<compile_context>
chip_gen: v7x
topology: tpu7x:2x2x1
jax: 0.10.0
libtpu: 0.0.40
codegen_flags: <defaults>
</compile_context>

<pallas_src>
import functools
import math

import jax
import jax.numpy as jnp
from jax.experimental import pallas as pl
from jax.experimental.pallas import tpu as pltpu


# ----------------------------------------------------------------------------
# helpers: tiling / padding
# ----------------------------------------------------------------------------

def _round_up(x, m):
    return (x + m - 1) // m * m


def _tile(dim, pref, align):
    """Pick (tile, padded_dim): tile == padded_dim if small, else pref."""
    dp = _round_up(dim, align)
    if dp <= pref:
        return dp, dp
    return pref, _round_up(dim, pref)


def _pad_dims(a, targets):
    pads = [(0, t - s) for s, t in zip(a.shape, targets)]
    if all(p == (0, 0) for p in pads):
        return a
    return jnp.pad(a, pads)


def _attn_tile_pref():
    # 256-wide tiles match the 2x256^2 MXU on v6e/v7x; keep 128 on v5e (and
    # older) whose MXU is 128-wide and whose default scoped VMEM is smaller.
    try:
        kind = jax.devices()[0].device_kind.lower()
    except Exception:  # pragma: no cover - device query should not fail
        kind = ""
    return 256 if ("v6" in kind or "v7" in kind) else 128


def _head_group(n_head, dh):
    """Smallest head group whose merged output width is lane-dense (%128==0);
    falls back to all heads (block == full model width) for tiny test dims."""
    for g in range(1, n_head + 1):
        if n_head % g == 0 and (g * dh) % 128 == 0:
            return g
    return n_head


# ----------------------------------------------------------------------------
# Tiled matmul kernel: y = act( LN?(x) @ w + b ) + residual   (all optional)
# ----------------------------------------------------------------------------

def _matmul_kernel(*args, nk, activation, has_bias, has_res, has_ln, k_true):
    idx = 0
    x_ref = args[idx]; idx += 1
    w_ref = args[idx]; idx += 1
    if has_ln:
        lng_ref, lnb_ref = args[idx], args[idx + 1]
        idx += 2
    b_ref = args[idx] if has_bias else None
    idx += int(has_bias)
    r_ref = args[idx] if has_res else None
    idx += int(has_res)
    o_ref, acc_ref = args[idx], args[idx + 1]

    k = pl.program_id(2)

    @pl.when(k == 0)
    def _():
        acc_ref[...] = jnp.zeros(acc_ref.shape, acc_ref.dtype)

    x = x_ref[...]
    if has_ln:
        # Fused LayerNorm prologue (only emitted when the whole K is one tile).
        # Zero-padded K columns drop out of the matmul because the matching w
        # rows are zero; mean / E[x^2] use the true K so padding is harmless.
        xf = x.astype(jnp.float32)
        inv_k = 1.0 / k_true
        mu = jnp.sum(xf, axis=-1, keepdims=True) * inv_k
        var = jnp.maximum(
            jnp.sum(xf * xf, axis=-1, keepdims=True) * inv_k - mu * mu, 0.0)
        xf = (xf - mu) * jax.lax.rsqrt(var + 1e-5)
        x = (xf * lng_ref[...] + lnb_ref[...]).astype(jnp.bfloat16)

    acc_ref[...] += jnp.dot(x, w_ref[...], preferred_element_type=jnp.float32)

    @pl.when(k == nk - 1)
    def _():
        y = acc_ref[...]
        if has_bias:
            y = y + b_ref[...].astype(jnp.float32)
        if has_res:
            y = y + r_ref[...].astype(jnp.float32)
        if activation == "gelu":
            # TODO(synk): PyTorch Whisper uses exact erf-GELU; tanh approx here
            # (erf has no guaranteed Mosaic lowering), ~1e-3 deviation.
            y = jax.nn.gelu(y, approximate=True)
        o_ref[...] = y.astype(o_ref.dtype)


def linear(x, w, b=None, residual=None, activation=None, ln=None,
           out_dtype=jnp.bfloat16, tm_pref=512, tn_pref=512, tk_pref=1024):
    """y = act(LN?(x) @ w + b) + residual.  x: (..., K), w: (K, N).

    `ln=(gamma, beta)` fuses a LayerNorm over the last axis of x into the
    matmul prologue (requires / forces a single K tile)."""
    orig_shape = x.shape
    K = orig_shape[-1]
    M = math.prod(orig_shape[:-1])
    N = w.shape[1]

    if ln is not None:                     # fused LN needs full K in one tile
        tk_pref = max(tk_pref, _round_up(K, 128))

    tm, Mp = _tile(M, tm_pref, 8)
    tn, Np = _tile(N, tn_pref, 128)
    tk, Kp = _tile(K, tk_pref, 128)
    nk = Kp // tk
    assert ln is None or nk == 1

    xp = _pad_dims(x.reshape(M, K), (Mp, Kp)).astype(jnp.bfloat16)
    wp = _pad_dims(w, (Kp, Np)).astype(jnp.bfloat16)

    inputs = [xp, wp]
    in_specs = [pl.BlockSpec((tm, tk), lambda i, j, k: (i, k)),
                pl.BlockSpec((tk, tn), lambda i, j, k: (k, j))]
    if ln is not None:
        g_ln, b_ln = ln
        inputs += [_pad_dims(g_ln.reshape(1, K).astype(jnp.float32), (1, Kp)),
                   _pad_dims(b_ln.reshape(1, K).astype(jnp.float32), (1, Kp))]
        in_specs += [pl.BlockSpec((1, tk), lambda i, j, k: (0, k)),
                     pl.BlockSpec((1, tk), lambda i, j, k: (0, k))]
    if b is not None:
        inputs.append(_pad_dims(b.reshape(1, N).astype(jnp.float32), (1, Np)))
        in_specs.append(pl.BlockSpec((1, tn), lambda i, j, k: (0, j)))
    if residual is not None:
        inputs.append(
            _pad_dims(residual.reshape(M, N).astype(jnp.bfloat16), (Mp, Np)))
        in_specs.append(pl.BlockSpec((tm, tn), lambda i, j, k: (i, j)))

    out = pl.pallas_call(
        functools.partial(_matmul_kernel, nk=nk, activation=activation,
                          has_bias=b is not None, has_res=residual is not None,
                          has_ln=ln is not None, k_true=float(K)),
        out_shape=jax.ShapeDtypeStruct((Mp, Np), out_dtype),
        grid_spec=pltpu.PrefetchScalarGridSpec(
            num_scalar_prefetch=0,
            grid=(Mp // tm, Np // tn, nk),
            in_specs=in_specs,
            out_specs=pl.BlockSpec((tm, tn), lambda i, j, k: (i, j)),
            scratch_shapes=[pltpu.VMEM((tm, tn), jnp.float32)]),
        compiler_params=pltpu.CompilerParams(
            dimension_semantics=("parallel", "parallel", "arbitrary"),
            vmem_limit_bytes=32 * 1024 * 1024),
    )(*inputs)

    out = out[:M, :N]
    return out.reshape(orig_shape[:-1] + (N,))


# ----------------------------------------------------------------------------
# Standalone row-tiled LayerNorm (only used for the encoder's ln_post)
# ----------------------------------------------------------------------------

def _layernorm_kernel(x_ref, g_ref, b_ref, o_ref):
    x = x_ref[...].astype(jnp.float32)
    mu = jnp.mean(x, axis=-1, keepdims=True)
    var = jnp.mean(jnp.square(x - mu), axis=-1, keepdims=True)
    y = (x - mu) * jax.lax.rsqrt(var + 1e-5)
    o_ref[...] = (y * g_ref[...] + b_ref[...]).astype(o_ref.dtype)


def layer_norm(x, g, b, tm_pref=512):
    shape = x.shape
    D = shape[-1]
    M = math.prod(shape[:-1])
    tm, Mp = _tile(M, tm_pref, 8)
    xp = _pad_dims(x.reshape(M, D), (Mp, D))

    out = pl.pallas_call(
        _layernorm_kernel,
        out_shape=jax.ShapeDtypeStruct((Mp, D), jnp.bfloat16),
        grid_spec=pltpu.PrefetchScalarGridSpec(
            num_scalar_prefetch=0,
            grid=(Mp // tm,),
            in_specs=[pl.BlockSpec((tm, D), lambda i: (i, 0)),
                      pl.BlockSpec((1, D), lambda i: (0, 0)),
                      pl.BlockSpec((1, D), lambda i: (0, 0))],
            out_specs=pl.BlockSpec((tm, D), lambda i: (i, 0))),
        compiler_params=pltpu.CompilerParams(dimension_semantics=("parallel",)),
    )(xp, g.reshape(1, D).astype(jnp.float32), b.reshape(1, D).astype(jnp.float32))
    return out[:M].reshape(shape)


# ----------------------------------------------------------------------------
# Flash attention: grid over (batch, head-group, q-tiles, kv-tiles),
# lane-dense output written straight into the merged (B, Lq, S) layout.
# The 1/sqrt(dh) scale is pre-folded into the Q projection weights.
# ----------------------------------------------------------------------------

def _flash_attn_kernel(q_ref, k_ref, v_ref, o_ref, m_sc, l_sc, acc_sc,
                       *, causal, lk, tq, tkv, nkv, g, dh):
    kv = pl.program_id(3)

    @pl.when(kv == 0)
    def _():
        m_sc[...] = jnp.full(m_sc.shape, -1e30, jnp.float32)
        l_sc[...] = jnp.zeros(l_sc.shape, jnp.float32)
        acc_sc[...] = jnp.zeros(acc_sc.shape, jnp.float32)

    q = q_ref[0]                                      # (g, tq, dh)  bf16
    k = k_ref[0]                                      # (g, tkv, dh) bf16
    v = v_ref[0]                                      # (g, tkv, dh) bf16

    s = jnp.einsum("hqd,hkd->hqk", q, k,
                   preferred_element_type=jnp.float32)  # (g, tq, tkv)

    need_mask = causal or (nkv * tkv != lk)
    if need_mask:
        col = kv * tkv + jax.lax.broadcasted_iota(jnp.int32, (tq, tkv), 1)
        valid = col < lk
        if causal:
            row = pl.program_id(2) * tq + jax.lax.broadcasted_iota(
                jnp.int32, (tq, tkv), 0)
            valid = jnp.logical_and(valid, col <= row)
        s = jnp.where(valid[None, :, :], s, -1e30)

    m_prev = m_sc[...]
    m_new = jnp.maximum(m_prev, jnp.max(s, axis=-1, keepdims=True))
    alpha = jnp.exp(m_prev - m_new)
    p = jnp.exp(s - m_new)
    l_sc[...] = alpha * l_sc[...] + jnp.sum(p, axis=-1, keepdims=True)
    acc_sc[...] = alpha * acc_sc[...] + jnp.einsum(
        "hqk,hkd->hqd", p.astype(v.dtype), v,
        preferred_element_type=jnp.float32)
    m_sc[...] = m_new

    @pl.when(kv == nkv - 1)
    def _():
        out = acc_sc[...] * pl.reciprocal(l_sc[...], approx=True)
        # Merge the head group into the lane-dense (tq, g*dh) output block.
        for h in range(g):
            o_ref[0, :, h * dh:(h + 1) * dh] = out[h].astype(o_ref.dtype)


def multi_head_attention(q, k, v, n_head, causal):
    """q: (B, Lq, S), k/v: (B, Lk, S) -> (B, Lq, S)   (bf16 in / bf16 out)."""
    B, Lq, S = q.shape
    Lk = k.shape[1]
    dh = S // n_head
    g = _head_group(n_head, dh)            # heads processed per grid step
    n_hp = n_head // g

    pref = _attn_tile_pref()
    tq, Lqp = _tile(Lq, pref, 8)
    tkv, Lkp = _tile(Lk, pref, 8)
    nq, nkv = Lqp // tq, Lkp // tkv

    # TODO(synk): the q/k/v head-split transposes remain in XLA; the output
    # merge transpose is eliminated by writing (B, Lq, S) directly.
    def split(t, L, Lp):
        t = t.reshape(B, L, n_head, dh).transpose(0, 2, 1, 3)   # (B, H, L, dh)
        return _pad_dims(t, (B, n_head, Lp, dh)).astype(jnp.bfloat16)

    qh = split(q, Lq, Lqp)
    kh = split(k, Lk, Lkp)
    vh = split(v, Lk, Lkp)

    out = pl.pallas_call(
        functools.partial(_flash_attn_kernel, causal=causal, lk=Lk,
                          tq=tq, tkv=tkv, nkv=nkv, g=g, dh=dh),
        out_shape=jax.ShapeDtypeStruct((B, Lqp, S), jnp.bfloat16),
        grid_spec=pltpu.PrefetchScalarGridSpec(
            num_scalar_prefetch=0,
            grid=(B, n_hp, nq, nkv),
            in_specs=[
                pl.BlockSpec((1, g, tq, dh), lambda b, hp, qi, ki: (b, hp, qi, 0)),
                pl.BlockSpec((1, g, tkv, dh), lambda b, hp, qi, ki: (b, hp, ki, 0)),
                pl.BlockSpec((1, g, tkv, dh), lambda b, hp, qi, ki: (b, hp, ki, 0)),
            ],
            out_specs=pl.BlockSpec((1, tq, g * dh),
                                   lambda b, hp, qi, ki: (b, qi, hp)),
            scratch_shapes=[pltpu.VMEM((g, tq, 1), jnp.float32),
                            pltpu.VMEM((g, tq, 1), jnp.float32),
                            pltpu.VMEM((g, tq, dh), jnp.float32)]),
        compiler_params=pltpu.CompilerParams(
            dimension_semantics=("parallel", "parallel", "parallel",
                                 "arbitrary")),
    )(qh, kh, vh)

    return out[:, :Lq, :]


# ----------------------------------------------------------------------------
# Conv1d (kernel=3, padding=1): all taps folded into one matmul reduction
# ----------------------------------------------------------------------------

def conv1d(x_btc, w, b, stride, activation=None):
    """x_btc: (B, T, Cin).  w: (Cout, Cin, K) PyTorch layout.  b: (Cout,)."""
    B, T, Cin = x_btc.shape
    Cout, _, K = w.shape
    pad = (K - 1) // 2
    x_pad = jnp.pad(x_btc, ((0, 0), (pad, pad), (0, 0)))
    T_out = (T + 2 * pad - K) // stride + 1
    # Fold the K taps into the matmul reduction axis: one kernel, one output
    # write (no 3x residual round-trips of the (B, T_out, Cout) activation).
    taps = [x_pad[:, k::stride, :][:, :T_out, :] for k in range(K)]
    xcat = jnp.concatenate(taps, axis=-1)                       # (B, T_out, K*Cin)
    wcat = jnp.transpose(w, (2, 1, 0)).reshape(K * Cin, Cout)   # (K*Cin, Cout)
    return linear(xcat, wcat, b, activation=activation)         # (B, T_out, Cout)


# ----------------------------------------------------------------------------
# Whisper architecture (glue in plain JAX, compute in Pallas kernels)
# ----------------------------------------------------------------------------

def residual_attention_block(x, p, n_head, causal, xa=None):
    B, L, S = x.shape

    # self attention: LN fused into the QKV matmul, residual fused in o-proj
    qkv = linear(x, p["attn_qkv_w"], p["attn_qkv_b"],
                 ln=(p["attn_ln_g"], p["attn_ln_b"]))
    q, k, v = qkv[..., :S], qkv[..., S:2 * S], qkv[..., 2 * S:]
    a = multi_head_attention(q, k, v, n_head, causal=causal)
    x = linear(a, p["attn_o_w"], p["attn_o_b"], residual=x)

    if xa is not None:  # cross attention onto audio features
        q = linear(x, p["cross_q_w"], p["cross_q_b"],
                   ln=(p["cross_ln_g"], p["cross_ln_b"]))
        kv = linear(xa, p["cross_kv_w"], p["cross_kv_b"])
        k, v = kv[..., :S], kv[..., S:]
        a = multi_head_attention(q, k, v, n_head, causal=False)
        x = linear(a, p["cross_o_w"], p["cross_o_b"], residual=x)

    # MLP: LN fused into mlp1, residual fused into mlp2
    h = linear(x, p["mlp1_w"], p["mlp1_b"], activation="gelu",
               ln=(p["mlp_ln_g"], p["mlp_ln_b"]))
    x = linear(h, p["mlp2_w"], p["mlp2_b"], residual=x)
    return x


def encoder_forward(mel_nct, p, n_head):
    # mel_nct: (B, n_mels, T) PyTorch NCT -> channel-last for TPU lanes
    x = jnp.transpose(mel_nct, (0, 2, 1))                       # (B, T, n_mels)
    x = conv1d(x, p["conv1_w"], p["conv1_b"], stride=1, activation="gelu")
    x = conv1d(x, p["conv2_w"], p["conv2_b"], stride=2, activation="gelu")
    x = x + p["pos"]                                            # sinusoidal pos-emb
    for blk in p["blocks"]:
        x = residual_attention_block(x, blk, n_head, causal=False)
    return layer_norm(x, p["ln_post_g"], p["ln_post_b"])        # (B, n_audio_ctx, S)


def decoder_forward(tokens, audio_features, p, n_head):
    B, L = tokens.shape
    x = jnp.take(p["tok_emb"], tokens, axis=0) + p["pos"][:L]   # offset = 0
    for blk in p["blocks"]:
        x = residual_attention_block(x, blk, n_head, causal=True,
                                     xa=audio_features)
    # final LN fused into the logits matmul; logits kept in f32
    logits = linear(x, p["tok_emb_T"], None, ln=(p["ln_g"], p["ln_b"]),
                    out_dtype=jnp.float32)
    return logits                                               # (B, L, n_vocab)


def whisper_forward(mel, tokens, params, dims):
    # Mirrors Whisper.forward: new_kv_cache() is all-zeros with offset=0, i.e.
    # semantically empty -- no cache tensor is materialized here.
    audio_features = encoder_forward(mel, params["encoder"],
                                     dims["n_audio_head"])
    return decoder_forward(tokens, audio_features, params["decoder"],
                           dims["n_text_head"])


# ----------------------------------------------------------------------------
# Deterministic parameter init (synthetic weights; OpenVINO blobs not loadable)
# ----------------------------------------------------------------------------

def _normal(key, shape, scale=0.02):
    return scale * jax.random.normal(key, shape, jnp.float32)


def sinusoids(length, channels, max_timescale=10000.0):
    log_inc = math.log(max_timescale) / (channels // 2 - 1)
    inv_ts = jnp.exp(-log_inc * jnp.arange(channels // 2, dtype=jnp.float32))
    t = jnp.arange(length, dtype=jnp.float32)[:, None] * inv_ts[None, :]
    return jnp.concatenate([jnp.sin(t), jnp.cos(t)], axis=1)


def init_block(key, S, n_head, cross):
    ks = jax.random.split(key, 8)
    scale = (S // n_head) ** -0.5   # softmax scale folded into the Q weights

    # fused QKV; Whisper's K projection has no bias -> its bias slice is 0
    qkv_w = _normal(ks[0], (S, 3 * S))
    qkv_w = qkv_w.at[:, :S].multiply(scale)

    p = {
        "attn_ln_g": jnp.ones((S,)), "attn_ln_b": jnp.zeros((S,)),
        "attn_qkv_w": qkv_w.astype(jnp.bfloat16),
        "attn_qkv_b": jnp.zeros((3 * S,)),
        "attn_o_w": _normal(ks[1], (S, S)).astype(jnp.bfloat16),
        "attn_o_b": jnp.zeros((S,)),
        "mlp_ln_g": jnp.ones((S,)), "mlp_ln_b": jnp.zeros((S,)),
        "mlp1_w": _normal(ks[2], (S, 4 * S)).astype(jnp.bfloat16),
        "mlp1_b": jnp.zeros((4 * S,)),
        "mlp2_w": _normal(ks[3], (4 * S, S)).astype(jnp.bfloat16),
        "mlp2_b": jnp.zeros((S,)),
    }
    if cross:
        p.update({
            "cross_ln_g": jnp.ones((S,)), "cross_ln_b": jnp.zeros((S,)),
            "cross_q_w": (_normal(ks[4], (S, S)) * scale).astype(jnp.bfloat16),
            "cross_q_b": jnp.zeros((S,)),
            "cross_kv_w": _normal(ks[5], (S, 2 * S)).astype(jnp.bfloat16),
            "cross_kv_b": jnp.zeros((2 * S,)),
            "cross_o_w": _normal(ks[6], (S, S)).astype(jnp.bfloat16),
            "cross_o_b": jnp.zeros((S,)),
        })
    return p


def init_params(key, dims):
    Sa, St = dims["n_audio_state"], dims["n_text_state"]
    k_enc, k_dec = jax.random.split(key)

    ke = jax.random.split(k_enc, 2 + dims["n_audio_layer"])
    encoder = {
        "conv1_w": _normal(ke[0], (Sa, dims["n_mels"], 3)),
        "conv1_b": jnp.zeros((Sa,)),
        "conv2_w": _normal(ke[1], (Sa, Sa, 3)),
        "conv2_b": jnp.zeros((Sa,)),
        "pos": sinusoids(dims["n_audio_ctx"], Sa).astype(jnp.bfloat16),
        "blocks": [init_block(ke[2 + i], Sa, dims["n_audio_head"], cross=False)
                   for i in range(dims["n_audio_layer"])],
        "ln_post_g": jnp.ones((Sa,)), "ln_post_b": jnp.zeros((Sa,)),
    }

    kd = jax.random.split(k_dec, 2 + dims["n_text_layer"])
    tok_emb = _normal(kd[0], (dims["n_vocab"], St))
    decoder = {
        "tok_emb": tok_emb.astype(jnp.bfloat16),
        "tok_emb_T": jnp.transpose(tok_emb).astype(jnp.bfloat16),  # cached once
        "pos": _normal(kd[1], (dims["n_text_ctx"], St)).astype(jnp.bfloat16),
        "blocks": [init_block(kd[2 + i], St, dims["n_text_head"], cross=True)
                   for i in range(dims["n_text_layer"])],
        "ln_g": jnp.ones((St,)), "ln_b": jnp.zeros((St,)),
    }
    return {"encoder": encoder, "decoder": decoder}


# ----------------------------------------------------------------------------
# Main
# ----------------------------------------------------------------------------

if __name__ == "__main__":
    # TODO(synk): the original module runs OpenVINO compiled graphs; weights
    # here are synthetic, but the forward-pass structure/shapes match Whisper.
    T_MEL = 16
    dims = dict(
        n_mels=16, n_audio_ctx=T_MEL // 2, n_audio_state=32, n_audio_head=4,
        n_audio_layer=2, n_vocab=64, n_text_ctx=8, n_text_state=32,
        n_text_head=4, n_text_layer=2,
    )

    key = jax.random.PRNGKey(0)
    k_params, k_mel, k_tok = jax.random.split(key, 3)

    params = init_params(k_params, dims)
    mel = jax.random.normal(k_mel, (2, dims["n_mels"], T_MEL), jnp.float32)   # NCT
    tokens = jax.random.randint(k_tok, (2, dims["n_text_ctx"]), 0,
                                dims["n_vocab"], dtype=jnp.int32)

    fwd = jax.jit(functools.partial(whisper_forward, dims=dims))
    logits = fwd(mel, tokens, params)
    logits = jax.block_until_ready(logits)

    assert logits.shape == (2, dims["n_text_ctx"], dims["n_vocab"]), logits.shape
    assert bool(jnp.all(jnp.isfinite(logits)))
    print("KERNEL_OK")
</pallas_src>

<mosaic_0001>
module attributes {stable_mosaic.version = 11 : i64} {
  func.func @_matmul_kernel(%arg0: i32, %arg1: i32, %arg2: i32, %arg3: memref<32x128xbf16, #tpu.memory_space<vmem>>, %arg4: memref<128x128xbf16, #tpu.memory_space<vmem>>, %arg5: memref<1x128xf32, #tpu.memory_space<vmem>>, %arg6: memref<32x128xbf16, #tpu.memory_space<vmem>>, %arg7: memref<32x128xf32, #tpu.memory_space<vmem>>) attributes {dimension_semantics = [#tpu.dimension_semantics<parallel>, #tpu.dimension_semantics<parallel>, #tpu.dimension_semantics<arbitrary>], iteration_bounds = array<i64: 1, 1, 1>, scalar_prefetch = 0 : i64, scratch_operands = 1 : i64, tpu.core_type = #tpu.core_type<tc>, window_params = [{transform_indices = @transform_0, window_bounds = array<i64: 32, 128>}, {transform_indices = @transform_1, window_bounds = array<i64: 128, 128>}, {transform_indices = @transform_2, window_bounds = array<i64: 1, 128>}, {transform_indices = @transform_3, window_bounds = array<i64: 32, 128>}]} {
    %c0_i32 = arith.constant 0 : i32
    %0 = arith.cmpi eq, %arg2, %c0_i32 : i32
    %1 = arith.extui %0 : i1 to i32
    %c0_i32_0 = arith.constant 0 : i32
    %2 = arith.cmpi ne, %1, %c0_i32_0 : i32
    scf.if %2 {
      %cst_10 = arith.constant 0.000000e+00 : f32
      %12 = vector.broadcast %cst_10 : f32 to vector<32x128xf32>
      %c0_11 = arith.constant 0 : index
      %c0_12 = arith.constant 0 : index
      %13 = vector.load %arg7[%c0_11, %c0_12] : memref<32x128xf32, #tpu.memory_space<vmem>>, vector<32x128xf32>
      tpu.vector_store %arg7[%c0_11, %c0_12], %12 {strides = array<i32>} : memref<32x128xf32, #tpu.memory_space<vmem>>, vector<32x128xf32>,
    } else {
    }
    %c0 = arith.constant 0 : index
    %c0_1 = arith.constant 0 : index
    %3 = vector.load %arg3[%c0, %c0_1] : memref<32x128xbf16, #tpu.memory_space<vmem>>, vector<32x128xbf16>
    %c0_2 = arith.constant 0 : index
    %c0_3 = arith.constant 0 : index
    %4 = vector.load %arg7[%c0_2, %c0_3] : memref<32x128xf32, #tpu.memory_space<vmem>>, vector<32x128xf32>
    %c0_4 = arith.constant 0 : index
    %c0_5 = arith.constant 0 : index
    %5 = vector.load %arg4[%c0_4, %c0_5] : memref<128x128xbf16, #tpu.memory_space<vmem>>, vector<128x128xbf16>
    %cst = arith.constant dense<0.000000e+00> : vector<32x128xf32>
    %6 = tpu.matmul %3, %5, %cst {dimension_numbers = #tpu.dot_dimension_numbers<[1], [0], [0], [1], [0, 0, 1, 1], [], []>} : vector<32x128xbf16>, vector<128x128xbf16>, vector<32x128xf32> -> vector<32x128xf32>
    %7 = arith.addf %4, %6 : vector<32x128xf32>
    %c0_6 = arith.constant 0 : index
    %c0_7 = arith.constant 0 : index
    %8 = vector.load %arg7[%c0_6, %c0_7] : memref<32x128xf32, #tpu.memory_space<vmem>>, vector<32x128xf32>
    tpu.vector_store %arg7[%c0_6, %c0_7], %7 {strides = array<i32>} : memref<32x128xf32, #tpu.memory_space<vmem>>, vector<32x128xf32>,
    %c0_i32_8 = arith.constant 0 : i32
    %9 = arith.cmpi eq, %arg2, %c0_i32_8 : i32
    %10 = arith.extui %9 : i1 to i32
    %c0_i32_9 = arith.constant 0 : i32
    %11 = arith.cmpi ne, %10, %c0_i32_9 : i32
    scf.if %11 {
      %c0_10 = arith.constant 0 : index
      %c0_11 = arith.constant 0 : index
      %12 = vector.load %arg7[%c0_10, %c0_11] : memref<32x128xf32, #tpu.memory_space<vmem>>, vector<32x128xf32>
      %c0_12 = arith.constant 0 : index
      %c0_13 = arith.constant 0 : index
      %13 = vector.load %arg5[%c0_12, %c0_13] : memref<1x128xf32, #tpu.memory_space<vmem>>, vector<1x128xf32>
      %14 = vector.broadcast %13 : vector<1x128xf32> to vector<32x128xf32>
      %15 = arith.addf %12, %14 : vector<32x128xf32>
      %16 = arith.mulf %15, %15 : vector<32x128xf32>
      %17 = arith.mulf %15, %16 : vector<32x128xf32>
      %cst_14 = arith.constant 4.471500e-02 : f32
      %18 = vector.broadcast %cst_14 : f32 to vector<32x128xf32>
      %19 = arith.mulf %18, %17 : vector<32x128xf32>
      %20 = arith.addf %15, %19 : vector<32x128xf32>
      %cst_15 = arith.constant 0.797884583 : f32
      %21 = vector.broadcast %cst_15 : f32 to vector<32x128xf32>
      %22 = arith.mulf %21, %20 : vector<32x128xf32>
      %23 = math.tanh %22 : vector<32x128xf32>
      %cst_16 = arith.constant 1.000000e+00 : f32
      %24 = vector.broadcast %cst_16 : f32 to vector<32x128xf32>
      %25 = arith.addf %24, %23 : vector<32x128xf32>
      %cst_17 = arith.constant 5.000000e-01 : f32
      %26 = vector.broadcast %cst_17 : f32 to vector<32x128xf32>
      %27 = arith.mulf %26, %25 : vector<32x128xf32>
      %28 = arith.mulf %15, %27 : vector<32x128xf32>
      %29 = arith.truncf %28 : vector<32x128xf32> to vector<32x128xbf16>
      %c0_18 = arith.constant 0 : index
      %c0_19 = arith.constant 0 : index
      %30 = vector.load %arg6[%c0_18, %c0_19] : memref<32x128xbf16, #tpu.memory_space<vmem>>, vector<32x128xbf16>
      tpu.vector_store %arg6[%c0_18, %c0_19], %29 {strides = array<i32>} : memref<32x128xbf16, #tpu.memory_space<vmem>>, vector<32x128xbf16>,
    } else {
    }
    return
  }
  func.func @transform_0(%arg0: i32, %arg1: i32, %arg2: i32) -> (i32, i32) {
    %c0_i32 = arith.constant 0 : i32
    return %arg0, %arg2 : i32, i32
  }
  func.func @transform_1(%arg0: i32, %arg1: i32, %arg2: i32) -> (i32, i32) {
    %c0_i32 = arith.constant 0 : i32
    return %arg2, %arg1 : i32, i32
  }
  func.func @transform_2(%arg0: i32, %arg1: i32, %arg2: i32) -> (i32, i32) {
    %c0_i32 = arith.constant 0 : i32
    %c0_i32_0 = arith.constant 0 : i32
    return %c0_i32, %arg1 : i32, i32
  }
  func.func @transform_3(%arg0: i32, %arg1: i32, %arg2: i32) -> (i32, i32) {
    %c0_i32 = arith.constant 0 : i32
    return %arg0, %arg1 : i32, i32
  }
}

module attributes {stable_mosaic.version = 11 : i64} {
  func.func @_matmul_kernel(%arg0: i32, %arg1: i32, %arg2: i32, %arg3: memref<16x128xbf16, #tpu.memory_space<vmem>>, %arg4: memref<128x128xbf16, #tpu.memory_space<vmem>>, %arg5: memref<1x128xf32, #tpu.memory_space<vmem>>, %arg6: memref<16x128xbf16, #tpu.memory_space<vmem>>, %arg7: memref<16x128xf32, #tpu.memory_space<vmem>>) attributes {dimension_semantics = [#tpu.dimension_semantics<parallel>, #tpu.dimension_semantics<parallel>, #tpu.dimension_semantics<arbitrary>], iteration_bounds = array<i64: 1, 1, 1>, scalar_prefetch = 0 : i64, scratch_operands = 1 : i64, tpu.core_type = #tpu.core_type<tc>, window_params = [{transform_indices = @transform_0, window_bounds = array<i64: 16, 128>}, {transform_indices = @transform_1, window_bounds = array<i64: 128, 128>}, {transform_indices = @transform_2, window_bounds = array<i64: 1, 128>}, {transform_indices = @transform_3, window_bounds = array<i64: 16, 128>}]} {
    %c0_i32 = arith.constant 0 : i32
    %0 = arith.cmpi eq, %arg2, %c0_i32 : i32
    %1 = arith.extui %0 : i1 to i32
    %c0_i32_0 = arith.constant 0 : i32
    %2 = arith.cmpi ne, %1, %c0_i32_0 : i32
    scf.if %2 {
      %cst_10 = arith.constant 0.000000e+00 : f32
      %12 = vector.broadcast %cst_10 : f32 to vector<16x128xf32>
      %c0_11 = arith.constant 0 : index
      %c0_12 = arith.constant 0 : index
      %13 = vector.load %arg7[%c0_11, %c0_12] : memref<16x128xf32, #tpu.memory_space<vmem>>, vector<16x128xf32>
      tpu.vector_store %arg7[%c0_11, %c0_12], %12 {strides = array<i32>} : memref<16x128xf32, #tpu.memory_space<vmem>>, vector<16x128xf32>,
    } else {
    }
    %c0 = arith.constant 0 : index
    %c0_1 = arith.constant 0 : index
    %3 = vector.load %arg3[%c0, %c0_1] : memref<16x128xbf16, #tpu.memory_space<vmem>>, vector<16x128xbf16>
    %c0_2 = arith.constant 0 : index
    %c0_3 = arith.constant 0 : index
    %4 = vector.load %arg7[%c0_2, %c0_3] : memref<16x128xf32, #tpu.memory_space<vmem>>, vector<16x128xf32>
    %c0_4 = arith.constant 0 : index
    %c0_5 = arith.constant 0 : index
    %5 = vector.load %arg4[%c0_4, %c0_5] : memref<128x128xbf16, #tpu.memory_space<vmem>>, vector<128x128xbf16>
    %cst = arith.constant dense<0.000000e+00> : vector<16x128xf32>
    %6 = tpu.matmul %3, %5, %cst {dimension_numbers = #tpu.dot_dimension_numbers<[1], [0], [0], [1], [0, 0, 1, 1], [], []>} : vector<16x128xbf16>, vector<128x128xbf16>, vector<16x128xf32> -> vector<16x128xf32>
    %7 = arith.addf %4, %6 : vector<16x128xf32>
    %c0_6 = arith.constant 0 : index
    %c0_7 = arith.constant 0 : index
    %8 = vector.load %arg7[%c0_6, %c0_7] : memref<16x128xf32, #tpu.memory_space<vmem>>, vector<16x128xf32>
    tpu.vector_store %arg7[%c0_6, %c0_7], %7 {strides = array<i32>} : memref<16x128xf32, #tpu.memory_space<vmem>>, vector<16x128xf32>,
    %c0_i32_8 = arith.constant 0 : i32
    %9 = arith.cmpi eq, %arg2, %c0_i32_8 : i32
    %10 = arith.extui %9 : i1 to i32
    %c0_i32_9 = arith.constant 0 : i32
    %11 = arith.cmpi ne, %10, %c0_i32_9 : i32
    scf.if %11 {
      %c0_10 = arith.constant 0 : index
      %c0_11 = arith.constant 0 : index
      %12 = vector.load %arg7[%c0_10, %c0_11] : memref<16x128xf32, #tpu.memory_space<vmem>>, vector<16x128xf32>
      %c0_12 = arith.constant 0 : index
      %c0_13 = arith.constant 0 : index
      %13 = vector.load %arg5[%c0_12, %c0_13] : memref<1x128xf32, #tpu.memory_space<vmem>>, vector<1x128xf32>
      %14 = vector.broadcast %13 : vector<1x128xf32> to vector<16x128xf32>
      %15 = arith.addf %12, %14 : vector<16x128xf32>
      %16 = arith.mulf %15, %15 : vector<16x128xf32>
      %17 = arith.mulf %15, %16 : vector<16x128xf32>
      %cst_14 = arith.constant 4.471500e-02 : f32
      %18 = vector.broadcast %cst_14 : f32 to vector<16x128xf32>
      %19 = arith.mulf %18, %17 : vector<16x128xf32>
      %20 = arith.addf %15, %19 : vector<16x128xf32>
      %cst_15 = arith.constant 0.797884583 : f32
      %21 = vector.broadcast %cst_15 : f32 to vector<16x128xf32>
      %22 = arith.mulf %21, %20 : vector<16x128xf32>
      %23 = math.tanh %22 : vector<16x128xf32>
      %cst_16 = arith.constant 1.000000e+00 : f32
      %24 = vector.broadcast %cst_16 : f32 to vector<16x128xf32>
      %25 = arith.addf %24, %23 : vector<16x128xf32>
      %cst_17 = arith.constant 5.000000e-01 : f32
      %26 = vector.broadcast %cst_17 : f32 to vector<16x128xf32>
      %27 = arith.mulf %26, %25 : vector<16x128xf32>
      %28 = arith.mulf %15, %27 : vector<16x128xf32>
      %29 = arith.truncf %28 : vector<16x128xf32> to vector<16x128xbf16>
      %c0_18 = arith.constant 0 : index
      %c0_19 = arith.constant 0 : index
      %30 = vector.load %arg6[%c0_18, %c0_19] : memref<16x128xbf16, #tpu.memory_space<vmem>>, vector<16x128xbf16>
      tpu.vector_store %arg6[%c0_18, %c0_19], %29 {strides = array<i32>} : memref<16x128xbf16, #tpu.memory_space<vmem>>, vector<16x128xbf16>,
    } else {
    }
    return
  }
  func.func @transform_0(%arg0: i32, %arg1: i32, %arg2: i32) -> (i32, i32) {
    %c0_i32 = arith.constant 0 : i32
    return %arg0, %arg2 : i32, i32
  }
  func.func @transform_1(%arg0: i32, %arg1: i32, %arg2: i32) -> (i32, i32) {
    %c0_i32 = arith.constant 0 : i32
    return %arg2, %arg1 : i32, i32
  }
  func.func @transform_2(%arg0: i32, %arg1: i32, %arg2: i32) -> (i32, i32) {
    %c0_i32 = arith.constant 0 : i32
    %c0_i32_0 = arith.constant 0 : i32
    return %c0_i32, %arg1 : i32, i32
  }
  func.func @transform_3(%arg0: i32, %arg1: i32, %arg2: i32) -> (i32, i32) {
    %c0_i32 = arith.constant 0 : i32
    return %arg0, %arg1 : i32, i32
  }
}

module attributes {stable_mosaic.version = 11 : i64} {
  func.func @_matmul_kernel(%arg0: i32, %arg1: i32, %arg2: i32, %arg3: memref<16x128xbf16, #tpu.memory_space<vmem>>, %arg4: memref<128x128xbf16, #tpu.memory_space<vmem>>, %arg5: memref<1x128xf32, #tpu.memory_space<vmem>>, %arg6: memref<1x128xf32, #tpu.memory_space<vmem>>, %arg7: memref<1x128xf32, #tpu.memory_space<vmem>>, %arg8: memref<16x128xbf16, #tpu.memory_space<vmem>>, %arg9: memref<16x128xf32, #tpu.memory_space<vmem>>) attributes {dimension_semantics = [#tpu.dimension_semantics<parallel>, #tpu.dimension_semantics<parallel>, #tpu.dimension_semantics<arbitrary>], iteration_bounds = array<i64: 1, 1, 1>, scalar_prefetch = 0 : i64, scratch_operands = 1 : i64, tpu.core_type = #tpu.core_type<tc>, window_params = [{transform_indices = @transform_0, window_bounds = array<i64: 16, 128>}, {transform_indices = @transform_1, window_bounds = array<i64: 128, 128>}, {transform_indices = @transform_2, window_bounds = array<i64: 1, 128>}, {transform_indices = @transform_3, window_bounds = array<i64: 1, 128>}, {transform_indices = @transform_4, window_bounds = array<i64: 1, 128>}, {transform_indices = @transform_5, window_bounds = array<i64: 16, 128>}]} {
    %c0_i32 = arith.constant 0 : i32
    %0 = arith.cmpi eq, %arg2, %c0_i32 : i32
    %1 = arith.extui %0 : i1 to i32
    %c0_i32_0 = arith.constant 0 : i32
    %2 = arith.cmpi ne, %1, %c0_i32_0 : i32
    scf.if %2 {
      %cst_20 = arith.constant 0.000000e+00 : f32
      %40 = vector.broadcast %cst_20 : f32 to vector<16x128xf32>
      %c0_21 = arith.constant 0 : index
      %c0_22 = arith.constant 0 : index
      %41 = vector.load %arg9[%c0_21, %c0_22] : memref<16x128xf32, #tpu.memory_space<vmem>>, vector<16x128xf32>
      tpu.vector_store %arg9[%c0_21, %c0_22], %40 {strides = array<i32>} : memref<16x128xf32, #tpu.memory_space<vmem>>, vector<16x128xf32>,
    } else {
    }
    %c0 = arith.constant 0 : index
    %c0_1 = arith.constant 0 : index
    %3 = vector.load %arg3[%c0, %c0_1] : memref<16x128xbf16, #tpu.memory_space<vmem>>, vector<16x128xbf16>
    %4 = arith.extf %3 : vector<16x128xbf16> to vector<16x128xf32>
    %cst = arith.constant dense<0.000000e+00> : vector<16xf32>
    %5 = vector.multi_reduction <add>, %4, %cst [1] : vector<16x128xf32> to vector<16xf32>
    %6 = vector.shape_cast %5 : vector<16xf32> to vector<16x1xf32>
    %cst_2 = arith.constant 3.125000e-02 : f32
    %7 = vector.broadcast %cst_2 : f32 to vector<16x1xf32>
    %8 = arith.mulf %6, %7 : vector<16x1xf32>
    %9 = arith.mulf %4, %4 : vector<16x128xf32>
    %cst_3 = arith.constant dense<0.000000e+00> : vector<16xf32>
    %10 = vector.multi_reduction <add>, %9, %cst_3 [1] : vector<16x128xf32> to vector<16xf32>
    %11 = vector.shape_cast %10 : vector<16xf32> to vector<16x1xf32>
    %cst_4 = arith.constant 3.125000e-02 : f32
    %12 = vector.broadcast %cst_4 : f32 to vector<16x1xf32>
    %13 = arith.mulf %11, %12 : vector<16x1xf32>
    %14 = arith.mulf %8, %8 : vector<16x1xf32>
    %15 = arith.subf %13, %14 : vector<16x1xf32>
    %cst_5 = arith.constant 0.000000e+00 : f32
    %16 = vector.broadcast %cst_5 : f32 to vector<16x1xf32>
    %17 = arith.maximumf %15, %16 : vector<16x1xf32>
    %18 = vector.broadcast %8 : vector<16x1xf32> to vector<16x128xf32>
    %19 = arith.subf %4, %18 : vector<16x128xf32>
    %cst_6 = arith.constant 9.99999974E-6 : f32
    %20 = vector.broadcast %cst_6 : f32 to vector<16x1xf32>
    %21 = arith.addf %17, %20 : vector<16x1xf32>
    %22 = math.rsqrt %21 : vector<16x1xf32>
    %23 = vector.broadcast %22 : vector<16x1xf32> to vector<16x128xf32>
    %24 = arith.mulf %19, %23 : vector<16x128xf32>
    %c0_7 = arith.constant 0 : index
    %c0_8 = arith.constant 0 : index
    %25 = vector.load %arg5[%c0_7, %c0_8] : memref<1x128xf32, #tpu.memory_space<vmem>>, vector<1x128xf32>
    %26 = vector.broadcast %25 : vector<1x128xf32> to vector<16x128xf32>
    %27 = arith.mulf %24, %26 : vector<16x128xf32>
    %c0_9 = arith.constant 0 : index
    %c0_10 = arith.constant 0 : index
    %28 = vector.load %arg6[%c0_9, %c0_10] : memref<1x128xf32, #tpu.memory_space<vmem>>, vector<1x128xf32>
    %29 = vector.broadcast %28 : vector<1x128xf32> to vector<16x128xf32>
    %30 = arith.addf %27, %29 : vector<16x128xf32>
    %31 = arith.truncf %30 : vector<16x128xf32> to vector<16x128xbf16>
    %c0_11 = arith.constant 0 : index
    %c0_12 = arith.constant 0 : index
    %32 = vector.load %arg9[%c0_11, %c0_12] : memref<16x128xf32, #tpu.memory_space<vmem>>, vector<16x128xf32>
    %c0_13 = arith.constant 0 : index
    %c0_14 = arith.constant 0 : index
    %33 = vector.load %arg4[%c0_13, %c0_14] : memref<128x128xbf16, #tpu.memory_space<vmem>>, vector<128x128xbf16>
    %cst_15 = arith.constant dense<0.000000e+00> : vector<16x128xf32>
    %34 = tpu.matmul %31, %33, %cst_15 {dimension_numbers = #tpu.dot_dimension_numbers<[1], [0], [0], [1], [0, 0, 1, 1], [], []>} : vector<16x128xbf16>, vector<128x128xbf16>, vector<16x128xf32> -> vector<16x128xf32>
    %35 = arith.addf %32, %34 : vector<16x128xf32>
    %c0_16 = arith.constant 0 : index
    %c0_17 = arith.constant 0 : index
    %36 = vector.load %arg9[%c0_16, %c0_17] : memref<16x128xf32, #tpu.memory_space<vmem>>, vector<16x128xf32>
    tpu.vector_store %arg9[%c0_16, %c0_17], %35 {strides = array<i32>} : memref<16x128xf32, #tpu.memory_space<vmem>>, vector<16x128xf32>,
    %c0_i32_18 = arith.constant 0 : i32
    %37 = arith.cmpi eq, %arg2, %c0_i32_18 : i32
    %38 = arith.extui %37 : i1 to i32
    %c0_i32_19 = arith.constant 0 : i32
    %39 = arith.cmpi ne, %38, %c0_i32_19 : i32
    scf.if %39 {
      %c0_20 = arith.constant 0 : index
      %c0_21 = arith.constant 0 : index
      %40 = vector.load %arg9[%c0_20, %c0_21] : memref<16x128xf32, #tpu.memory_space<vmem>>, vector<16x128xf32>
      %c0_22 = arith.constant 0 : index
      %c0_23 = arith.constant 0 : index
      %41 = vector.load %arg7[%c0_22, %c0_23] : memref<1x128xf32, #tpu.memory_space<vmem>>, vector<1x128xf32>
      %42 = vector.broadcast %41 : vector<1x128xf32> to vector<16x128xf32>
      %43 = arith.addf %40, %42 : vector<16x128xf32>
      %44 = arith.truncf %43 : vector<16x128xf32> to vector<16x128xbf16>
      %c0_24 = arith.constant 0 : index
      %c0_25 = arith.constant 0 : index
      %45 = vector.load %arg8[%c0_24, %c0_25] : memref<16x128xbf16, #tpu.memory_space<vmem>>, vector<16x128xbf16>
      tpu.vector_store %arg8[%c0_24, %c0_25], %44 {strides = array<i32>} : memref<16x128xbf16, #tpu.memory_space<vmem>>, vector<16x128xbf16>,
    } else {
    }
    return
  }
  func.func @transform_0(%arg0: i32, %arg1: i32, %arg2: i32) -> (i32, i32) {
    %c0_i32 = arith.constant 0 : i32
    return %arg0, %arg2 : i32, i32
  }
  func.func @transform_1(%arg0: i32, %arg1: i32, %arg2: i32) -> (i32, i32) {
    %c0_i32 = arith.constant 0 : i32
    return %arg2, %arg1 : i32, i32
  }
  func.func @transform_2(%arg0: i32, %arg1: i32, %arg2: i32) -> (i32, i32) {
    %c0_i32 = arith.constant 0 : i32
    %c0_i32_0 = arith.constant 0 : i32
    return %c0_i32, %arg2 : i32, i32
  }
  func.func @transform_3(%arg0: i32, %arg1: i32, %arg2: i32) -> (i32, i32) {
    %c0_i32 = arith.constant 0 : i32
    %c0_i32_0 = arith.constant 0 : i32
    return %c0_i32, %arg2 : i32, i32
  }
  func.func @transform_4(%arg0: i32, %arg1: i32, %arg2: i32) -> (i32, i32) {
    %c0_i32 = arith.constant 0 : i32
    %c0_i32_0 = arith.constant 0 : i32
    return %c0_i32, %arg1 : i32, i32
  }
  func.func @transform_5(%arg0: i32, %arg1: i32, %arg2: i32) -> (i32, i32) {
    %c0_i32 = arith.constant 0 : i32
    return %arg0, %arg1 : i32, i32
  }
}

module attributes {stable_mosaic.version = 11 : i64} {
  func.func @_flash_attn_kernel(%arg0: i32, %arg1: i32, %arg2: i32, %arg3: i32, %arg4: memref<1x4x8x8xbf16, #tpu.memory_space<vmem>>, %arg5: memref<1x4x8x8xbf16, #tpu.memory_space<vmem>>, %arg6: memref<1x4x8x8xbf16, #tpu.memory_space<vmem>>, %arg7: memref<1x8x32xbf16, #tpu.memory_space<vmem>>, %arg8: memref<4x8x1xf32, #tpu.memory_space<vmem>>, %arg9: memref<4x8x1xf32, #tpu.memory_space<vmem>>, %arg10: memref<4x8x8xf32, #tpu.memory_space<vmem>>) attributes {dimension_semantics = [#tpu.dimension_semantics<parallel>, #tpu.dimension_semantics<parallel>, #tpu.dimension_semantics<parallel>, #tpu.dimension_semantics<arbitrary>], iteration_bounds = array<i64: 2, 1, 1, 1>, scalar_prefetch = 0 : i64, scratch_operands = 3 : i64, tpu.core_type = #tpu.core_type<tc>, window_params = [{transform_indices = @transform_0, window_bounds = array<i64: 1, 4, 8, 8>}, {transform_indices = @transform_1, window_bounds = array<i64: 1, 4, 8, 8>}, {transform_indices = @transform_2, window_bounds = array<i64: 1, 4, 8, 8>}, {transform_indices = @transform_3, window_bounds = array<i64: 1, 8, 32>}]} {
    %c0_i32 = arith.constant 0 : i32
    %0 = arith.cmpi eq, %arg3, %c0_i32 : i32
    %1 = arith.extui %0 : i1 to i32
    %c0_i32_0 = arith.constant 0 : i32
    %2 = arith.cmpi ne, %1, %c0_i32_0 : i32
    scf.if %2 {
      %cst_35 = arith.constant -1.000000e+30 : f32
      %36 = vector.broadcast %cst_35 : f32 to vector<4x8x1xf32>
      %c0_36 = arith.constant 0 : index
      %c0_37 = arith.constant 0 : index
      %c0_38 = arith.constant 0 : index
      %37 = vector.load %arg8[%c0_36, %c0_37, %c0_38] : memref<4x8x1xf32, #tpu.memory_space<vmem>>, vector<4x8x1xf32>
      tpu.vector_store %arg8[%c0_36, %c0_37, %c0_38], %36 {strides = array<i32>} : memref<4x8x1xf32, #tpu.memory_space<vmem>>, vector<4x8x1xf32>,
      %cst_39 = arith.constant 0.000000e+00 : f32
      %38 = vector.broadcast %cst_39 : f32 to vector<4x8x1xf32>
      %c0_40 = arith.constant 0 : index
      %c0_41 = arith.constant 0 : index
      %c0_42 = arith.constant 0 : index
      %39 = vector.load %arg9[%c0_40, %c0_41, %c0_42] : memref<4x8x1xf32, #tpu.memory_space<vmem>>, vector<4x8x1xf32>
      tpu.vector_store %arg9[%c0_40, %c0_41, %c0_42], %38 {strides = array<i32>} : memref<4x8x1xf32, #tpu.memory_space<vmem>>, vector<4x8x1xf32>,
      %cst_43 = arith.constant 0.000000e+00 : f32
      %40 = vector.broadcast %cst_43 : f32 to vector<4x8x8xf32>
      %c0_44 = arith.constant 0 : index
      %c0_45 = arith.constant 0 : index
      %c0_46 = arith.constant 0 : index
      %41 = vector.load %arg10[%c0_44, %c0_45, %c0_46] : memref<4x8x8xf32, #tpu.memory_space<vmem>>, vector<4x8x8xf32>
      tpu.vector_store %arg10[%c0_44, %c0_45, %c0_46], %40 {strides = array<i32>} : memref<4x8x8xf32, #tpu.memory_space<vmem>>, vector<4x8x8xf32>,
    } else {
    }
    %c0 = arith.constant 0 : index
    %c0_1 = arith.constant 0 : index
    %c0_2 = arith.constant 0 : index
    %c0_3 = arith.constant 0 : index
    %3 = vector.load %arg4[%c0, %c0_1, %c0_2, %c0_3] : memref<1x4x8x8xbf16, #tpu.memory_space<vmem>>, vector<1x4x8x8xbf16>
    %4 = vector.shape_cast %3 : vector<1x4x8x8xbf16> to vector<4x8x8xbf16>
    %c0_4 = arith.constant 0 : index
    %c0_5 = arith.constant 0 : index
    %c0_6 = arith.constant 0 : index
    %c0_7 = arith.constant 0 : index
    %5 = vector.load %arg5[%c0_4, %c0_5, %c0_6, %c0_7] : memref<1x4x8x8xbf16, #tpu.memory_space<vmem>>, vector<1x4x8x8xbf16>
    %6 = vector.shape_cast %5 : vector<1x4x8x8xbf16> to vector<4x8x8xbf16>
    %c0_8 = arith.constant 0 : index
    %c0_9 = arith.constant 0 : index
    %c0_10 = arith.constant 0 : index
    %c0_11 = arith.constant 0 : index
    %7 = vector.load %arg6[%c0_8, %c0_9, %c0_10, %c0_11] : memref<1x4x8x8xbf16, #tpu.memory_space<vmem>>, vector<1x4x8x8xbf16>
    %8 = vector.shape_cast %7 : vector<1x4x8x8xbf16> to vector<4x8x8xbf16>
    "tpu.trace_start"() <{level = 10 : i32, message = "hqd,hkd->hqk"}> : () -> ()
    %cst = arith.constant dense<0.000000e+00> : vector<4x8x8xf32>
    %9 = tpu.matmul %4, %6, %cst {dimension_numbers = #tpu.dot_dimension_numbers<[2], [2], [1], [1], [0, 0, 0, 1, 1, 1], [0], [0]>} : vector<4x8x8xbf16>, vector<4x8x8xbf16>, vector<4x8x8xf32> -> vector<4x8x8xf32>
    "tpu.trace_stop"() : () -> ()
    %c0_12 = arith.constant 0 : index
    %c0_13 = arith.constant 0 : index
    %c0_14 = arith.constant 0 : index
    %10 = vector.load %arg8[%c0_12, %c0_13, %c0_14] : memref<4x8x1xf32, #tpu.memory_space<vmem>>, vector<4x8x1xf32>
    %cst_15 = arith.constant dense<0xFF800000> : vector<4x8xf32>
    %11 = vector.multi_reduction <maximumf>, %9, %cst_15 [2] : vector<4x8x8xf32> to vector<4x8xf32>
    %12 = vector.shape_cast %11 : vector<4x8xf32> to vector<4x8x1xf32>
    %13 = arith.maximumf %10, %12 : vector<4x8x1xf32>
    %14 = arith.subf %10, %13 : vector<4x8x1xf32>
    %15 = math.exp %14 : vector<4x8x1xf32>
    %16 = vector.broadcast %13 : vector<4x8x1xf32> to vector<4x8x8xf32>
    %17 = arith.subf %9, %16 : vector<4x8x8xf32>
    %18 = math.exp %17 : vector<4x8x8xf32>
    %c0_16 = arith.constant 0 : index
    %c0_17 = arith.constant 0 : index
    %c0_18 = arith.constant 0 : index
    %19 = vector.load %arg9[%c0_16, %c0_17, %c0_18] : memref<4x8x1xf32, #tpu.memory_space<vmem>>, vector<4x8x1xf32>
    %20 = arith.mulf %15, %19 : vector<4x8x1xf32>
    %cst_19 = arith.constant dense<0.000000e+00> : vector<4x8xf32>
    %21 = vector.multi_reduction <add>, %18, %cst_19 [2] : vector<4x8x8xf32> to vector<4x8xf32>
    %22 = vector.shape_cast %21 : vector<4x8xf32> to vector<4x8x1xf32>
    %23 = arith.addf %20, %22 : vector<4x8x1xf32>
    %c0_20 = arith.constant 0 : index
    %c0_21 = arith.constant 0 : index
    %c0_22 = arith.constant 0 : index
    %24 = vector.load %arg9[%c0_20, %c0_21, %c0_22] : memref<4x8x1xf32, #tpu.memory_space<vmem>>, vector<4x8x1xf32>
    tpu.vector_store %arg9[%c0_20, %c0_21, %c0_22], %23 {strides = array<i32>} : memref<4x8x1xf32, #tpu.memory_space<vmem>>, vector<4x8x1xf32>,
    %c0_23 = arith.constant 0 : index
    %c0_24 = arith.constant 0 : index
    %c0_25 = arith.constant 0 : index
    %25 = vector.load %arg10[%c0_23, %c0_24, %c0_25] : memref<4x8x8xf32, #tpu.memory_space<vmem>>, vector<4x8x8xf32>
    %26 = vector.broadcast %15 : vector<4x8x1xf32> to vector<4x8x8xf32>
    %27 = arith.mulf %26, %25 : vector<4x8x8xf32>
    %28 = arith.truncf %18 : vector<4x8x8xf32> to vector<4x8x8xbf16>
    "tpu.trace_start"() <{level = 10 : i32, message = "hqk,hkd->hqd"}> : () -> ()
    %cst_26 = arith.constant dense<0.000000e+00> : vector<4x8x8xf32>
    %29 = tpu.matmul %28, %8, %cst_26 {dimension_numbers = #tpu.dot_dimension_numbers<[2], [1], [1], [2], [0, 0, 0, 1, 1, 2], [0], [0]>} : vector<4x8x8xbf16>, vector<4x8x8xbf16>, vector<4x8x8xf32> -> vector<4x8x8xf32>
    "tpu.trace_stop"() : () -> ()
    %30 = arith.addf %27, %29 : vector<4x8x8xf32>
    %c0_27 = arith.constant 0 : index
    %c0_28 = arith.constant 0 : index
    %c0_29 = arith.constant 0 : index
    %31 = vector.load %arg10[%c0_27, %c0_28, %c0_29] : memref<4x8x8xf32, #tpu.memory_space<vmem>>, vector<4x8x8xf32>
    tpu.vector_store %arg10[%c0_27, %c0_28, %c0_29], %30 {strides = array<i32>} : memref<4x8x8xf32, #tpu.memory_space<vmem>>, vector<4x8x8xf32>,
    %c0_30 = arith.constant 0 : index
    %c0_31 = arith.constant 0 : index
    %c0_32 = arith.constant 0 : index
    %32 = vector.load %arg8[%c0_30, %c0_31, %c0_32] : memref<4x8x1xf32, #tpu.memory_space<vmem>>, vector<4x8x1xf32>
    tpu.vector_store %arg8[%c0_30, %c0_31, %c0_32], %13 {strides = array<i32>} : memref<4x8x1xf32, #tpu.memory_space<vmem>>, vector<4x8x1xf32>,
    %c0_i32_33 = arith.constant 0 : i32
    %33 = arith.cmpi eq, %arg3, %c0_i32_33 : i32
    %34 = arith.extui %33 : i1 to i32
    %c0_i32_34 = arith.constant 0 : i32
    %35 = arith.cmpi ne, %34, %c0_i32_34 : i32
    scf.if %35 {
      %c0_35 = arith.constant 0 : index
      %c0_36 = arith.constant 0 : index
      %c0_37 = arith.constant 0 : index
      %36 = vector.load %arg10[%c0_35, %c0_36, %c0_37] : memref<4x8x8xf32, #tpu.memory_space<vmem>>, vector<4x8x8xf32>
      %c0_38 = arith.constant 0 : index
      %c0_39 = arith.constant 0 : index
      %c0_40 = arith.constant 0 : index
      %37 = vector.load %arg9[%c0_38, %c0_39, %c0_40] : memref<4x8x1xf32, #tpu.memory_space<vmem>>, vector<4x8x1xf32>
      %38 = tpu.reciprocal %37 {approx = true} : vector<4x8x1xf32> -> vector<4x8x1xf32>
      %39 = vector.broadcast %38 : vector<4x8x1xf32> to vector<4x8x8xf32>
      %40 = arith.mulf %36, %39 : vector<4x8x8xf32>
      %41 = vector.extract_strided_slice %40 {offsets = [0, 0, 0], sizes = [1, 8, 8], strides = [1, 1, 1]} : vector<4x8x8xf32> to vector<1x8x8xf32>
      %42 = vector.shape_cast %41 : vector<1x8x8xf32> to vector<8x8xf32>
      %43 = arith.truncf %42 : vector<8x8xf32> to vector<8x8xbf16>
      %c0_41 = arith.constant 0 : index
      %c0_42 = arith.constant 0 : index
      %c0_43 = arith.constant 0 : index
      %44 = vector.load %arg7[%c0_41, %c0_42, %c0_43] : memref<1x8x32xbf16, #tpu.memory_space<vmem>>, vector<1x8x8xbf16>
      %45 = vector.shape_cast %44 : vector<1x8x8xbf16> to vector<8x8xbf16>
      %46 = vector.shape_cast %43 : vector<8x8xbf16> to vector<1x8x8xbf16>
      tpu.vector_store %arg7[%c0_41, %c0_42, %c0_43], %46 {strides = array<i32>} : memref<1x8x32xbf16, #tpu.memory_space<vmem>>, vector<1x8x8xbf16>,
      %47 = vector.extract_strided_slice %40 {offsets = [1, 0, 0], sizes = [1, 8, 8], strides = [1, 1, 1]} : vector<4x8x8xf32> to vector<1x8x8xf32>
      %48 = vector.shape_cast %47 : vector<1x8x8xf32> to vector<8x8xf32>
      %49 = arith.truncf %48 : vector<8x8xf32> to vector<8x8xbf16>
      %c0_44 = arith.constant 0 : index
      %c0_45 = arith.constant 0 : index
      %c8 = arith.constant 8 : index
      %50 = vector.load %arg7[%c0_44, %c0_45, %c8] : memref<1x8x32xbf16, #tpu.memory_space<vmem>>, vector<1x8x8xbf16>
      %51 = vector.shape_cast %50 : vector<1x8x8xbf16> to vector<8x8xbf16>
      %52 = vector.shape_cast %49 : vector<8x8xbf16> to vector<1x8x8xbf16>
      tpu.vector_store %arg7[%c0_44, %c0_45, %c8], %52 {strides = array<i32>} : memref<1x8x32xbf16, #tpu.memory_space<vmem>>, vector<1x8x8xbf16>,
      %53 = vector.extract_strided_slice %40 {offsets = [2, 0, 0], sizes = [1, 8, 8], strides = [1, 1, 1]} : vector<4x8x8xf32> to vector<1x8x8xf32>
      %54 = vector.shape_cast %53 : vector<1x8x8xf32> to vector<8x8xf32>
      %55 = arith.truncf %54 : vector<8x8xf32> to vector<8x8xbf16>
      %c0_46 = arith.constant 0 : index
      %c0_47 = arith.constant 0 : index
      %c16 = arith.constant 16 : index
      %56 = vector.load %arg7[%c0_46, %c0_47, %c16] : memref<1x8x32xbf16, #tpu.memory_space<vmem>>, vector<1x8x8xbf16>
      %57 = vector.shape_cast %56 : vector<1x8x8xbf16> to vector<8x8xbf16>
      %58 = vector.shape_cast %55 : vector<8x8xbf16> to vector<1x8x8xbf16>
      tpu.vector_store %arg7[%c0_46, %c0_47, %c16], %58 {strides = array<i32>} : memref<1x8x32xbf16, #tpu.memory_space<vmem>>, vector<1x8x8xbf16>,
      %59 = vector.extract_strided_slice %40 {offsets = [3, 0, 0], sizes = [1, 8, 8], strides = [1, 1, 1]} : vector<4x8x8xf32> to vector<1x8x8xf32>
      %60 = vector.shape_cast %59 : vector<1x8x8xf32> to vector<8x8xf32>
      %61 = arith.truncf %60 : vector<8x8xf32> to vector<8x8xbf16>
      %c0_48 = arith.constant 0 : index
      %c0_49 = arith.constant 0 : index
      %c24 = arith.constant 24 : index
      %62 = vector.load %arg7[%c0_48, %c0_49, %c24] : memref<1x8x32xbf16, #tpu.memory_space<vmem>>, vector<1x8x8xbf16>
      %63 = vector.shape_cast %62 : vector<1x8x8xbf16> to vector<8x8xbf16>
      %64 = vector.shape_cast %61 : vector<8x8xbf16> to vector<1x8x8xbf16>
      tpu.vector_store %arg7[%c0_48, %c0_49, %c24], %64 {strides = array<i32>} : memref<1x8x32xbf16, #tpu.memory_space<vmem>>, vector<1x8x8xbf16>,
    } else {
    }
    return
  }
  func.func @transform_0(%arg0: i32, %arg1: i32, %arg2: i32, %arg3: i32) -> (i32, i32, i32, i32) {
    %c0_i32 = arith.constant 0 : i32
    %c0_i32_0 = arith.constant 0 : i32
    return %arg0, %arg1, %arg2, %c0_i32 : i32, i32, i32, i32
  }
  func.func @transform_1(%arg0: i32, %arg1: i32, %arg2: i32, %arg3: i32) -> (i32, i32, i32, i32) {
    %c0_i32 = arith.constant 0 : i32
    %c0_i32_0 = arith.constant 0 : i32
    return %arg0, %arg1, %arg3, %c0_i32 : i32, i32, i32, i32
  }
  func.func @transform_2(%arg0: i32, %arg1: i32, %arg2: i32, %arg3: i32) -> (i32, i32, i32, i32) {
    %c0_i32 = arith.constant 0 : i32
    %c0_i32_0 = arith.constant 0 : i32
    return %arg0, %arg1, %arg3, %c0_i32 : i32, i32, i32, i32
  }
  func.func @transform_3(%arg0: i32, %arg1: i32, %arg2: i32, %arg3: i32) -> (i32, i32, i32) {
    %c0_i32 = arith.constant 0 : i32
    return %arg0, %arg2, %arg1 : i32, i32, i32
  }
}

module attributes {stable_mosaic.version = 11 : i64} {
  func.func @_matmul_kernel(%arg0: i32, %arg1: i32, %arg2: i32, %arg3: memref<16x128xbf16, #tpu.memory_space<vmem>>, %arg4: memref<128x128xbf16, #tpu.memory_space<vmem>>, %arg5: memref<1x128xf32, #tpu.memory_space<vmem>>, %arg6: memref<16x128xbf16, #tpu.memory_space<vmem>>, %arg7: memref<16x128xbf16, #tpu.memory_space<vmem>>, %arg8: memref<16x128xf32, #tpu.memory_space<vmem>>) attributes {dimension_semantics = [#tpu.dimension_semantics<parallel>, #tpu.dimension_semantics<parallel>, #tpu.dimension_semantics<arbitrary>], iteration_bounds = array<i64: 1, 1, 1>, scalar_prefetch = 0 : i64, scratch_operands = 1 : i64, tpu.core_type = #tpu.core_type<tc>, window_params = [{transform_indices = @transform_0, window_bounds = array<i64: 16, 128>}, {transform_indices = @transform_1, window_bounds = array<i64: 128, 128>}, {transform_indices = @transform_2, window_bounds = array<i64: 1, 128>}, {transform_indices = @transform_3, window_bounds = array<i64: 16, 128>}, {transform_indices = @transform_4, window_bounds = array<i64: 16, 128>}]} {
    %c0_i32 = arith.constant 0 : i32
    %0 = arith.cmpi eq, %arg2, %c0_i32 : i32
    %1 = arith.extui %0 : i1 to i32
    %c0_i32_0 = arith.constant 0 : i32
    %2 = arith.cmpi ne, %1, %c0_i32_0 : i32
    scf.if %2 {
      %cst_10 = arith.constant 0.000000e+00 : f32
      %12 = vector.broadcast %cst_10 : f32 to vector<16x128xf32>
      %c0_11 = arith.constant 0 : index
      %c0_12 = arith.constant 0 : index
      %13 = vector.load %arg8[%c0_11, %c0_12] : memref<16x128xf32, #tpu.memory_space<vmem>>, vector<16x128xf32>
      tpu.vector_store %arg8[%c0_11, %c0_12], %12 {strides = array<i32>} : memref<16x128xf32, #tpu.memory_space<vmem>>, vector<16x128xf32>,
    } else {
    }
    %c0 = arith.constant 0 : index
    %c0_1 = arith.constant 0 : index
    %3 = vector.load %arg3[%c0, %c0_1] : memref<16x128xbf16, #tpu.memory_space<vmem>>, vector<16x128xbf16>
    %c0_2 = arith.constant 0 : index
    %c0_3 = arith.constant 0 : index
    %4 = vector.load %arg8[%c0_2, %c0_3] : memref<16x128xf32, #tpu.memory_space<vmem>>, vector<16x128xf32>
    %c0_4 = arith.constant 0 : index
    %c0_5 = arith.constant 0 : index
    %5 = vector.load %arg4[%c0_4, %c0_5] : memref<128x128xbf16, #tpu.memory_space<vmem>>, vector<128x128xbf16>
    %cst = arith.constant dense<0.000000e+00> : vector<16x128xf32>
    %6 = tpu.matmul %3, %5, %cst {dimension_numbers = #tpu.dot_dimension_numbers<[1], [0], [0], [1], [0, 0, 1, 1], [], []>} : vector<16x128xbf16>, vector<128x128xbf16>, vector<16x128xf32> -> vector<16x128xf32>
    %7 = arith.addf %4, %6 : vector<16x128xf32>
    %c0_6 = arith.constant 0 : index
    %c0_7 = arith.constant 0 : index
    %8 = vector.load %arg8[%c0_6, %c0_7] : memref<16x128xf32, #tpu.memory_space<vmem>>, vector<16x128xf32>
    tpu.vector_store %arg8[%c0_6, %c0_7], %7 {strides = array<i32>} : memref<16x128xf32, #tpu.memory_space<vmem>>, vector<16x128xf32>,
    %c0_i32_8 = arith.constant 0 : i32
    %9 = arith.cmpi eq, %arg2, %c0_i32_8 : i32
    %10 = arith.extui %9 : i1 to i32
    %c0_i32_9 = arith.constant 0 : i32
    %11 = arith.cmpi ne, %10, %c0_i32_9 : i32
    scf.if %11 {
      %c0_10 = arith.constant 0 : index
      %c0_11 = arith.constant 0 : index
      %12 = vector.load %arg8[%c0_10, %c0_11] : memref<16x128xf32, #tpu.memory_space<vmem>>, vector<16x128xf32>
      %c0_12 = arith.constant 0 : index
      %c0_13 = arith.constant 0 : index
      %13 = vector.load %arg5[%c0_12, %c0_13] : memref<1x128xf32, #tpu.memory_space<vmem>>, vector<1x128xf32>
      %14 = vector.broadcast %13 : vector<1x128xf32> to vector<16x128xf32>
      %15 = arith.addf %12, %14 : vector<16x128xf32>
      %c0_14 = arith.constant 0 : index
      %c0_15 = arith.constant 0 : index
      %16 = vector.load %arg6[%c0_14, %c0_15] : memref<16x128xbf16, #tpu.memory_space<vmem>>, vector<16x128xbf16>
      %17 = arith.extf %16 : vector<16x128xbf16> to vector<16x128xf32>
      %18 = arith.addf %15, %17 : vector<16x128xf32>
      %19 = arith.truncf %18 : vector<16x128xf32> to vector<16x128xbf16>
      %c0_16 = arith.constant 0 : index
      %c0_17 = arith.constant 0 : index
      %20 = vector.load %arg7[%c0_16, %c0_17] : memref<16x128xbf16, #tpu.memory_space<vmem>>, vector<16x128xbf16>
      tpu.vector_store %arg7[%c0_16, %c0_17], %19 {strides = array<i32>} : memref<16x128xbf16, #tpu.memory_space<vmem>>, vector<16x128xbf16>,
    } else {
    }
    return
  }
  func.func @transform_0(%arg0: i32, %arg1: i32, %arg2: i32) -> (i32, i32) {
    %c0_i32 = arith.constant 0 : i32
    return %arg0, %arg2 : i32, i32
  }
  func.func @transform_1(%arg0: i32, %arg1: i32, %arg2: i32) -> (i32, i32) {
    %c0_i32 = arith.constant 0 : i32
    return %arg2, %arg1 : i32, i32
  }
  func.func @transform_2(%arg0: i32, %arg1: i32, %arg2: i32) -> (i32, i32) {
    %c0_i32 = arith.constant 0 : i32
    %c0_i32_0 = arith.constant 0 : i32
    return %c0_i32, %arg1 : i32, i32
  }
  func.func @transform_3(%arg0: i32, %arg1: i32, %arg2: i32) -> (i32, i32) {
    %c0_i32 = arith.constant 0 : i32
    return %arg0, %arg1 : i32, i32
  }
  func.func @transform_4(%arg0: i32, %arg1: i32, %arg2: i32) -> (i32, i32) {
    %c0_i32 = arith.constant 0 : i32
    return %arg0, %arg1 : i32, i32
  }
}

module attributes {stable_mosaic.version = 11 : i64} {
  func.func @_matmul_kernel(%arg0: i32, %arg1: i32, %arg2: i32, %arg3: memref<16x128xbf16, #tpu.memory_space<vmem>>, %arg4: memref<128x128xbf16, #tpu.memory_space<vmem>>, %arg5: memref<1x128xf32, #tpu.memory_space<vmem>>, %arg6: memref<1x128xf32, #tpu.memory_space<vmem>>, %arg7: memref<1x128xf32, #tpu.memory_space<vmem>>, %arg8: memref<16x128xbf16, #tpu.memory_space<vmem>>, %arg9: memref<16x128xf32, #tpu.memory_space<vmem>>) attributes {dimension_semantics = [#tpu.dimension_semantics<parallel>, #tpu.dimension_semantics<parallel>, #tpu.dimension_semantics<arbitrary>], iteration_bounds = array<i64: 1, 1, 1>, scalar_prefetch = 0 : i64, scratch_operands = 1 : i64, tpu.core_type = #tpu.core_type<tc>, window_params = [{transform_indices = @transform_0, window_bounds = array<i64: 16, 128>}, {transform_indices = @transform_1, window_bounds = array<i64: 128, 128>}, {transform_indices = @transform_2, window_bounds = array<i64: 1, 128>}, {transform_indices = @transform_3, window_bounds = array<i64: 1, 128>}, {transform_indices = @transform_4, window_bounds = array<i64: 1, 128>}, {transform_indices = @transform_5, window_bounds = array<i64: 16, 128>}]} {
    %c0_i32 = arith.constant 0 : i32
    %0 = arith.cmpi eq, %arg2, %c0_i32 : i32
    %1 = arith.extui %0 : i1 to i32
    %c0_i32_0 = arith.constant 0 : i32
    %2 = arith.cmpi ne, %1, %c0_i32_0 : i32
    scf.if %2 {
      %cst_20 = arith.constant 0.000000e+00 : f32
      %40 = vector.broadcast %cst_20 : f32 to vector<16x128xf32>
      %c0_21 = arith.constant 0 : index
      %c0_22 = arith.constant 0 : index
      %41 = vector.load %arg9[%c0_21, %c0_22] : memref<16x128xf32, #tpu.memory_space<vmem>>, vector<16x128xf32>
      tpu.vector_store %arg9[%c0_21, %c0_22], %40 {strides = array<i32>} : memref<16x128xf32, #tpu.memory_space<vmem>>, vector<16x128xf32>,
    } else {
    }
    %c0 = arith.constant 0 : index
    %c0_1 = arith.constant 0 : index
    %3 = vector.load %arg3[%c0, %c0_1] : memref<16x128xbf16, #tpu.memory_space<vmem>>, vector<16x128xbf16>
    %4 = arith.extf %3 : vector<16x128xbf16> to vector<16x128xf32>
    %cst = arith.constant dense<0.000000e+00> : vector<16xf32>
    %5 = vector.multi_reduction <add>, %4, %cst [1] : vector<16x128xf32> to vector<16xf32>
    %6 = vector.shape_cast %5 : vector<16xf32> to vector<16x1xf32>
    %cst_2 = arith.constant 3.125000e-02 : f32
    %7 = vector.broadcast %cst_2 : f32 to vector<16x1xf32>
    %8 = arith.mulf %6, %7 : vector<16x1xf32>
    %9 = arith.mulf %4, %4 : vector<16x128xf32>
    %cst_3 = arith.constant dense<0.000000e+00> : vector<16xf32>
    %10 = vector.multi_reduction <add>, %9, %cst_3 [1] : vector<16x128xf32> to vector<16xf32>
    %11 = vector.shape_cast %10 : vector<16xf32> to vector<16x1xf32>
    %cst_4 = arith.constant 3.125000e-02 : f32
    %12 = vector.broadcast %cst_4 : f32 to vector<16x1xf32>
    %13 = arith.mulf %11, %12 : vector<16x1xf32>
    %14 = arith.mulf %8, %8 : vector<16x1xf32>
    %15 = arith.subf %13, %14 : vector<16x1xf32>
    %cst_5 = arith.constant 0.000000e+00 : f32
    %16 = vector.broadcast %cst_5 : f32 to vector<16x1xf32>
    %17 = arith.maximumf %15, %16 : vector<16x1xf32>
    %18 = vector.broadcast %8 : vector<16x1xf32> to vector<16x128xf32>
    %19 = arith.subf %4, %18 : vector<16x128xf32>
    %cst_6 = arith.constant 9.99999974E-6 : f32
    %20 = vector.broadcast %cst_6 : f32 to vector<16x1xf32>
    %21 = arith.addf %17, %20 : vector<16x1xf32>
    %22 = math.rsqrt %21 : vector<16x1xf32>
    %23 = vector.broadcast %22 : vector<16x1xf32> to vector<16x128xf32>
    %24 = arith.mulf %19, %23 : vector<16x128xf32>
    %c0_7 = arith.constant 0 : index
    %c0_8 = arith.constant 0 : index
    %25 = vector.load %arg5[%c0_7, %c0_8] : memref<1x128xf32, #tpu.memory_space<vmem>>, vector<1x128xf32>
    %26 = vector.broadcast %25 : vector<1x128xf32> to vector<16x128xf32>
    %27 = arith.mulf %24, %26 : vector<16x128xf32>
    %c0_9 = arith.constant 0 : index
    %c0_10 = arith.constant 0 : index
    %28 = vector.load %arg6[%c0_9, %c0_10] : memref<1x128xf32, #tpu.memory_space<vmem>>, vector<1x128xf32>
    %29 = vector.broadcast %28 : vector<1x128xf32> to vector<16x128xf32>
    %30 = arith.addf %27, %29 : vector<16x128xf32>
    %31 = arith.truncf %30 : vector<16x128xf32> to vector<16x128xbf16>
    %c0_11 = arith.constant 0 : index
    %c0_12 = arith.constant 0 : index
    %32 = vector.load %arg9[%c0_11, %c0_12] : memref<16x128xf32, #tpu.memory_space<vmem>>, vector<16x128xf32>
    %c0_13 = arith.constant 0 : index
    %c0_14 = arith.constant 0 : index
    %33 = vector.load %arg4[%c0_13, %c0_14] : memref<128x128xbf16, #tpu.memory_space<vmem>>, vector<128x128xbf16>
    %cst_15 = arith.constant dense<0.000000e+00> : vector<16x128xf32>
    %34 = tpu.matmul %31, %33, %cst_15 {dimension_numbers = #tpu.dot_dimension_numbers<[1], [0], [0], [1], [0, 0, 1, 1], [], []>} : vector<16x128xbf16>, vector<128x128xbf16>, vector<16x128xf32> -> vector<16x128xf32>
    %35 = arith.addf %32, %34 : vector<16x128xf32>
    %c0_16 = arith.constant 0 : index
    %c0_17 = arith.constant 0 : index
    %36 = vector.load %arg9[%c0_16, %c0_17] : memref<16x128xf32, #tpu.memory_space<vmem>>, vector<16x128xf32>
    tpu.vector_store %arg9[%c0_16, %c0_17], %35 {strides = array<i32>} : memref<16x128xf32, #tpu.memory_space<vmem>>, vector<16x128xf32>,
    %c0_i32_18 = arith.constant 0 : i32
    %37 = arith.cmpi eq, %arg2, %c0_i32_18 : i32
    %38 = arith.extui %37 : i1 to i32
    %c0_i32_19 = arith.constant 0 : i32
    %39 = arith.cmpi ne, %38, %c0_i32_19 : i32
    scf.if %39 {
      %c0_20 = arith.constant 0 : index
      %c0_21 = arith.constant 0 : index
      %40 = vector.load %arg9[%c0_20, %c0_21] : memref<16x128xf32, #tpu.memory_space<vmem>>, vector<16x128xf32>
      %c0_22 = arith.constant 0 : index
      %c0_23 = arith.constant 0 : index
      %41 = vector.load %arg7[%c0_22, %c0_23] : memref<1x128xf32, #tpu.memory_space<vmem>>, vector<1x128xf32>
      %42 = vector.broadcast %41 : vector<1x128xf32> to vector<16x128xf32>
      %43 = arith.addf %40, %42 : vector<16x128xf32>
      %44 = arith.mulf %43, %43 : vector<16x128xf32>
      %45 = arith.mulf %43, %44 : vector<16x128xf32>
      %cst_24 = arith.constant 4.471500e-02 : f32
      %46 = vector.broadcast %cst_24 : f32 to vector<16x128xf32>
      %47 = arith.mulf %46, %45 : vector<16x128xf32>
      %48 = arith.addf %43, %47 : vector<16x128xf32>
      %cst_25 = arith.constant 0.797884583 : f32
      %49 = vector.broadcast %cst_25 : f32 to vector<16x128xf32>
      %50 = arith.mulf %49, %48 : vector<16x128xf32>
      %51 = math.tanh %50 : vector<16x128xf32>
      %cst_26 = arith.constant 1.000000e+00 : f32
      %52 = vector.broadcast %cst_26 : f32 to vector<16x128xf32>
      %53 = arith.addf %52, %51 : vector<16x128xf32>
      %cst_27 = arith.constant 5.000000e-01 : f32
      %54 = vector.broadcast %cst_27 : f32 to vector<16x128xf32>
      %55 = arith.mulf %54, %53 : vector<16x128xf32>
      %56 = arith.mulf %43, %55 : vector<16x128xf32>
      %57 = arith.truncf %56 : vector<16x128xf32> to vector<16x128xbf16>
      %c0_28 = arith.constant 0 : index
      %c0_29 = arith.constant 0 : index
      %58 = vector.load %arg8[%c0_28, %c0_29] : memref<16x128xbf16, #tpu.memory_space<vmem>>, vector<16x128xbf16>
      tpu.vector_store %arg8[%c0_28, %c0_29], %57 {strides = array<i32>} : memref<16x128xbf16, #tpu.memory_space<vmem>>, vector<16x128xbf16>,
    } else {
    }
    return
  }
  func.func @transform_0(%arg0: i32, %arg1: i32, %arg2: i32) -> (i32, i32) {
    %c0_i32 = arith.constant 0 : i32
    return %arg0, %arg2 : i32, i32
  }
  func.func @transform_1(%arg0: i32, %arg1: i32, %arg2: i32) -> (i32, i32) {
    %c0_i32 = arith.constant 0 : i32
    return %arg2, %arg1 : i32, i32
  }
  func.func @transform_2(%arg0: i32, %arg1: i32, %arg2: i32) -> (i32, i32) {
    %c0_i32 = arith.constant 0 : i32
    %c0_i32_0 = arith.constant 0 : i32
    return %c0_i32, %arg2 : i32, i32
  }
  func.func @transform_3(%arg0: i32, %arg1: i32, %arg2: i32) -> (i32, i32) {
    %c0_i32 = arith.constant 0 : i32
    %c0_i32_0 = arith.constant 0 : i32
    return %c0_i32, %arg2 : i32, i32
  }
  func.func @transform_4(%arg0: i32, %arg1: i32, %arg2: i32) -> (i32, i32) {
    %c0_i32 = arith.constant 0 : i32
    %c0_i32_0 = arith.constant 0 : i32
    return %c0_i32, %arg1 : i32, i32
  }
  func.func @transform_5(%arg0: i32, %arg1: i32, %arg2: i32) -> (i32, i32) {
    %c0_i32 = arith.constant 0 : i32
    return %arg0, %arg1 : i32, i32
  }
}

module attributes {stable_mosaic.version = 11 : i64} {
  func.func @_layernorm_kernel(%arg0: i32, %arg1: memref<16x32xbf16, #tpu.memory_space<vmem>>, %arg2: memref<1x32xf32, #tpu.memory_space<vmem>>, %arg3: memref<1x32xf32, #tpu.memory_space<vmem>>, %arg4: memref<16x32xbf16, #tpu.memory_space<vmem>>) attributes {dimension_semantics = [#tpu.dimension_semantics<parallel>], iteration_bounds = array<i64: 1>, scalar_prefetch = 0 : i64, scratch_operands = 0 : i64, tpu.core_type = #tpu.core_type<tc>, window_params = [{transform_indices = @transform_0, window_bounds = array<i64: 16, 32>}, {pipeline_mode = #tpu.pipeline_mode<synchronous>, transform_indices = @transform_1, window_bounds = array<i64: 1, 32>}, {pipeline_mode = #tpu.pipeline_mode<synchronous>, transform_indices = @transform_2, window_bounds = array<i64: 1, 32>}, {transform_indices = @transform_3, window_bounds = array<i64: 16, 32>}]} {
    %c0 = arith.constant 0 : index
    %c0_0 = arith.constant 0 : index
    %0 = vector.load %arg1[%c0, %c0_0] : memref<16x32xbf16, #tpu.memory_space<vmem>>, vector<16x32xbf16>
    %1 = arith.extf %0 : vector<16x32xbf16> to vector<16x32xf32>
    %cst = arith.constant dense<0.000000e+00> : vector<16xf32>
    %2 = vector.multi_reduction <add>, %1, %cst [1] : vector<16x32xf32> to vector<16xf32>
    %3 = vector.shape_cast %2 : vector<16xf32> to vector<16x1xf32>
    %cst_1 = arith.constant 3.200000e+01 : f32
    %4 = vector.broadcast %cst_1 : f32 to vector<16x1xf32>
    %5 = arith.divf %3, %4 : vector<16x1xf32>
    %6 = vector.broadcast %5 : vector<16x1xf32> to vector<16x32xf32>
    %7 = arith.subf %1, %6 : vector<16x32xf32>
    %8 = arith.mulf %7, %7 : vector<16x32xf32>
    %cst_2 = arith.constant dense<0.000000e+00> : vector<16xf32>
    %9 = vector.multi_reduction <add>, %8, %cst_2 [1] : vector<16x32xf32> to vector<16xf32>
    %10 = vector.shape_cast %9 : vector<16xf32> to vector<16x1xf32>
    %cst_3 = arith.constant 3.200000e+01 : f32
    %11 = vector.broadcast %cst_3 : f32 to vector<16x1xf32>
    %12 = arith.divf %10, %11 : vector<16x1xf32>
    %13 = vector.broadcast %5 : vector<16x1xf32> to vector<16x32xf32>
    %14 = arith.subf %1, %13 : vector<16x32xf32>
    %cst_4 = arith.constant 9.99999974E-6 : f32
    %15 = vector.broadcast %cst_4 : f32 to vector<16x1xf32>
    %16 = arith.addf %12, %15 : vector<16x1xf32>
    %17 = math.rsqrt %16 : vector<16x1xf32>
    %18 = vector.broadcast %17 : vector<16x1xf32> to vector<16x32xf32>
    %19 = arith.mulf %14, %18 : vector<16x32xf32>
    %c0_5 = arith.constant 0 : index
    %c0_6 = arith.constant 0 : index
    %20 = vector.load %arg2[%c0_5, %c0_6] : memref<1x32xf32, #tpu.memory_space<vmem>>, vector<1x32xf32>
    %21 = vector.broadcast %20 : vector<1x32xf32> to vector<16x32xf32>
    %22 = arith.mulf %19, %21 : vector<16x32xf32>
    %c0_7 = arith.constant 0 : index
    %c0_8 = arith.constant 0 : index
    %23 = vector.load %arg3[%c0_7, %c0_8] : memref<1x32xf32, #tpu.memory_space<vmem>>, vector<1x32xf32>
    %24 = vector.broadcast %23 : vector<1x32xf32> to vector<16x32xf32>
    %25 = arith.addf %22, %24 : vector<16x32xf32>
    %26 = arith.truncf %25 : vector<16x32xf32> to vector<16x32xbf16>
    %c0_9 = arith.constant 0 : index
    %c0_10 = arith.constant 0 : index
    %27 = vector.load %arg4[%c0_9, %c0_10] : memref<16x32xbf16, #tpu.memory_space<vmem>>, vector<16x32xbf16>
    tpu.vector_store %arg4[%c0_9, %c0_10], %26 {strides = array<i32>} : memref<16x32xbf16, #tpu.memory_space<vmem>>, vector<16x32xbf16>,
    return
  }
  func.func @transform_0(%arg0: i32) -> (i32, i32) {
    %c0_i32 = arith.constant 0 : i32
    %c0_i32_0 = arith.constant 0 : i32
    return %arg0, %c0_i32 : i32, i32
  }
  func.func @transform_1(%arg0: i32) -> (i32, i32) {
    %c0_i32 = arith.constant 0 : i32
    %c0_i32_0 = arith.constant 0 : i32
    %c0_i32_1 = arith.constant 0 : i32
    return %c0_i32, %c0_i32_0 : i32, i32
  }
  func.func @transform_2(%arg0: i32) -> (i32, i32) {
    %c0_i32 = arith.constant 0 : i32
    %c0_i32_0 = arith.constant 0 : i32
    %c0_i32_1 = arith.constant 0 : i32
    return %c0_i32, %c0_i32_0 : i32, i32
  }
  func.func @transform_3(%arg0: i32) -> (i32, i32) {
    %c0_i32 = arith.constant 0 : i32
    %c0_i32_0 = arith.constant 0 : i32
    return %arg0, %c0_i32 : i32, i32
  }
}

module attributes {stable_mosaic.version = 11 : i64} {
  func.func @_flash_attn_kernel(%arg0: i32, %arg1: i32, %arg2: i32, %arg3: i32, %arg4: memref<1x4x8x8xbf16, #tpu.memory_space<vmem>>, %arg5: memref<1x4x8x8xbf16, #tpu.memory_space<vmem>>, %arg6: memref<1x4x8x8xbf16, #tpu.memory_space<vmem>>, %arg7: memref<1x8x32xbf16, #tpu.memory_space<vmem>>, %arg8: memref<4x8x1xf32, #tpu.memory_space<vmem>>, %arg9: memref<4x8x1xf32, #tpu.memory_space<vmem>>, %arg10: memref<4x8x8xf32, #tpu.memory_space<vmem>>) attributes {dimension_semantics = [#tpu.dimension_semantics<parallel>, #tpu.dimension_semantics<parallel>, #tpu.dimension_semantics<parallel>, #tpu.dimension_semantics<arbitrary>], iteration_bounds = array<i64: 2, 1, 1, 1>, scalar_prefetch = 0 : i64, scratch_operands = 3 : i64, tpu.core_type = #tpu.core_type<tc>, window_params = [{transform_indices = @transform_0, window_bounds = array<i64: 1, 4, 8, 8>}, {transform_indices = @transform_1, window_bounds = array<i64: 1, 4, 8, 8>}, {transform_indices = @transform_2, window_bounds = array<i64: 1, 4, 8, 8>}, {transform_indices = @transform_3, window_bounds = array<i64: 1, 8, 32>}]} {
    %c0_i32 = arith.constant 0 : i32
    %0 = arith.cmpi eq, %arg3, %c0_i32 : i32
    %1 = arith.extui %0 : i1 to i32
    %c0_i32_0 = arith.constant 0 : i32
    %2 = arith.cmpi ne, %1, %c0_i32_0 : i32
    scf.if %2 {
      %cst_38 = arith.constant -1.000000e+30 : f32
      %53 = vector.broadcast %cst_38 : f32 to vector<4x8x1xf32>
      %c0_39 = arith.constant 0 : index
      %c0_40 = arith.constant 0 : index
      %c0_41 = arith.constant 0 : index
      %54 = vector.load %arg8[%c0_39, %c0_40, %c0_41] : memref<4x8x1xf32, #tpu.memory_space<vmem>>, vector<4x8x1xf32>
      tpu.vector_store %arg8[%c0_39, %c0_40, %c0_41], %53 {strides = array<i32>} : memref<4x8x1xf32, #tpu.memory_space<vmem>>, vector<4x8x1xf32>,
      %cst_42 = arith.constant 0.000000e+00 : f32
      %55 = vector.broadcast %cst_42 : f32 to vector<4x8x1xf32>
      %c0_43 = arith.constant 0 : index
      %c0_44 = arith.constant 0 : index
      %c0_45 = arith.constant 0 : index
      %56 = vector.load %arg9[%c0_43, %c0_44, %c0_45] : memref<4x8x1xf32, #tpu.memory_space<vmem>>, vector<4x8x1xf32>
      tpu.vector_store %arg9[%c0_43, %c0_44, %c0_45], %55 {strides = array<i32>} : memref<4x8x1xf32, #tpu.memory_space<vmem>>, vector<4x8x1xf32>,
      %cst_46 = arith.constant 0.000000e+00 : f32
      %57 = vector.broadcast %cst_46 : f32 to vector<4x8x8xf32>
      %c0_47 = arith.constant 0 : index
      %c0_48 = arith.constant 0 : index
      %c0_49 = arith.constant 0 : index
      %58 = vector.load %arg10[%c0_47, %c0_48, %c0_49] : memref<4x8x8xf32, #tpu.memory_space<vmem>>, vector<4x8x8xf32>
      tpu.vector_store %arg10[%c0_47, %c0_48, %c0_49], %57 {strides = array<i32>} : memref<4x8x8xf32, #tpu.memory_space<vmem>>, vector<4x8x8xf32>,
    } else {
    }
    %c0 = arith.constant 0 : index
    %c0_1 = arith.constant 0 : index
    %c0_2 = arith.constant 0 : index
    %c0_3 = arith.constant 0 : index
    %3 = vector.load %arg4[%c0, %c0_1, %c0_2, %c0_3] : memref<1x4x8x8xbf16, #tpu.memory_space<vmem>>, vector<1x4x8x8xbf16>
    %4 = vector.shape_cast %3 : vector<1x4x8x8xbf16> to vector<4x8x8xbf16>
    %c0_4 = arith.constant 0 : index
    %c0_5 = arith.constant 0 : index
    %c0_6 = arith.constant 0 : index
    %c0_7 = arith.constant 0 : index
    %5 = vector.load %arg5[%c0_4, %c0_5, %c0_6, %c0_7] : memref<1x4x8x8xbf16, #tpu.memory_space<vmem>>, vector<1x4x8x8xbf16>
    %6 = vector.shape_cast %5 : vector<1x4x8x8xbf16> to vector<4x8x8xbf16>
    %c0_8 = arith.constant 0 : index
    %c0_9 = arith.constant 0 : index
    %c0_10 = arith.constant 0 : index
    %c0_11 = arith.constant 0 : index
    %7 = vector.load %arg6[%c0_8, %c0_9, %c0_10, %c0_11] : memref<1x4x8x8xbf16, #tpu.memory_space<vmem>>, vector<1x4x8x8xbf16>
    %8 = vector.shape_cast %7 : vector<1x4x8x8xbf16> to vector<4x8x8xbf16>
    "tpu.trace_start"() <{level = 10 : i32, message = "hqd,hkd->hqk"}> : () -> ()
    %cst = arith.constant dense<0.000000e+00> : vector<4x8x8xf32>
    %9 = tpu.matmul %4, %6, %cst {dimension_numbers = #tpu.dot_dimension_numbers<[2], [2], [1], [1], [0, 0, 0, 1, 1, 1], [0], [0]>} : vector<4x8x8xbf16>, vector<4x8x8xbf16>, vector<4x8x8xf32> -> vector<4x8x8xf32>
    "tpu.trace_stop"() : () -> ()
    %c8_i32 = arith.constant 8 : i32
    %10 = arith.muli %arg3, %c8_i32 : i32
    %11 = tpu.iota {dimensions = array<i32: 1>} : vector<8x8xi32>
    %12 = vector.broadcast %10 : i32 to vector<8x8xi32>
    %13 = arith.addi %12, %11 : vector<8x8xi32>
    %c8_i32_12 = arith.constant 8 : i32
    %14 = vector.broadcast %c8_i32_12 : i32 to vector<8x8xi32>
    %15 = arith.cmpi slt, %13, %14 : vector<8x8xi32>
    %c8_i32_13 = arith.constant 8 : i32
    %16 = arith.muli %arg2, %c8_i32_13 : i32
    %17 = tpu.iota {dimensions = array<i32: 0>} : vector<8x8xi32>
    %18 = vector.broadcast %16 : i32 to vector<8x8xi32>
    %19 = arith.addi %18, %17 : vector<8x8xi32>
    %20 = arith.cmpi sle, %13, %19 : vector<8x8xi32>
    %21 = arith.andi %15, %20 : vector<8x8xi1>
    %22 = vector.shape_cast %21 : vector<8x8xi1> to vector<1x8x8xi1>
    %cst_14 = arith.constant -1.000000e+30 : f32
    %23 = vector.shape_cast %22 : vector<1x8x8xi1> to vector<1x8x8xi1>
    %24 = vector.broadcast %23 : vector<1x8x8xi1> to vector<4x8x8xi1>
    %25 = vector.broadcast %cst_14 : f32 to vector<4x8x8xf32>
    %26 = arith.select %24, %9, %25 : vector<4x8x8xi1>, vector<4x8x8xf32>
    %c0_15 = arith.constant 0 : index
    %c0_16 = arith.constant 0 : index
    %c0_17 = arith.constant 0 : index
    %27 = vector.load %arg8[%c0_15, %c0_16, %c0_17] : memref<4x8x1xf32, #tpu.memory_space<vmem>>, vector<4x8x1xf32>
    %cst_18 = arith.constant dense<0xFF800000> : vector<4x8xf32>
    %28 = vector.multi_reduction <maximumf>, %26, %cst_18 [2] : vector<4x8x8xf32> to vector<4x8xf32>
    %29 = vector.shape_cast %28 : vector<4x8xf32> to vector<4x8x1xf32>
    %30 = arith.maximumf %27, %29 : vector<4x8x1xf32>
    %31 = arith.subf %27, %30 : vector<4x8x1xf32>
    %32 = math.exp %31 : vector<4x8x1xf32>
    %33 = vector.broadcast %30 : vector<4x8x1xf32> to vector<4x8x8xf32>
    %34 = arith.subf %26, %33 : vector<4x8x8xf32>
    %35 = math.exp %34 : vector<4x8x8xf32>
    %c0_19 = arith.constant 0 : index
    %c0_20 = arith.constant 0 : index
    %c0_21 = arith.constant 0 : index
    %36 = vector.load %arg9[%c0_19, %c0_20, %c0_21] : memref<4x8x1xf32, #tpu.memory_space<vmem>>, vector<4x8x1xf32>
    %37 = arith.mulf %32, %36 : vector<4x8x1xf32>
    %cst_22 = arith.constant dense<0.000000e+00> : vector<4x8xf32>
    %38 = vector.multi_reduction <add>, %35, %cst_22 [2] : vector<4x8x8xf32> to vector<4x8xf32>
    %39 = vector.shape_cast %38 : vector<4x8xf32> to vector<4x8x1xf32>
    %40 = arith.addf %37, %39 : vector<4x8x1xf32>
    %c0_23 = arith.constant 0 : index
    %c0_24 = arith.constant 0 : index
    %c0_25 = arith.constant 0 : index
    %41 = vector.load %arg9[%c0_23, %c0_24, %c0_25] : memref<4x8x1xf32, #tpu.memory_space<vmem>>, vector<4x8x1xf32>
    tpu.vector_store %arg9[%c0_23, %c0_24, %c0_25], %40 {strides = array<i32>} : memref<4x8x1xf32, #tpu.memory_space<vmem>>, vector<4x8x1xf32>,
    %c0_26 = arith.constant 0 : index
    %c0_27 = arith.constant 0 : index
    %c0_28 = arith.constant 0 : index
    %42 = vector.load %arg10[%c0_26, %c0_27, %c0_28] : memref<4x8x8xf32, #tpu.memory_space<vmem>>, vector<4x8x8xf32>
    %43 = vector.broadcast %32 : vector<4x8x1xf32> to vector<4x8x8xf32>
    %44 = arith.mulf %43, %42 : vector<4x8x8xf32>
    %45 = arith.truncf %35 : vector<4x8x8xf32> to vector<4x8x8xbf16>
    "tpu.trace_start"() <{level = 10 : i32, message = "hqk,hkd->hqd"}> : () -> ()
    %cst_29 = arith.constant dense<0.000000e+00> : vector<4x8x8xf32>
    %46 = tpu.matmul %45, %8, %cst_29 {dimension_numbers = #tpu.dot_dimension_numbers<[2], [1], [1], [2], [0, 0, 0, 1, 1, 2], [0], [0]>} : vector<4x8x8xbf16>, vector<4x8x8xbf16>, vector<4x8x8xf32> -> vector<4x8x8xf32>
    "tpu.trace_stop"() : () -> ()
    %47 = arith.addf %44, %46 : vector<4x8x8xf32>
    %c0_30 = arith.constant 0 : index
    %c0_31 = arith.constant 0 : index
    %c0_32 = arith.constant 0 : index
    %48 = vector.load %arg10[%c0_30, %c0_31, %c0_32] : memref<4x8x8xf32, #tpu.memory_space<vmem>>, vector<4x8x8xf32>
    tpu.vector_store %arg10[%c0_30, %c0_31, %c0_32], %47 {strides = array<i32>} : memref<4x8x8xf32, #tpu.memory_space<vmem>>, vector<4x8x8xf32>,
    %c0_33 = arith.constant 0 : index
    %c0_34 = arith.constant 0 : index
    %c0_35 = arith.constant 0 : index
    %49 = vector.load %arg8[%c0_33, %c0_34, %c0_35] : memref<4x8x1xf32, #tpu.memory_space<vmem>>, vector<4x8x1xf32>
    tpu.vector_store %arg8[%c0_33, %c0_34, %c0_35], %30 {strides = array<i32>} : memref<4x8x1xf32, #tpu.memory_space<vmem>>, vector<4x8x1xf32>,
    %c0_i32_36 = arith.constant 0 : i32
    %50 = arith.cmpi eq, %arg3, %c0_i32_36 : i32
    %51 = arith.extui %50 : i1 to i32
    %c0_i32_37 = arith.constant 0 : i32
    %52 = arith.cmpi ne, %51, %c0_i32_37 : i32
    scf.if %52 {
      %c0_38 = arith.constant 0 : index
      %c0_39 = arith.constant 0 : index
      %c0_40 = arith.constant 0 : index
      %53 = vector.load %arg10[%c0_38, %c0_39, %c0_40] : memref<4x8x8xf32, #tpu.memory_space<vmem>>, vector<4x8x8xf32>
      %c0_41 = arith.constant 0 : index
      %c0_42 = arith.constant 0 : index
      %c0_43 = arith.constant 0 : index
      %54 = vector.load %arg9[%c0_41, %c0_42, %c0_43] : memref<4x8x1xf32, #tpu.memory_space<vmem>>, vector<4x8x1xf32>
      %55 = tpu.reciprocal %54 {approx = true} : vector<4x8x1xf32> -> vector<4x8x1xf32>
      %56 = vector.broadcast %55 : vector<4x8x1xf32> to vector<4x8x8xf32>
      %57 = arith.mulf %53, %56 : vector<4x8x8xf32>
      %58 = vector.extract_strided_slice %57 {offsets = [0, 0, 0], sizes = [1, 8, 8], strides = [1, 1, 1]} : vector<4x8x8xf32> to vector<1x8x8xf32>
      %59 = vector.shape_cast %58 : vector<1x8x8xf32> to vector<8x8xf32>
      %60 = arith.truncf %59 : vector<8x8xf32> to vector<8x8xbf16>
      %c0_44 = arith.constant 0 : index
      %c0_45 = arith.constant 0 : index
      %c0_46 = arith.constant 0 : index
      %61 = vector.load %arg7[%c0_44, %c0_45, %c0_46] : memref<1x8x32xbf16, #tpu.memory_space<vmem>>, vector<1x8x8xbf16>
      %62 = vector.shape_cast %61 : vector<1x8x8xbf16> to vector<8x8xbf16>
      %63 = vector.shape_cast %60 : vector<8x8xbf16> to vector<1x8x8xbf16>
      tpu.vector_store %arg7[%c0_44, %c0_45, %c0_46], %63 {strides = array<i32>} : memref<1x8x32xbf16, #tpu.memory_space<vmem>>, vector<1x8x8xbf16>,
      %64 = vector.extract_strided_slice %57 {offsets = [1, 0, 0], sizes = [1, 8, 8], strides = [1, 1, 1]} : vector<4x8x8xf32> to vector<1x8x8xf32>
      %65 = vector.shape_cast %64 : vector<1x8x8xf32> to vector<8x8xf32>
      %66 = arith.truncf %65 : vector<8x8xf32> to vector<8x8xbf16>
      %c0_47 = arith.constant 0 : index
      %c0_48 = arith.constant 0 : index
      %c8 = arith.constant 8 : index
      %67 = vector.load %arg7[%c0_47, %c0_48, %c8] : memref<1x8x32xbf16, #tpu.memory_space<vmem>>, vector<1x8x8xbf16>
      %68 = vector.shape_cast %67 : vector<1x8x8xbf16> to vector<8x8xbf16>
      %69 = vector.shape_cast %66 : vector<8x8xbf16> to vector<1x8x8xbf16>
      tpu.vector_store %arg7[%c0_47, %c0_48, %c8], %69 {strides = array<i32>} : memref<1x8x32xbf16, #tpu.memory_space<vmem>>, vector<1x8x8xbf16>,
      %70 = vector.extract_strided_slice %57 {offsets = [2, 0, 0], sizes = [1, 8, 8], strides = [1, 1, 1]} : vector<4x8x8xf32> to vector<1x8x8xf32>
      %71 = vector.shape_cast %70 : vector<1x8x8xf32> to vector<8x8xf32>
      %72 = arith.truncf %71 : vector<8x8xf32> to vector<8x8xbf16>
      %c0_49 = arith.constant 0 : index
      %c0_50 = arith.constant 0 : index
      %c16 = arith.constant 16 : index
      %73 = vector.load %arg7[%c0_49, %c0_50, %c16] : memref<1x8x32xbf16, #tpu.memory_space<vmem>>, vector<1x8x8xbf16>
      %74 = vector.shape_cast %73 : vector<1x8x8xbf16> to vector<8x8xbf16>
      %75 = vector.shape_cast %72 : vector<8x8xbf16> to vector<1x8x8xbf16>
      tpu.vector_store %arg7[%c0_49, %c0_50, %c16], %75 {strides = array<i32>} : memref<1x8x32xbf16, #tpu.memory_space<vmem>>, vector<1x8x8xbf16>,
      %76 = vector.extract_strided_slice %57 {offsets = [3, 0, 0], sizes = [1, 8, 8], strides = [1, 1, 1]} : vector<4x8x8xf32> to vector<1x8x8xf32>
      %77 = vector.shape_cast %76 : vector<1x8x8xf32> to vector<8x8xf32>
      %78 = arith.truncf %77 : vector<8x8xf32> to vector<8x8xbf16>
      %c0_51 = arith.constant 0 : index
      %c0_52 = arith.constant 0 : index
      %c24 = arith.constant 24 : index
      %79 = vector.load %arg7[%c0_51, %c0_52, %c24] : memref<1x8x32xbf16, #tpu.memory_space<vmem>>, vector<1x8x8xbf16>
      %80 = vector.shape_cast %79 : vector<1x8x8xbf16> to vector<8x8xbf16>
      %81 = vector.shape_cast %78 : vector<8x8xbf16> to vector<1x8x8xbf16>
      tpu.vector_store %arg7[%c0_51, %c0_52, %c24], %81 {strides = array<i32>} : memref<1x8x32xbf16, #tpu.memory_space<vmem>>, vector<1x8x8xbf16>,
    } else {
    }
    return
  }
  func.func @transform_0(%arg0: i32, %arg1: i32, %arg2: i32, %arg3: i32) -> (i32, i32, i32, i32) {
    %c0_i32 = arith.constant 0 : i32
    %c0_i32_0 = arith.constant 0 : i32
    return %arg0, %arg1, %arg2, %c0_i32 : i32, i32, i32, i32
  }
  func.func @transform_1(%arg0: i32, %arg1: i32, %arg2: i32, %arg3: i32) -> (i32, i32, i32, i32) {
    %c0_i32 = arith.constant 0 : i32
    %c0_i32_0 = arith.constant 0 : i32
    return %arg0, %arg1, %arg3, %c0_i32 : i32, i32, i32, i32
  }
  func.func @transform_2(%arg0: i32, %arg1: i32, %arg2: i32, %arg3: i32) -> (i32, i32, i32, i32) {
    %c0_i32 = arith.constant 0 : i32
    %c0_i32_0 = arith.constant 0 : i32
    return %arg0, %arg1, %arg3, %c0_i32 : i32, i32, i32, i32
  }
  func.func @transform_3(%arg0: i32, %arg1: i32, %arg2: i32, %arg3: i32) -> (i32, i32, i32) {
    %c0_i32 = arith.constant 0 : i32
    return %arg0, %arg2, %arg1 : i32, i32, i32
  }
}

module attributes {stable_mosaic.version = 11 : i64} {
  func.func @_matmul_kernel(%arg0: i32, %arg1: i32, %arg2: i32, %arg3: memref<16x128xbf16, #tpu.memory_space<vmem>>, %arg4: memref<128x128xbf16, #tpu.memory_space<vmem>>, %arg5: memref<1x128xf32, #tpu.memory_space<vmem>>, %arg6: memref<16x128xbf16, #tpu.memory_space<vmem>>, %arg7: memref<16x128xf32, #tpu.memory_space<vmem>>) attributes {dimension_semantics = [#tpu.dimension_semantics<parallel>, #tpu.dimension_semantics<parallel>, #tpu.dimension_semantics<arbitrary>], iteration_bounds = array<i64: 1, 1, 1>, scalar_prefetch = 0 : i64, scratch_operands = 1 : i64, tpu.core_type = #tpu.core_type<tc>, window_params = [{transform_indices = @transform_0, window_bounds = array<i64: 16, 128>}, {transform_indices = @transform_1, window_bounds = array<i64: 128, 128>}, {transform_indices = @transform_2, window_bounds = array<i64: 1, 128>}, {transform_indices = @transform_3, window_bounds = array<i64: 16, 128>}]} {
    %c0_i32 = arith.constant 0 : i32
    %0 = arith.cmpi eq, %arg2, %c0_i32 : i32
    %1 = arith.extui %0 : i1 to i32
    %c0_i32_0 = arith.constant 0 : i32
    %2 = arith.cmpi ne, %1, %c0_i32_0 : i32
    scf.if %2 {
      %cst_10 = arith.constant 0.000000e+00 : f32
      %12 = vector.broadcast %cst_10 : f32 to vector<16x128xf32>
      %c0_11 = arith.constant 0 : index
      %c0_12 = arith.constant 0 : index
      %13 = vector.load %arg7[%c0_11, %c0_12] : memref<16x128xf32, #tpu.memory_space<vmem>>, vector<16x128xf32>
      tpu.vector_store %arg7[%c0_11, %c0_12], %12 {strides = array<i32>} : memref<16x128xf32, #tpu.memory_space<vmem>>, vector<16x128xf32>,
    } else {
    }
    %c0 = arith.constant 0 : index
    %c0_1 = arith.constant 0 : index
    %3 = vector.load %arg3[%c0, %c0_1] : memref<16x128xbf16, #tpu.memory_space<vmem>>, vector<16x128xbf16>
    %c0_2 = arith.constant 0 : index
    %c0_3 = arith.constant 0 : index
    %4 = vector.load %arg7[%c0_2, %c0_3] : memref<16x128xf32, #tpu.memory_space<vmem>>, vector<16x128xf32>
    %c0_4 = arith.constant 0 : index
    %c0_5 = arith.constant 0 : index
    %5 = vector.load %arg4[%c0_4, %c0_5] : memref<128x128xbf16, #tpu.memory_space<vmem>>, vector<128x128xbf16>
    %cst = arith.constant dense<0.000000e+00> : vector<16x128xf32>
    %6 = tpu.matmul %3, %5, %cst {dimension_numbers = #tpu.dot_dimension_numbers<[1], [0], [0], [1], [0, 0, 1, 1], [], []>} : vector<16x128xbf16>, vector<128x128xbf16>, vector<16x128xf32> -> vector<16x128xf32>
    %7 = arith.addf %4, %6 : vector<16x128xf32>
    %c0_6 = arith.constant 0 : index
    %c0_7 = arith.constant 0 : index
    %8 = vector.load %arg7[%c0_6, %c0_7] : memref<16x128xf32, #tpu.memory_space<vmem>>, vector<16x128xf32>
    tpu.vector_store %arg7[%c0_6, %c0_7], %7 {strides = array<i32>} : memref<16x128xf32, #tpu.memory_space<vmem>>, vector<16x128xf32>,
    %c0_i32_8 = arith.constant 0 : i32
    %9 = arith.cmpi eq, %arg2, %c0_i32_8 : i32
    %10 = arith.extui %9 : i1 to i32
    %c0_i32_9 = arith.constant 0 : i32
    %11 = arith.cmpi ne, %10, %c0_i32_9 : i32
    scf.if %11 {
      %c0_10 = arith.constant 0 : index
      %c0_11 = arith.constant 0 : index
      %12 = vector.load %arg7[%c0_10, %c0_11] : memref<16x128xf32, #tpu.memory_space<vmem>>, vector<16x128xf32>
      %c0_12 = arith.constant 0 : index
      %c0_13 = arith.constant 0 : index
      %13 = vector.load %arg5[%c0_12, %c0_13] : memref<1x128xf32, #tpu.memory_space<vmem>>, vector<1x128xf32>
      %14 = vector.broadcast %13 : vector<1x128xf32> to vector<16x128xf32>
      %15 = arith.addf %12, %14 : vector<16x128xf32>
      %16 = arith.truncf %15 : vector<16x128xf32> to vector<16x128xbf16>
      %c0_14 = arith.constant 0 : index
      %c0_15 = arith.constant 0 : index
      %17 = vector.load %arg6[%c0_14, %c0_15] : memref<16x128xbf16, #tpu.memory_space<vmem>>, vector<16x128xbf16>
      tpu.vector_store %arg6[%c0_14, %c0_15], %16 {strides = array<i32>} : memref<16x128xbf16, #tpu.memory_space<vmem>>, vector<16x128xbf16>,
    } else {
    }
    return
  }
  func.func @transform_0(%arg0: i32, %arg1: i32, %arg2: i32) -> (i32, i32) {
    %c0_i32 = arith.constant 0 : i32
    return %arg0, %arg2 : i32, i32
  }
  func.func @transform_1(%arg0: i32, %arg1: i32, %arg2: i32) -> (i32, i32) {
    %c0_i32 = arith.constant 0 : i32
    return %arg2, %arg1 : i32, i32
  }
  func.func @transform_2(%arg0: i32, %arg1: i32, %arg2: i32) -> (i32, i32) {
    %c0_i32 = arith.constant 0 : i32
    %c0_i32_0 = arith.constant 0 : i32
    return %c0_i32, %arg1 : i32, i32
  }
  func.func @transform_3(%arg0: i32, %arg1: i32, %arg2: i32) -> (i32, i32) {
    %c0_i32 = arith.constant 0 : i32
    return %arg0, %arg1 : i32, i32
  }
}

module attributes {stable_mosaic.version = 11 : i64} {
  func.func @_matmul_kernel(%arg0: i32, %arg1: i32, %arg2: i32, %arg3: memref<16x128xbf16, #tpu.memory_space<vmem>>, %arg4: memref<128x128xbf16, #tpu.memory_space<vmem>>, %arg5: memref<1x128xf32, #tpu.memory_space<vmem>>, %arg6: memref<1x128xf32, #tpu.memory_space<vmem>>, %arg7: memref<16x128xf32, #tpu.memory_space<vmem>>, %arg8: memref<16x128xf32, #tpu.memory_space<vmem>>) attributes {dimension_semantics = [#tpu.dimension_semantics<parallel>, #tpu.dimension_semantics<parallel>, #tpu.dimension_semantics<arbitrary>], iteration_bounds = array<i64: 1, 1, 1>, scalar_prefetch = 0 : i64, scratch_operands = 1 : i64, tpu.core_type = #tpu.core_type<tc>, window_params = [{transform_indices = @transform_0, window_bounds = array<i64: 16, 128>}, {transform_indices = @transform_1, window_bounds = array<i64: 128, 128>}, {transform_indices = @transform_2, window_bounds = array<i64: 1, 128>}, {transform_indices = @transform_3, window_bounds = array<i64: 1, 128>}, {transform_indices = @transform_4, window_bounds = array<i64: 16, 128>}]} {
    %c0_i32 = arith.constant 0 : i32
    %0 = arith.cmpi eq, %arg2, %c0_i32 : i32
    %1 = arith.extui %0 : i1 to i32
    %c0_i32_0 = arith.constant 0 : i32
    %2 = arith.cmpi ne, %1, %c0_i32_0 : i32
    scf.if %2 {
      %cst_20 = arith.constant 0.000000e+00 : f32
      %40 = vector.broadcast %cst_20 : f32 to vector<16x128xf32>
      %c0_21 = arith.constant 0 : index
      %c0_22 = arith.constant 0 : index
      %41 = vector.load %arg8[%c0_21, %c0_22] : memref<16x128xf32, #tpu.memory_space<vmem>>, vector<16x128xf32>
      tpu.vector_store %arg8[%c0_21, %c0_22], %40 {strides = array<i32>} : memref<16x128xf32, #tpu.memory_space<vmem>>, vector<16x128xf32>,
    } else {
    }
    %c0 = arith.constant 0 : index
    %c0_1 = arith.constant 0 : index
    %3 = vector.load %arg3[%c0, %c0_1] : memref<16x128xbf16, #tpu.memory_space<vmem>>, vector<16x128xbf16>
    %4 = arith.extf %3 : vector<16x128xbf16> to vector<16x128xf32>
    %cst = arith.constant dense<0.000000e+00> : vector<16xf32>
    %5 = vector.multi_reduction <add>, %4, %cst [1] : vector<16x128xf32> to vector<16xf32>
    %6 = vector.shape_cast %5 : vector<16xf32> to vector<16x1xf32>
    %cst_2 = arith.constant 3.125000e-02 : f32
    %7 = vector.broadcast %cst_2 : f32 to vector<16x1xf32>
    %8 = arith.mulf %6, %7 : vector<16x1xf32>
    %9 = arith.mulf %4, %4 : vector<16x128xf32>
    %cst_3 = arith.constant dense<0.000000e+00> : vector<16xf32>
    %10 = vector.multi_reduction <add>, %9, %cst_3 [1] : vector<16x128xf32> to vector<16xf32>
    %11 = vector.shape_cast %10 : vector<16xf32> to vector<16x1xf32>
    %cst_4 = arith.constant 3.125000e-02 : f32
    %12 = vector.broadcast %cst_4 : f32 to vector<16x1xf32>
    %13 = arith.mulf %11, %12 : vector<16x1xf32>
    %14 = arith.mulf %8, %8 : vector<16x1xf32>
    %15 = arith.subf %13, %14 : vector<16x1xf32>
    %cst_5 = arith.constant 0.000000e+00 : f32
    %16 = vector.broadcast %cst_5 : f32 to vector<16x1xf32>
    %17 = arith.maximumf %15, %16 : vector<16x1xf32>
    %18 = vector.broadcast %8 : vector<16x1xf32> to vector<16x128xf32>
    %19 = arith.subf %4, %18 : vector<16x128xf32>
    %cst_6 = arith.constant 9.99999974E-6 : f32
    %20 = vector.broadcast %cst_6 : f32 to vector<16x1xf32>
    %21 = arith.addf %17, %20 : vector<16x1xf32>
    %22 = math.rsqrt %21 : vector<16x1xf32>
    %23 = vector.broadcast %22 : vector<16x1xf32> to vector<16x128xf32>
    %24 = arith.mulf %19, %23 : vector<16x128xf32>
    %c0_7 = arith.constant 0 : index
    %c0_8 = arith.constant 0 : index
    %25 = vector.load %arg5[%c0_7, %c0_8] : memref<1x128xf32, #tpu.memory_space<vmem>>, vector<1x128xf32>
    %26 = vector.broadcast %25 : vector<1x128xf32> to vector<16x128xf32>
    %27 = arith.mulf %24, %26 : vector<16x128xf32>
    %c0_9 = arith.constant 0 : index
    %c0_10 = arith.constant 0 : index
    %28 = vector.load %arg6[%c0_9, %c0_10] : memref<1x128xf32, #tpu.memory_space<vmem>>, vector<1x128xf32>
    %29 = vector.broadcast %28 : vector<1x128xf32> to vector<16x128xf32>
    %30 = arith.addf %27, %29 : vector<16x128xf32>
    %31 = arith.truncf %30 : vector<16x128xf32> to vector<16x128xbf16>
    %c0_11 = arith.constant 0 : index
    %c0_12 = arith.constant 0 : index
    %32 = vector.load %arg8[%c0_11, %c0_12] : memref<16x128xf32, #tpu.memory_space<vmem>>, vector<16x128xf32>
    %c0_13 = arith.constant 0 : index
    %c0_14 = arith.constant 0 : index
    %33 = vector.load %arg4[%c0_13, %c0_14] : memref<128x128xbf16, #tpu.memory_space<vmem>>, vector<128x128xbf16>
    %cst_15 = arith.constant dense<0.000000e+00> : vector<16x128xf32>
    %34 = tpu.matmul %31, %33, %cst_15 {dimension_numbers = #tpu.dot_dimension_numbers<[1], [0], [0], [1], [0, 0, 1, 1], [], []>} : vector<16x128xbf16>, vector<128x128xbf16>, vector<16x128xf32> -> vector<16x128xf32>
    %35 = arith.addf %32, %34 : vector<16x128xf32>
    %c0_16 = arith.constant 0 : index
    %c0_17 = arith.constant 0 : index
    %36 = vector.load %arg8[%c0_16, %c0_17] : memref<16x128xf32, #tpu.memory_space<vmem>>, vector<16x128xf32>
    tpu.vector_store %arg8[%c0_16, %c0_17], %35 {strides = array<i32>} : memref<16x128xf32, #tpu.memory_space<vmem>>, vector<16x128xf32>,
    %c0_i32_18 = arith.constant 0 : i32
    %37 = arith.cmpi eq, %arg2, %c0_i32_18 : i32
    %38 = arith.extui %37 : i1 to i32
    %c0_i32_19 = arith.constant 0 : i32
    %39 = arith.cmpi ne, %38, %c0_i32_19 : i32
    scf.if %39 {
      %c0_20 = arith.constant 0 : index
      %c0_21 = arith.constant 0 : index
      %40 = vector.load %arg8[%c0_20, %c0_21] : memref<16x128xf32, #tpu.memory_space<vmem>>, vector<16x128xf32>
      %c0_22 = arith.constant 0 : index
      %c0_23 = arith.constant 0 : index
      %41 = vector.load %arg7[%c0_22, %c0_23] : memref<16x128xf32, #tpu.memory_space<vmem>>, vector<16x128xf32>
      tpu.vector_store %arg7[%c0_22, %c0_23], %40 {strides = array<i32>} : memref<16x128xf32, #tpu.memory_space<vmem>>, vector<16x128xf32>,
    } else {
    }
    return
  }
  func.func @transform_0(%arg0: i32, %arg1: i32, %arg2: i32) -> (i32, i32) {
    %c0_i32 = arith.constant 0 : i32
    return %arg0, %arg2 : i32, i32
  }
  func.func @transform_1(%arg0: i32, %arg1: i32, %arg2: i32) -> (i32, i32) {
    %c0_i32 = arith.constant 0 : i32
    return %arg2, %arg1 : i32, i32
  }
  func.func @transform_2(%arg0: i32, %arg1: i32, %arg2: i32) -> (i32, i32) {
    %c0_i32 = arith.constant 0 : i32
    %c0_i32_0 = arith.constant 0 : i32
    return %c0_i32, %arg2 : i32, i32
  }
  func.func @transform_3(%arg0: i32, %arg1: i32, %arg2: i32) -> (i32, i32) {
    %c0_i32 = arith.constant 0 : i32
    %c0_i32_0 = arith.constant 0 : i32
    return %c0_i32, %arg2 : i32, i32
  }
  func.func @transform_4(%arg0: i32, %arg1: i32, %arg2: i32) -> (i32, i32) {
    %c0_i32 = arith.constant 0 : i32
    return %arg0, %arg1 : i32, i32
  }
}

</mosaic_0001>

<bundles_post_ra>
// kernel: whisper_forward.32
= control target key start
LH: loop header
LB: loop body
LE: loop exit
PB: predicated region body
PF: predicated region fallthrough
CT: control target
= control target key end

     0   :  { %s379_s1 = inlined_call_operand.vmem [shape: bf16[128,128], index: 1, kind: input, shape index: {}]   ;;  %s380_s0 = inlined_call_operand.vmem [shape: bf16[32,128], index: 0, kind: input, shape index: {}]   ;;  %s381_s2 = inlined_call_operand.vmem [shape: f32[1,128], index: 2, kind: input, shape index: {}]   ;;  %s382_s3 = inlined_call_operand.vmem [shape: bf16[32,128], index: 3, kind: output, shape index: {}]  }
   0x1   :  { %v302_v0 = vld [vmem:[%s379_s1] sm:$0xff]   ;;  %v303_v1 = vld [vmem:[%s379_s1 + $0x8] sm:$0xff]   ;;  %v304_v2 = vld [vmem:[%s379_s1 + $0x10] sm:$0xff]  }
   0x2   :  { %282 = vmatprep.subr.bf16.mxu0 %v302_v0  ;;  %v305_v3 = vld [vmem:[%s379_s1 + $0x18] sm:$0xff]   ;;  %v310_v4 = vld [vmem:[%s380_s0] sm:$0xff]   ;;  %v307_v6 = vld [vmem:[%s379_s1 + $0x28] sm:$0xff]  }
   0x3   :  { %283 = vmatpush3.bf16.msra.mxu0 %v302_v0  ;;  %298 = vmatprep.mubr.bf16.mxu0 %v310_v4  ;;  %v306_v5 = vld [vmem:[%s379_s1 + $0x20] sm:$0xff]   ;;  %v308_v7 = vld [vmem:[%s379_s1 + $0x30] sm:$0xff]   ;;  %v309_v8 = vld [vmem:[%s379_s1 + $0x38] sm:$0xff]  }
   0x4   :  { %284 = vmatprep.subr.bf16.mxu0 %v303_v1  ;;  %v311_v9 = vld [vmem:[%s380_s0 + $0x8] sm:$0xff]   ;;  %v252_v10 = vld [vmem:[%s381_s2] ss:$0 sm:$0xff] }
   0x7   :  { %285 = vmatpush3.bf16.msra.mxu0 %v303_v1 }
   0x8   :  { %286 = vmatprep.subr.bf16.mxu0 %v304_v2 }
   0xb   :  { %287 = vmatpush3.bf16.msra.mxu0 %v304_v2 }
   0xc   :  { %288 = vmatprep.subr.bf16.mxu0 %v305_v3 }
   0xf   :  { %289 = vmatpush3.bf16.msra.mxu0 %v305_v3 }
  0x10   :  { %290 = vmatprep.subr.bf16.mxu0 %v306_v5 }
  0x13   :  { %291 = vmatpush3.bf16.msra.mxu0 %v306_v5 }
  0x14   :  { %292 = vmatprep.subr.bf16.mxu0 %v307_v6 }
  0x17   :  { %293 = vmatpush3.bf16.msra.mxu0 %v307_v6 }
  0x18   :  { %294 = vmatprep.subr.bf16.mxu0 %v308_v7 }
  0x1b   :  { %295 = vmatpush3.bf16.msra.mxu0 %v308_v7 }
  0x1c   :  { %296 = vmatprep.subr.bf16.mxu0 %v309_v8 }
  0x1f   :  { %297 = vmatpush3.bf16.msra.mxu0 %v309_v8 }
  0x22   :  { %299 = vmatmul.mubr.bf16.vlgmr.msra.gmra.mrb[0].mxu0 %v311_v9 }
  0xf5   :  { %v300_v11 = vpop.f32.mrb[0].mxu0 }
  0xf6   :  { %v180_v12 = vadd.f32 %v300_v11, %v252_v10  ;;  %v141_v13 = vpop.f32.mrb[1].mxu0 }
  0xf7   :  { %v178_v14 = vadd.f32 %v252_v10, %v141_v13  ;;  %v301_v15 = vpop.f32.mrb[2].mxu0 }
  0xf8   :  { %v184_v16 = vmul.f32 %v180_v12, %v180_v12  ;;  %v181_v17 = vadd.f32 %v301_v15, %v252_v10  ;;  %v144_v18 = vpop.f32.mrb[3].mxu0 }
  0xf9   :  { %v182_v19 = vmul.f32 %v178_v14, %v178_v14  ;;  %v179_v20 = vadd.f32 %v252_v10, %v144_v18 }
  0xfa   :  { %v188_v21 = vmul.f32 %v184_v16, %v180_v12  ;;  %v185_v22 = vmul.f32 %v181_v17, %v181_v17 }
  0xfb   :  { %v186_v23 = vmul.f32 %v182_v19, %v178_v14  ;;  %v183_v24 = vmul.f32 %v179_v20, %v179_v20 }
  0xfc   :  { %v192_v25 = vmul.f32 0.044715, %v188_v21  ;;  %v189_v26 = vmul.f32 %v185_v22, %v181_v17 }
  0xfd   :  { %v190_v27 = vmul.f32 0.044715, %v186_v23  ;;  %v187_v28 = vmul.f32 %v183_v24, %v179_v20 }
  0xfe   :  { %v196_v29 = vadd.f32 %v192_v25, %v180_v12  ;;  %v193_v30 = vmul.f32 0.044715, %v189_v26 }
  0xff   :  { %v194_v31 = vadd.f32 %v190_v27, %v178_v14  ;;  %v191_v32 = vmul.f32 0.044715, %v187_v28 }
 0x100   :  { %v200_v33 = vmul.f32 0.7978846, %v196_v29  ;;  %v197_v34 = vadd.f32 %v193_v30, %v181_v17 }
 0x101   :  { %v198_v35 = vmul.f32 0.7978846, %v194_v31  ;;  %v195_v36 = vadd.f32 %v191_v32, %v179_v20 }
 0x102   :  { %312 = vtanh.f32 %v200_v33  ;;  %v201_v37 = vmul.f32 0.7978846, %v197_v34 }
 0x103   :  { %314 = vtanh.f32 %v198_v35  ;;  %v199_v38 = vmul.f32 0.7978846, %v195_v36 }
 0x104   :  { %316 = vtanh.f32 %v201_v37 }
 0x105   :  { %318 = vtanh.f32 %v199_v38 }
 0x10c   :  { %v313_v39 = vpop.eup %312 }
 0x10d   :  { %v315_v40 = vpop.eup %314  ;;  %v208_v41 = vadd.f32 1.0, %v313_v39 }
 0x10e   :  { %v317_v42 = vpop.eup %316  ;;  %v206_v43 = vadd.f32 1.0, %v315_v40 }
 0x10f   :  { %v319_v44 = vpop.eup %318  ;;  %v212_v45 = vmul.f32 0.5, %v208_v41  ;;  %v209_v46 = vadd.f32 1.0, %v317_v42 }
 0x110   :  { %v210_v47 = vmul.f32 0.5, %v206_v43  ;;  %v207_v48 = vadd.f32 1.0, %v319_v44 }
 0x111   :  { %v213_v49 = vmul.f32 0.5, %v209_v46  ;;  %v216_v51 = vmul.f32 %v212_v45, %v180_v12 }
 0x112   :  { %v211_v50 = vmul.f32 0.5, %v207_v48  ;;  %v214_v53 = vmul.f32 %v210_v47, %v178_v14 }
 0x113   :  { %v217_v52 = vmul.f32 %v213_v49, %v181_v17 }
 0x114   :  { %v215_v54 = vmul.f32 %v211_v50, %v179_v20 }
 0x115   :  { %v269_v55 = vpack.c.bf16 %v217_v52, %v216_v51 }
 0x116   :  { %v264_v56 = vpack.c.bf16 %v215_v54, %v214_v53 }
 0x117   :  { %271 = vst [vmem:[%s382_s3 + $0x8] sm:$0xff] %v269_v55  }
 0x118   :  { %265 = vst [vmem:[%s382_s3] sm:$0xff] %v264_v56  }

// kernel: whisper_forward.33
= control target key start
LH: loop header
LB: loop body
LE: loop exit
PB: predicated region body
PF: predicated region fallthrough
CT: control target
= control target key end

     0   :  { %v249_v0 = vmov 0.0   ;;  %vm250_vm0 = vmmov 0   ;;  %s304_s1 = inlined_call_operand.vmem [shape: bf16[128,128], index: 1, kind: input, shape index: {}]   ;;  %s305_s0 = inlined_call_operand.vmem [shape: bf16[16,128], index: 0, kind: input, shape index: {}]   ;;  %s306_s2 = inlined_call_operand.vmem [shape: f32[1,128], index: 2, kind: input, shape index: {}]   ;;  %s307_s3 = inlined_call_operand.vmem [shape: bf16[16,128], index: 3, kind: output, shape index: {}]  }
   0x1   :  { %214 = vmatprep.subr.bf16.mxu0 %v249_v0  ;;  %v236_v1 = vld [vmem:[%s304_s1] sm:$0xff]   ;;  %230 = vmatprep.mubr.msk.bf16.mxu0 %vm250_vm0, %v249_v0  ;;  %v237_v2 = vld [vmem:[%s304_s1 + $0x8] sm:$0xff]   ;;  %v238_v3 = vld [vmem:[%s304_s1 + $0x10] sm:$0xff]  }
   0x2   :  { %215 = vmatpush3.bf16.msra.mxu0 %v236_v1  ;;  %v239_v4 = vld [vmem:[%s304_s1 + $0x18] sm:$0xff]   ;;  %v240_v5 = vld [vmem:[%s304_s1 + $0x20] sm:$0xff]   ;;  %v241_v6 = vld [vmem:[%s304_s1 + $0x28] sm:$0xff]  }
   0x3   :  { %216 = vmatprep.subr.bf16.mxu0 %v249_v0  ;;  %v242_v7 = vld [vmem:[%s304_s1 + $0x30] sm:$0xff]   ;;  %v243_v8 = vld [vmem:[%s304_s1 + $0x38] sm:$0xff]   ;;  %v244_v9 = vld [vmem:[%s305_s0] sm:$0xff]  }
   0x4   :  { %v195_v10 = vld [vmem:[%s306_s2] ss:$0 sm:$0xff] }
   0x6   :  { %217 = vmatpush3.bf16.msra.mxu0 %v237_v2 }
   0x7   :  { %218 = vmatprep.subr.bf16.mxu0 %v249_v0 }
   0xa   :  { %219 = vmatpush3.bf16.msra.mxu0 %v238_v3 }
   0xb   :  { %220 = vmatprep.subr.bf16.mxu0 %v249_v0 }
   0xe   :  { %221 = vmatpush3.bf16.msra.mxu0 %v239_v4 }
   0xf   :  { %222 = vmatprep.subr.bf16.mxu0 %v249_v0 }
  0x12   :  { %223 = vmatpush3.bf16.msra.mxu0 %v240_v5 }
  0x13   :  { %224 = vmatprep.subr.bf16.mxu0 %v249_v0 }
  0x16   :  { %225 = vmatpush3.bf16.msra.mxu0 %v241_v6 }
  0x17   :  { %226 = vmatprep.subr.bf16.mxu0 %v249_v0 }
  0x1a   :  { %227 = vmatpush3.bf16.msra.mxu0 %v242_v7 }
  0x1b   :  { %228 = vmatprep.subr.bf16.mxu0 %v249_v0 }
  0x1e   :  { %229 = vmatpush3.bf16.msra.mxu0 %v243_v8 }
  0x21   :  { %231 = vmatmul.mubr.bf16.vlgmr.msra.gmra.mrb[0].mxu0 %v244_v9 }
  0xf4   :  { %v129_v11 = vpop.f32.mrb[0].mxu0 }
  0xf5   :  { %v152_v12 = vadd.f32 %v195_v10, %v129_v11  ;;  %v232_v13 = vpop.f32.mrb[1].mxu0 }
  0xf6   :  { %v132_v14 = vpop.f32.mrb[2].mxu0 }
  0xf7   :  { %v154_v15 = vmul.f32 %v152_v12, %v152_v12  ;;  %v153_v16 = vadd.f32 %v195_v10, %v132_v14  ;;  %v233_v17 = vpop.f32.mrb[3].mxu0 }
  0xf9   :  { %v156_v18 = vmul.f32 %v154_v15, %v152_v12  ;;  %v155_v19 = vmul.f32 %v153_v16, %v153_v16 }
  0xfb   :  { %v158_v20 = vmul.f32 0.044715, %v156_v18  ;;  %v157_v21 = vmul.f32 %v155_v19, %v153_v16 }
  0xfd   :  { %v160_v22 = vadd.f32 %v158_v20, %v152_v12  ;;  %v159_v23 = vmul.f32 0.044715, %v157_v21 }
  0xff   :  { %v162_v24 = vmul.f32 0.7978846, %v160_v22  ;;  %v161_v25 = vadd.f32 %v159_v23, %v153_v16 }
 0x101   :  { %245 = vtanh.f32 %v162_v24  ;;  %v163_v26 = vmul.f32 0.7978846, %v161_v25 }
 0x103   :  { %247 = vtanh.f32 %v163_v26 }
 0x10b   :  { %v246_v27 = vpop.eup %245 }
 0x10c   :  { %v166_v28 = vadd.f32 1.0, %v246_v27 }
 0x10d   :  { %v248_v29 = vpop.eup %247 }
 0x10e   :  { %v168_v30 = vmul.f32 0.5, %v166_v28  ;;  %v167_v31 = vadd.f32 1.0, %v248_v29 }
 0x110   :  { %v169_v32 = vmul.f32 0.5, %v167_v31  ;;  %v170_v33 = vmul.f32 %v168_v30, %v152_v12 }
 0x112   :  { %v171_v34 = vmul.f32 %v169_v32, %v153_v16 }
 0x114   :  { %v203_v35 = vpack.c.bf16 %v171_v34, %v170_v33 }
 0x116   :  { %204 = vst [vmem:[%s307_s3] sm:$0xff] %v203_v35  }

// kernel: whisper_forward.34
= control target key start
LH: loop header
LB: loop body
LE: loop exit
PB: predicated region body
PF: predicated region fallthrough
CT: control target
= control target key end

     0   :  { %v284_v6 = vmov 0.0   ;;  %vm285_vm0 = vmmov 0   ;;  %s355_s0 = inlined_call_operand.vmem [shape: bf16[16,128], index: 0, kind: input, shape index: {}]   ;;  %s356_s1 = inlined_call_operand.vmem [shape: bf16[128,128], index: 1, kind: input, shape index: {}]   ;;  %s357_s2 = inlined_call_operand.vmem [shape: f32[1,128], index: 2, kind: input, shape index: {}]   ;;  %s358_s3 = inlined_call_operand.vmem [shape: f32[1,128], index: 3, kind: input, shape index: {}]   ;;  %s359_s4 = inlined_call_operand.vmem [shape: f32[1,128], index: 4, kind: input, shape index: {}]   ;;  %s360_s5 = inlined_call_operand.vmem [shape: bf16[16,128], index: 5, kind: output, shape index: {}]  }
   0x1   :  { %v233_v0 = vld [vmem:[%s355_s0] sm:$0xff]   ;;  %250 = vmatprep.subr.bf16.mxu0 %v284_v6  ;;  %v273_v7 = vld [vmem:[%s356_s1 + $0x8] sm:$0xff]   ;;  %v274_v8 = vld [vmem:[%s356_s1 + $0x10] sm:$0xff]   ;;  %266 = vmatprep.mubr.msk.bf16.mxu0 %vm285_vm0, %v284_v6 }
   0x2   :  { %v234_v1 = vunpack.c.l.bf16 %v233_v0  ;;  %v235_v2 = vunpack.c.h.bf16 %v233_v0  ;;  %v272_v5 = vld [vmem:[%s356_s1] sm:$0xff]   ;;  %v275_v9 = vld [vmem:[%s356_s1 + $0x18] sm:$0xff]   ;;  %v277_v11 = vld [vmem:[%s356_s1 + $0x28] sm:$0xff]  }
   0x3   :  { %251 = vmatpush3.bf16.msra.mxu0 %v272_v5  ;;  %v276_v10 = vld [vmem:[%s356_s1 + $0x20] sm:$0xff]   ;;  %v278_v12 = vld [vmem:[%s356_s1 + $0x30] sm:$0xff]   ;;  %v279_v13 = vld [vmem:[%s356_s1 + $0x38] sm:$0xff]  }
   0x4   :  { %31 = vadd.xlane.f32.xlu0 %v234_v1  ;;  %v37_v3 = vmul.f32 %v234_v1, %v234_v1  ;;  %v38_v4 = vmul.f32 %v235_v2, %v235_v2  ;;  %252 = vmatprep.subr.bf16.mxu0 %v284_v6  ;;  %v217_v33 = vld [vmem:[%s357_s2] ss:$0 sm:$0xff] }
   0x5   :  { %v218_v38 = vld [vmem:[%s358_s3] ss:$0 sm:$0xff] }
   0x6   :  { %39 = vadd.xlane.f32.xlu1 %v37_v3  ;;  %v227_v44 = vld [vmem:[%s359_s4] ss:$0 sm:$0xff] }
   0x7   :  { %253 = vmatpush3.bf16.msra.mxu0 %v273_v7 }
   0x8   :  { %33 = vadd.xlane.f32.xlu0 %v235_v2  ;;  %254 = vmatprep.subr.bf16.mxu0 %v284_v6 }
   0xa   :  { %41 = vadd.xlane.f32.xlu1 %v38_v4 }
   0xb   :  { %255 = vmatpush3.bf16.msra.mxu0 %v274_v8 }
   0xc   :  { %256 = vmatprep.subr.bf16.mxu0 %v284_v6 }
   0xf   :  { %257 = vmatpush3.bf16.msra.mxu0 %v275_v9 }
  0x10   :  { %258 = vmatprep.subr.bf16.mxu0 %v284_v6 }
  0x13   :  { %259 = vmatpush3.bf16.msra.mxu0 %v276_v10 }
  0x14   :  { %260 = vmatprep.subr.bf16.mxu0 %v284_v6 }
  0x17   :  { %261 = vmatpush3.bf16.msra.mxu0 %v277_v11 }
  0x18   :  { %262 = vmatprep.subr.bf16.mxu0 %v284_v6 }
  0x1b   :  { %263 = vmatpush3.bf16.msra.mxu0 %v278_v12 }
  0x1c   :  { %264 = vmatprep.subr.bf16.mxu0 %v284_v6 }
  0x1f   :  { %265 = vmatpush3.bf16.msra.mxu0 %v279_v13 }
  0x91   :  { %v32_v14 = vpop.xlane.xlu0 %31 }
  0x92   :  { %v35_v15 = vmul.f32 0.03125, %v32_v14 }
  0x93   :  { %v40_v16 = vpop.xlane.xlu1 %39 }
  0x94   :  { %v45_v17 = vmul.f32 %v35_v15, %v35_v15  ;;  %v43_v18 = vmul.f32 0.03125, %v40_v16  ;;  %v51_v30 = vsub.f32 %v234_v1, %v35_v15 }
  0x95   :  { %v34_v19 = vpop.xlane.xlu0 %33 }
  0x96   :  { %v47_v20 = vsub.f32 %v43_v18, %v45_v17  ;;  %v36_v21 = vmul.f32 0.03125, %v34_v19 }
  0x97   :  { %v42_v22 = vpop.xlane.xlu1 %41 }
  0x98   :  { %v49_v23 = vmax.f32 %v47_v20, 0.0  ;;  %v46_v24 = vmul.f32 %v36_v21, %v36_v21  ;;  %v44_v25 = vmul.f32 0.03125, %v42_v22  ;;  %v52_v34 = vsub.f32 %v235_v2, %v36_v21 }
  0x9a   :  { %v53_v26 = vadd.f32 1e-05, %v49_v23  ;;  %v48_v27 = vsub.f32 %v44_v25, %v46_v24 }
  0x9c   :  { %280 = vrsqrt.f32 %v53_v26  ;;  %v50_v28 = vmax.f32 %v48_v27, 0.0 }
  0x9e   :  { %v54_v29 = vadd.f32 1e-05, %v50_v28 }
  0xa0   :  { %282 = vrsqrt.f32 %v54_v29 }
  0xa6   :  { %v281_v31 = vpop.eup %280 }
  0xa7   :  { %v57_v32 = vmul.f32 %v281_v31, %v51_v30 }
  0xa9   :  { %v66_v37 = vmul.f32 %v217_v33, %v57_v32 }
  0xaa   :  { %v283_v35 = vpop.eup %282 }
  0xab   :  { %v58_v36 = vmul.f32 %v283_v35, %v52_v34  ;;  %v75_v40 = vadd.f32 %v218_v38, %v66_v37 }
  0xad   :  { %v67_v39 = vmul.f32 %v217_v33, %v58_v36 }
  0xaf   :  { %v76_v41 = vadd.f32 %v218_v38, %v67_v39 }
  0xb1   :  { %v77_v42 = vpack.c.bf16 %v76_v41, %v75_v40 }
  0xb3   :  { %267 = vmatmul.mubr.bf16.vlgmr.msra.gmra.mrb[0].mxu0 %v77_v42 }
 0x186   :  { %v178_v43 = vpop.f32.mrb[0].mxu0 }
 0x187   :  { %v268_v45 = vpop.f32.mrb[1].mxu0  ;;  %v201_v47 = vadd.f32 %v227_v44, %v178_v43 }
 0x188   :  { %v181_v46 = vpop.f32.mrb[2].mxu0 }
 0x189   :  { %v202_v48 = vadd.f32 %v227_v44, %v181_v46  ;;  %v269_v49 = vpop.f32.mrb[3].mxu0 }
 0x18b   :  { %v239_v50 = vpack.c.bf16 %v202_v48, %v201_v47 }
 0x18d   :  { %240 = vst [vmem:[%s360_s5] sm:$0xff] %v239_v50  }

// kernel: whisper_forward.36
= control target key start
LH: loop header
LB: loop body
LE: loop exit
PB: predicated region body
PF: predicated region fallthrough
CT: control target
= control target key end

     0   :  { %v240_v0 = vmov 0.0   ;;  %vm241_vm0 = vmmov 0   ;;  %s303_s1 = inlined_call_operand.vmem [shape: bf16[128,128], index: 1, kind: input, shape index: {}]   ;;  %s304_s0 = inlined_call_operand.vmem [shape: bf16[16,128], index: 0, kind: input, shape index: {}]   ;;  %s305_s2 = inlined_call_operand.vmem [shape: f32[1,128], index: 2, kind: input, shape index: {}]   ;;  %s306_s3 = inlined_call_operand.vmem [shape: bf16[16,128], index: 3, kind: input, shape index: {}]   ;;  %s307_s4 = inlined_call_operand.vmem [shape: bf16[16,128], index: 4, kind: output, shape index: {}]  }
   0x1   :  { %209 = vmatprep.subr.bf16.mxu0 %v240_v0  ;;  %v231_v1 = vld [vmem:[%s303_s1] sm:$0xff]   ;;  %225 = vmatprep.mubr.msk.bf16.mxu0 %vm241_vm0, %v240_v0  ;;  %v232_v2 = vld [vmem:[%s303_s1 + $0x8] sm:$0xff]   ;;  %v233_v3 = vld [vmem:[%s303_s1 + $0x10] sm:$0xff]  }
   0x2   :  { %210 = vmatpush3.bf16.msra.mxu0 %v231_v1  ;;  %v234_v4 = vld [vmem:[%s303_s1 + $0x18] sm:$0xff]   ;;  %v235_v5 = vld [vmem:[%s303_s1 + $0x20] sm:$0xff]   ;;  %v236_v6 = vld [vmem:[%s303_s1 + $0x28] sm:$0xff]  }
   0x3   :  { %211 = vmatprep.subr.bf16.mxu0 %v240_v0  ;;  %v237_v7 = vld [vmem:[%s303_s1 + $0x30] sm:$0xff]   ;;  %v238_v8 = vld [vmem:[%s303_s1 + $0x38] sm:$0xff]   ;;  %v239_v9 = vld [vmem:[%s304_s0] sm:$0xff]  }
   0x4   :  { %v186_v10 = vld [vmem:[%s305_s2] ss:$0 sm:$0xff] }
   0x5   :  { %v192_v11 = vld [vmem:[%s306_s3] sm:$0xff]  }
   0x6   :  { %212 = vmatpush3.bf16.msra.mxu0 %v232_v2  ;;  %v193_v14 = vunpack.c.l.bf16 %v192_v11  ;;  %v194_v16 = vunpack.c.h.bf16 %v192_v11 }
   0x7   :  { %213 = vmatprep.subr.bf16.mxu0 %v240_v0 }
   0xa   :  { %214 = vmatpush3.bf16.msra.mxu0 %v233_v3 }
   0xb   :  { %215 = vmatprep.subr.bf16.mxu0 %v240_v0 }
   0xe   :  { %216 = vmatpush3.bf16.msra.mxu0 %v234_v4 }
   0xf   :  { %217 = vmatprep.subr.bf16.mxu0 %v240_v0 }
  0x12   :  { %218 = vmatpush3.bf16.msra.mxu0 %v235_v5 }
  0x13   :  { %219 = vmatprep.subr.bf16.mxu0 %v240_v0 }
  0x16   :  { %220 = vmatpush3.bf16.msra.mxu0 %v236_v6 }
  0x17   :  { %221 = vmatprep.subr.bf16.mxu0 %v240_v0 }
  0x1a   :  { %222 = vmatpush3.bf16.msra.mxu0 %v237_v7 }
  0x1b   :  { %223 = vmatprep.subr.bf16.mxu0 %v240_v0 }
  0x1e   :  { %224 = vmatpush3.bf16.msra.mxu0 %v238_v8 }
  0x21   :  { %226 = vmatmul.mubr.bf16.vlgmr.msra.gmra.mrb[0].mxu0 %v239_v9 }
  0xf4   :  { %v132_v12 = vpop.f32.mrb[0].mxu0 }
  0xf5   :  { %v155_v13 = vadd.f32 %v186_v10, %v132_v12  ;;  %v227_v15 = vpop.f32.mrb[1].mxu0 }
  0xf6   :  { %v135_v17 = vpop.f32.mrb[2].mxu0 }
  0xf7   :  { %v156_v18 = vadd.f32 %v186_v10, %v135_v17  ;;  %v228_v19 = vpop.f32.mrb[3].mxu0  ;;  %v161_v20 = vadd.f32 %v193_v14, %v155_v13 }
  0xf9   :  { %v162_v21 = vadd.f32 %v194_v16, %v156_v18 }
  0xfb   :  { %v198_v22 = vpack.c.bf16 %v162_v21, %v161_v20 }
  0xfd   :  { %199 = vst [vmem:[%s307_s4] sm:$0xff] %v198_v22  }

// kernel: whisper_forward.35
= control target key start
LH: loop header
LB: loop body
LE: loop exit
PB: predicated region body
PF: predicated region fallthrough
CT: control target
= control target key end

     0   :  { %s1280_s12 = smov 0   ;;  %s1282_s13 = smov 0   ;;  %s1452_s0 = inlined_call_operand.vmem [shape: bf16[2,4,8,8], index: 0, kind: input, shape index: {}]   ;;  %s1453_s1 = inlined_call_operand.vmem [shape: bf16[2,4,8,8], index: 1, kind: input, shape index: {}]   ;;  %s1454_s2 = inlined_call_operand.vmem [shape: bf16[2,4,8,8], index: 2, kind: input, shape index: {}]   ;;  %s1455_s3 = inlined_call_operand.vmem [shape: bf16[2,8,32], index: 3, kind: output, shape index: {}]  }
   0x1   :  { %s1284_s14 = smov 0  }
   0x2 LB: > { %s39_s15 = sadd.s32 1, %s1247_s13  ;;  %p1081_p0 = scmp.ge.s32.totalorder %s1251_s14, 1  ;;  %s1251_s14 = sphi %s1284_s14, %s13_s14   ;;  %s1247_s13 = sphi %s1282_s13, %s1457_s13   ;;  %s1243_s12 = sphi %s1280_s12, %s1456_s12  }
   0x3   : > { %p41_p1 = scmp.ge.s32.totalorder %s39_s15, 2  ;;  %p223_p2 = scmp.lt.s32.totalorder %s1251_s14, 3 }
   0x5   : > { %s1459_s15 = smov (%p41_p1, %s39_s15), 0  ;;  %p224_p3 = pnand %p1081_p0, %p223_p2 }
   0x6   : > { %p284_p4 = scmp.lt.s32.totalorder (!%p224_p3), %s1243_s12, 1  ;;  %vm346_vm0 = vcmask (!%p224_p3), 64512   ;;  %v1253_v0 = vmov (!%p224_p3), 0.0   ;;  %vm1254_vm1 = vmmov (!%p224_p3), 0   ;;  %vm337_vm2 = vcmask (!%p224_p3), 7168   ;;  %s1257_s26 = smov (!%p224_p3), 8  }
   0x7   : > { %227 = sbr.rel (%p224_p3) target bundleno = 950 (0x3b6), region = 32  ;;  %1124 = vmatprep.subr.bf16.mxu0 (!%p224_p3), %v1253_v0  ;;  %347 = vst.msk [vmem:[#allocation4] sm:$0xff] (!%p224_p3), %vm346_vm0, %v1253_v0  ;;  %348 = vst.msk [vmem:[#allocation4 + $0x8] sm:$0xff] (!%p224_p3), %vm346_vm0, %v1253_v0  ;;  %1130 = vmatprep.subr.bf16.mxu1 (!%p224_p3), %v1253_v0  ;;  %v1255_v13 = vmov (!%p224_p3), -1e+30   ;;  %v1256_v34 = vmov (!%p224_p3), 0  }
   0x8   : > { %349 = vst.msk [vmem:[#allocation4 + $0x10] sm:$0xff] (!%p224_p3), %vm346_vm0, %v1253_v0  ;;  %350 = vst.msk [vmem:[#allocation4 + $0x18] sm:$0xff] (!%p224_p3), %vm346_vm0, %v1253_v0  ;;  %1126 = vmatprep.mubr.msk.bf16.mxu0 (!%p224_p3), %vm1254_vm1, %v1253_v0  ;;  %1132 = vmatprep.mubr.msk.bf16.mxu1 (!%p224_p3), %vm1254_vm1, %v1253_v0  ;;  %vm676_vm3 = vcmask (!%p224_p3), 1043456   ;;  %s1258_s27 = smov (!%p224_p3), 16   ;;  %s1259_s28 = smov (!%p224_p3), 24   ;;  %vm910_vm4 = vcmask (!%p224_p3), 60416  }
   0x9   : > { %338 = vst.msk [vmem:[#allocation2] sm:$0xff] (!%p224_p3), %vm337_vm2, %v1255_v13  ;;  %339 = vst.msk [vmem:[#allocation2 + $0x8] sm:$0xff] (!%p224_p3), %vm337_vm2, %v1255_v13  ;;  %1203 = vset.pattern.permute.xlu0 (!%p224_p3), %v1256_v34  ;;  %1204 = vset.pattern.permute.xlu1 (!%p224_p3), %v1256_v34  ;;  %vm919_vm5 = vcmask (!%p224_p3), 126016   ;;  %vm928_vm6 = vcmask (!%p224_p3), 191616   ;;  %vm937_vm7 = vcmask (!%p224_p3), 257216  }
   0xa   : > { %340 = vst.msk [vmem:[#allocation2 + $0x10] sm:$0xff] (!%p224_p3), %vm337_vm2, %v1255_v13  ;;  %341 = vst.msk [vmem:[#allocation2 + $0x18] sm:$0xff] (!%p224_p3), %vm337_vm2, %v1255_v13 }
   0xb   : > { %342 = vst.msk [vmem:[#allocation3] sm:$0xff] (!%p224_p3), %vm337_vm2, %v1253_v0  ;;  %343 = vst.msk [vmem:[#allocation3 + $0x8] sm:$0xff] (!%p224_p3), %vm337_vm2, %v1253_v0 }
   0xc   : > { %344 = vst.msk [vmem:[#allocation3 + $0x10] sm:$0xff] (!%p224_p3), %vm337_vm2, %v1253_v0  ;;  %345 = vst.msk [vmem:[#allocation3 + $0x18] sm:$0xff] (!%p224_p3), %vm337_vm2, %v1253_v0 }
   0xe   : > { %s1461_s12 = smov (!%p284_p4, %s1243_s12), 1 }
   0xf   : > { %s1315_s16 = sshll.u32 %s1461_s12, 4  ;;  %s1088_s29 = sshll.u32 %s1461_s12, 2 }
  0x10   : > { %s307_s19 = scalar_lea.vmem %s1453_s1, %s1315_s16  ;;  %s294_s22 = scalar_lea.vmem %s1452_s0, %s1315_s16  ;;  %v1373_v35 = vld [vmem:[#allocation2] sm:$0xff]  ;;  %v1378_v38 = vld [vmem:[#allocation2 + $0x8] sm:$0xff] }
  0x11   : > { %v355_v1 = vld [vmem:[%s307_s19] sm:$0xf]  ;;  %v356_v2 = vld [vmem:[%s307_s19 + $0x4] sm:$0xf]  ;;  %v357_v5 = vld [vmem:[%s307_s19 + $0x8] sm:$0xf]  ;;  %s320_s25 = scalar_lea.vmem %s1454_s2, %s1315_s16  ;;  %s331_s5 = scalar_lea.vmem %s1455_s3, %s1088_s29 }
  0x12   : > { %v368_v3 = vsel %vm346_vm0, %v355_v1, 0  ;;  %v414_v4 = vsel %vm346_vm0, %v356_v2, 0  ;;  %v358_v6 = vld [vmem:[%s307_s19 + $0xc] sm:$0xf]  ;;  %v351_v7 = vld [vmem:[%s294_s22] sm:$0xf] }
  0x13   : > { %1125 = vmatpush3.bf16.xpose.msra.mxu0 %v368_v3  ;;  %1131 = vmatpush3.bf16.xpose.msra.mxu1 %v414_v4  ;;  %v352_v8 = vld [vmem:[%s294_s22 + $0x4] sm:$0xf]  ;;  %v460_v9 = vsel %vm346_vm0, %v357_v5, 0  ;;  %v506_v10 = vsel %vm346_vm0, %v358_v6, 0  ;;  %v353_v11 = vld [vmem:[%s294_s22 + $0x8] sm:$0xf] }
  0x14   : > { %1136 = vmatprep.subr.bf16.mxu0 %v1253_v0  ;;  %1142 = vmatprep.subr.bf16.mxu1 %v1253_v0  ;;  %v354_v12 = vld [vmem:[%s294_s22 + $0xc] sm:$0xf]  ;;  %v1388_v42 = vld [vmem:[#allocation2 + $0x10] sm:$0xff]  ;;  %v1396_v46 = vld [vmem:[#allocation2 + $0x18] sm:$0xff] }
  0x15   : > { %v359_v51 = vld [vmem:[%s320_s25] sm:$0xf]  ;;  %v360_v53 = vld [vmem:[%s320_s25 + $0x4] sm:$0xf]  ;;  %v361_v55 = vld [vmem:[%s320_s25 + $0x8] sm:$0xf] }
  0x16   : > { %v678_v52 = vsel %vm676_vm3, %v359_v51, 0  ;;  %v724_v54 = vsel %vm676_vm3, %v360_v53, 0  ;;  %v770_v56 = vsel %vm676_vm3, %v361_v55, 0  ;;  %v362_v57 = vld [vmem:[%s320_s25 + $0xc] sm:$0xf] }
  0x17   : > { %v816_v58 = vsel %vm676_vm3, %v362_v57, 0  ;;  %v642_v51 = vld [vmem:[#allocation4 + $0x8] sm:$0xff] }
  0x1a   : > { %1127 = vmatmul.mubr.msk.bf16.vlgmr.msra.gmra.mrb[0].mxu0 %vm346_vm0, %v351_v7  ;;  %1133 = vmatmul.mubr.msk.bf16.vlgmr.msra.gmra.mrb[0].mxu1 %vm346_vm0, %v352_v8 }
  0x1b   : > { %1137 = vmatpush3.bf16.xpose.msra.mxu0 %v460_v9  ;;  %1143 = vmatpush3.bf16.xpose.msra.mxu1 %v506_v10 }
  0x1c   : > { %1138 = vmatprep.mubr.msk.bf16.mxu0 %vm1254_vm1, %v1253_v0  ;;  %1144 = vmatprep.mubr.msk.bf16.mxu1 %vm1254_vm1, %v1253_v0 }
  0x1d   : > { %1148 = vmatprep.subr.bf16.mxu0 %v1253_v0  ;;  %1154 = vmatprep.subr.bf16.mxu1 %v1253_v0 }
  0x22   : > { %1139 = vmatmul.mubr.msk.bf16.vlgmr.msra.gmra.mrb[4].mxu0 %vm346_vm0, %v353_v11  ;;  %1145 = vmatmul.mubr.msk.bf16.vlgmr.msra.gmra.mrb[4].mxu1 %vm346_vm0, %v354_v12 }
  0x23   : > { %1150 = vmatprep.mubr.msk.bf16.mxu0 %vm1254_vm1, %v1253_v0  ;;  %1156 = vmatprep.mubr.msk.bf16.mxu1 %vm1254_vm1, %v1253_v0 }
  0x24   : > { %1149 = vmatpush3.bf16.msra.mxu0 %v678_v52  ;;  %1155 = vmatpush3.bf16.msra.mxu1 %v724_v54 }
  0x25   : > { %1160 = vmatprep.subr.bf16.mxu0 %v1253_v0  ;;  %1166 = vmatprep.subr.bf16.mxu1 %v1253_v0 }
  0xed   : > { %v1357_v14 = vpop.f32.mrb[0].mxu0  ;;  %v1359_v15 = vpop.f32.mrb[0].mxu1 }
  0xee   : > { %v1128_v16 = vpop.f32.mrb[1].mxu0  ;;  %v552_v17 = vsel %vm346_vm0, %v1357_v14, -inf  ;;  %v1134_v18 = vpop.f32.mrb[1].mxu1  ;;  %v555_v23 = vsel %vm346_vm0, %v1359_v15, -inf }
  0xef   : > { %553 = vmax.xlane.f32.xlu0 %v552_v17  ;;  %v407_v19 = vpop.f32.mrb[2].mxu0  ;;  %v453_v20 = vpop.f32.mrb[2].mxu1 }
  0xf0   : > { %v1129_v21 = vpop.f32.mrb[3].mxu0  ;;  %v1135_v22 = vpop.f32.mrb[3].mxu1 }
  0xf3   : > { %556 = vmax.xlane.f32.xlu0 %v555_v23 }
  0xf5   : > { %v1365_v24 = vpop.f32.mrb[4].mxu0  ;;  %v1367_v25 = vpop.f32.mrb[4].mxu1 }
  0xf6   : > { %v1140_v26 = vpop.f32.mrb[5].mxu0  ;;  %v558_v27 = vsel %vm346_vm0, %v1365_v24, -inf  ;;  %v1146_v28 = vpop.f32.mrb[5].mxu1  ;;  %v561_v33 = vsel %vm346_vm0, %v1367_v25, -inf }
  0xf7   : > { %559 = vmax.xlane.f32.xlu1 %v558_v27  ;;  %v499_v29 = vpop.f32.mrb[6].mxu0  ;;  %v545_v30 = vpop.f32.mrb[6].mxu1  ;;  %v613_v26 = vld [vmem:[#allocation3 + $0x8] sm:$0xff] }
  0xf8   : > { %v1141_v31 = vpop.f32.mrb[7].mxu0  ;;  %v1147_v32 = vpop.f32.mrb[7].mxu1  ;;  %v614_v29 = vld [vmem:[#allocation3 + $0x10] sm:$0xff] }
  0xfb   : > { %562 = vmax.xlane.f32.xlu1 %v561_v33  ;;  %v615_v33 = vld [vmem:[#allocation3 + $0x18] sm:$0xff] }
 0x17c   : > { %v554_v36 = vpop.xlane.xlu0 %553 }
 0x17d   : > { %v1376_v37 = vmax.f32 %v1373_v35, %v554_v36 }
 0x17f   : > { %v568_v39 = vsub.f32 %v1373_v35, %v1376_v37  ;;  %866 = vst.msk [vmem:[#allocation2] sm:$0xff] %vm337_vm2, %v1376_v37  ;;  %582 = vperm.xlu0 %1203, %v1376_v37  }
 0x180   : > { %v557_v40 = vpop.xlane.xlu0 %556 }
 0x181   : > { %v1386_v41 = vmax.f32 %v1378_v38, %v557_v40 }
 0x183   : > { %v569_v43 = vsub.f32 %v1378_v38, %v1386_v41  ;;  %867 = vst.msk [vmem:[#allocation2 + $0x8] sm:$0xff] %vm337_vm2, %v1386_v41  ;;  %587 = vperm.xlu1 %1204, %v1386_v41   ;;  %v612_v41 = vld [vmem:[#allocation3] sm:$0xff] }
 0x184   : > { %v560_v44 = vpop.xlane.xlu1 %559 }
 0x185   : > { %v566_v45 = vmax.f32 %v1388_v42, %v560_v44 }
 0x187   : > { %v570_v47 = vsub.f32 %v1388_v42, %v566_v45  ;;  %868 = vst.msk [vmem:[#allocation2 + $0x10] sm:$0xff] %vm337_vm2, %v566_v45  ;;  %592 = vperm.xlu1 %1204, %v566_v45  }
 0x188   : > { %v563_v48 = vpop.xlane.xlu1 %562 }
 0x189   : > { %v567_v49 = vmax.f32 %v1396_v46, %v563_v48  ;;  %v576_v19 = vmul.f32 1.442695, %v570_v47 }
 0x18b   : > { %v571_v50 = vsub.f32 %v1396_v46, %v567_v49  ;;  %869 = vst.msk [vmem:[#allocation2 + $0x18] sm:$0xff] %vm337_vm2, %v567_v49  ;;  %597 = vperm.xlu1 %1204, %v567_v49  }
 0x18d   : > { %v578_v21 = vmul.f32 1.442695, %v571_v50 }
 0x1fe   : > { %v583_v59 = vpop.permute.xlu0 %582 }
 0x1ff   : > { %v600_v60 = vsub.f32 %v1357_v14, %v583_v59 }
 0x201   : > { %v604_v61 = vmul.f32 1.442695, %v600_v60 }
 0x202   : > { %v588_v62 = vpop.permute.xlu1 %587 }
 0x203   : > { %1205 = vpow2.f32 %v604_v61  ;;  %v601_v63 = vsub.f32 %v1359_v15, %v588_v62 }
 0x205   : > { %v606_v1 = vmul.f32 1.442695, %v601_v63 }
 0x206   : > { %v593_v2 = vpop.permute.xlu1 %592 }
 0x207   : > { %1207 = vpow2.f32 %v606_v1  ;;  %v602_v3 = vsub.f32 %v1365_v24, %v593_v2 }
 0x209   : > { %v608_v4 = vmul.f32 1.442695, %v602_v3  ;;  %v644_v3 = vld [vmem:[#allocation4 + $0x18] sm:$0xff] }
 0x20a   : > { %v598_v5 = vpop.permute.xlu1 %597 }
 0x20b   : > { %1209 = vpow2.f32 %v608_v4  ;;  %v603_v6 = vsub.f32 %v1367_v25, %v598_v5  ;;  %v572_v25 = vmul.f32 1.442695, %v568_v39 }
 0x20d   : > { %v1206_v7 = vpop.eup %1205  ;;  %v610_v8 = vmul.f32 1.442695, %v603_v6 }
 0x20e   : > { %v669_v9 = vpack.c.bf16 %v1206_v7, %v1206_v7  ;;  %v620_v20 = vsel %vm346_vm0, %v1206_v7, 0.0 }
 0x20f   : > { %1211 = vpow2.f32 %v610_v8 }
 0x210   : > { %1151 = vmatmul.mubr.msk.bf16.vlgmr.msra.gmra.mrb[8].mxu0 %vm346_vm0, %v669_v9  ;;  %1213 = vpow2.f32 %v576_v19 }
 0x211   : > { %v1208_v10 = vpop.eup %1207  ;;  %1161 = vmatpush3.bf16.msra.mxu0 %v770_v56  ;;  %1162 = vmatprep.mubr.msk.bf16.mxu0 %vm1254_vm1, %v1253_v0 }
 0x212   : > { %v623_v11 = vsel %vm346_vm0, %v1208_v10, 0.0  ;;  %v670_v12 = vpack.c.bf16 %v1208_v10, %v1208_v10 }
 0x213   : > { %624 = vadd.xlane.f32.xlu1 %v623_v11 }
 0x214   : > { %1157 = vmatmul.mubr.msk.bf16.vlgmr.msra.gmra.mrb[8].mxu1 %vm346_vm0, %v670_v12 }
 0x215   : > { %v1210_v13 = vpop.eup %1209  ;;  %1167 = vmatpush3.bf16.msra.mxu1 %v816_v58  ;;  %1168 = vmatprep.mubr.msk.bf16.mxu1 %vm1254_vm1, %v1253_v0  ;;  %v574_v0 = vmul.f32 1.442695, %v569_v43  ;;  %v643_v58 = vld [vmem:[#allocation4 + $0x10] sm:$0xff] }
 0x216   : > { %v626_v14 = vsel %vm346_vm0, %v1210_v13, 0.0  ;;  %v671_v15 = vpack.c.bf16 %v1210_v13, %v1210_v13 }
 0x217   : > { %627 = vadd.xlane.f32.xlu0 %v626_v14  ;;  %1215 = vpow2.f32 %v574_v0 }
 0x218   : > { %1163 = vmatmul.mubr.msk.bf16.vlgmr.msra.gmra.mrb[12].mxu0 %vm346_vm0, %v671_v15  ;;  %1217 = vpow2.f32 %v578_v21 }
 0x219   : > { %v1212_v16 = vpop.eup %1211  ;;  %1219 = vpow2.f32 %v572_v25 }
 0x21a   : > { %v629_v17 = vsel %vm346_vm0, %v1212_v16, 0.0  ;;  %v672_v18 = vpack.c.bf16 %v1212_v16, %v1212_v16  ;;  %v1214_v22 = vpop.eup %1213 }
 0x21b   : > { %630 = vadd.xlane.f32.xlu1 %v629_v17  ;;  %v618_v31 = vmul.f32 %v1214_v22, %v614_v29 }
 0x21c   : > { %1169 = vmatmul.mubr.msk.bf16.vlgmr.msra.gmra.mrb[12].mxu1 %vm346_vm0, %v672_v18 }
 0x21f   : > { %621 = vadd.xlane.f32.xlu1 %v620_v20 }
 0x221   : > { %v1216_v23 = vpop.eup %1215 }
 0x222   : > { %v1218_v24 = vpop.eup %1217  ;;  %v617_v27 = vmul.f32 %v1216_v23, %v613_v26 }
 0x223   : > { %v619_v36 = vmul.f32 %v1218_v24, %v615_v33  ;;  %v1220_v38 = vpop.eup %1219 }
 0x224   : > { %v616_v39 = vmul.f32 %v1220_v38, %v612_v41 }
 0x22d   : > { %657 = vperm.xlu0 %1203, %v1214_v22   ;;  %v641_v22 = vld [vmem:[#allocation4] sm:$0xff] }
 0x230   : > { %652 = vperm.xlu1 %1204, %v1216_v23  }
 0x234   : > { %662 = vperm.xlu1 %1204, %v1218_v24  }
 0x2a0   : > { %v625_v28 = vpop.xlane.xlu1 %624 }
 0x2a1   : > { %v633_v30 = vadd.f32 %v625_v28, %v617_v27 }
 0x2a3   : > { %638 = vst.msk [vmem:[#allocation3 + $0x8] sm:$0xff] %vm337_vm2, %v633_v30 }
 0x2a4   : > { %v628_v32 = vpop.xlane.xlu0 %627 }
 0x2a5   : > { %v634_v34 = vadd.f32 %v628_v32, %v618_v31 }
 0x2a7   : > { %639 = vst.msk [vmem:[#allocation3 + $0x10] sm:$0xff] %vm337_vm2, %v634_v34 }
 0x2a8   : > { %v631_v40 = vpop.xlane.xlu1 %630 }
 0x2a9   : > { %v635_v35 = vadd.f32 %v631_v40, %v619_v36 }
 0x2aa   : > { %v878_v37 = vld [vmem:[#allocation3 + $0x8] sm:$0xff] }
 0x2ab   : > { %640 = vst.msk [vmem:[#allocation3 + $0x18] sm:$0xff] %vm337_vm2, %v635_v35  ;;  %1221 = vrcp.f32 %v878_v37 }
 0x2ac   : > { %v622_v42 = vpop.xlane.xlu1 %621  ;;  %v658_v59 = vpop.permute.xlu0 %657 }
 0x2ad   : > { %v632_v43 = vadd.f32 %v622_v42, %v616_v39  ;;  %v667_v1 = vmul.f32 %v658_v59, %v643_v58 }
 0x2ae   : > { %v879_v44 = vld [vmem:[#allocation3 + $0x10] sm:$0xff] }
 0x2af   : > { %637 = vst.msk [vmem:[#allocation3] sm:$0xff] %vm337_vm2, %v632_v43  ;;  %1223 = vrcp.f32 %v879_v44 }
 0x2b0   : > { %v653_v52 = vpop.permute.xlu1 %652 }
 0x2b1   : > { %v666_v56 = vmul.f32 %v653_v52, %v642_v51 }
 0x2b2   : > { %v880_v45 = vld [vmem:[#allocation3 + $0x18] sm:$0xff] }
 0x2b3   : > { %1225 = vrcp.f32 %v880_v45 }
 0x2b4   : > { %v663_v4 = vpop.permute.xlu1 %662 }
 0x2b5   : > { %v1222_v46 = vpop.eup %1221  ;;  %v668_v9 = vmul.f32 %v663_v4, %v644_v3 }
 0x2b6   : > { %892 = vperm.xlu1 %1204, %v1222_v46   ;;  %v877_v47 = vld [vmem:[#allocation3] sm:$0xff] }
 0x2b7   : > { %1227 = vrcp.f32 %v877_v47 }
 0x2b9   : > { %v1224_v48 = vpop.eup %1223 }
 0x2ba   : > { %897 = vperm.xlu1 %1204, %v1224_v48  }
 0x2bd   : > { %v1226_v49 = vpop.eup %1225 }
 0x2be   : > { %647 = vperm.xlu1 %1204, %v1220_v38   ;;  %902 = vperm.xlu0 %1203, %v1226_v49  }
 0x2c1   : > { %v1228_v50 = vpop.eup %1227 }
 0x2c2   : > { %887 = vperm.xlu0 %1203, %v1228_v50  }
 0x2e3   : > { %v714_v53 = vpop.f32.mrb[8].mxu0 }
 0x2e4   : > { %v1152_v54 = vpop.f32.mrb[9].mxu0 }
 0x2e5   : > { %v717_v55 = vpop.f32.mrb[10].mxu0 }
 0x2e6   : > { %v1153_v57 = vpop.f32.mrb[11].mxu0 }
 0x2e7   : > { %v760_v60 = vpop.f32.mrb[8].mxu1 }
 0x2e8   : > { %v859_v61 = vadd.f32 %v760_v60, %v666_v56  ;;  %v1158_v62 = vpop.f32.mrb[9].mxu1 }
 0x2e9   : > { %v763_v63 = vpop.f32.mrb[10].mxu1 }
 0x2ea   : > { %863 = vst.msk [vmem:[#allocation4 + $0x8] sm:$0xff] %vm346_vm0, %v859_v61  ;;  %v1159_v2 = vpop.f32.mrb[11].mxu1 }
 0x2eb   : > { %v806_v5 = vpop.f32.mrb[12].mxu0 }
 0x2ec   : > { %v860_v6 = vadd.f32 %v806_v5, %v667_v1  ;;  %v1164_v7 = vpop.f32.mrb[13].mxu0 }
 0x2ed   : > { %v809_v8 = vpop.f32.mrb[14].mxu0 }
 0x2ee   : > { %864 = vst.msk [vmem:[#allocation4 + $0x10] sm:$0xff] %vm346_vm0, %v860_v6  ;;  %v1165_v10 = vpop.f32.mrb[15].mxu0 }
 0x2ef   : > { %v852_v11 = vpop.f32.mrb[12].mxu1 }
 0x2f0   : > { %v861_v12 = vadd.f32 %v852_v11, %v668_v9  ;;  %v1170_v13 = vpop.f32.mrb[13].mxu1 }
 0x2f1   : > { %v855_v14 = vpop.f32.mrb[14].mxu1  ;;  %v874_v16 = vld [vmem:[#allocation4 + $0x8] sm:$0xff] }
 0x2f2   : > { %865 = vst.msk [vmem:[#allocation4 + $0x18] sm:$0xff] %vm346_vm0, %v861_v12  ;;  %v1171_v15 = vpop.f32.mrb[15].mxu1 }
 0x2f5   : > { %v875_v0 = vld [vmem:[#allocation4 + $0x10] sm:$0xff] }
 0x2f9   : > { %v876_v25 = vld [vmem:[#allocation4 + $0x18] sm:$0xff] }
 0x335   : > { %v893_v17 = vpop.permute.xlu1 %892 }
 0x336   : > { %v906_v18 = vmul.f32 %v893_v17, %v874_v16 }
 0x338   : > { %v1105_v19 = vpack.c.bf16 %v906_v18, %v906_v18 }
 0x339   : > { %v898_v20 = vpop.permute.xlu1 %897 }
 0x33a   : > { %v907_v21 = vmul.f32 %v898_v20, %v875_v0  ;;  %916 = vrot.lane.b32.xlu1 %v1105_v19, %s1257_s26 }
 0x33c   : > { %v1106_v23 = vpack.c.bf16 %v907_v21, %v907_v21 }
 0x33d   : > { %v903_v24 = vpop.permute.xlu0 %902  ;;  %v648_v26 = vpop.permute.xlu1 %647 }
 0x33e   : > { %v908_v27 = vmul.f32 %v903_v24, %v876_v25  ;;  %v665_v28 = vmul.f32 %v648_v26, %v641_v22  ;;  %925 = vrot.lane.b32.xlu0 %v1106_v23, %s1258_s27 }
 0x340   : > { %v1107_v29 = vpack.c.bf16 %v908_v27, %v908_v27  ;;  %v858_v30 = vadd.f32 %v714_v53, %v665_v28 }
 0x341   : > { %v888_v31 = vpop.permute.xlu0 %887 }
 0x342   : > { %862 = vst.msk [vmem:[#allocation4] sm:$0xff] %vm346_vm0, %v858_v30  ;;  %934 = vrot.lane.b32.xlu1 %v1107_v29, %s1259_s28 }
 0x349   : > { %v873_v32 = vld [vmem:[#allocation4] sm:$0xff] }
 0x34a   : > { %v905_v33 = vmul.f32 %v888_v31, %v873_v32 }
 0x34c   : > { %v909_v34 = vpack.c.bf16 %v905_v33, %v905_v33 }
 0x34e   : > { %911 = vst.msk [vmem:[%s331_s5] sm:$0xf] %vm910_vm4, %v909_v34 }
 0x3ac   : > { %v917_v36 = vpop.permute.xlu1 %916 }
 0x3ad   : > { %920 = vst.msk [vmem:[%s331_s5] sm:$0xf] %vm919_vm5, %v917_v36 }
 0x3b0   : > { %v926_v38 = vpop.permute.xlu0 %925 }
 0x3b1   : > { %929 = vst.msk [vmem:[%s331_s5] sm:$0xf] %vm928_vm6, %v926_v38 }
 0x3b4   : > { %v935_v40 = vpop.permute.xlu1 %934 }
 0x3b5   : > { %938 = vst.msk [vmem:[%s331_s5] sm:$0xf] %vm937_vm7, %v935_v40 }
 0x3b6 PF: > { %s13_s14 = sadd.s32 1, %s1251_s14   ;;  %s1456_s12 = smov %s1247_s13 }
 0x3b7   : > { %p10_p5 = scmp.ge.s32.totalorder %s13_s14, 4   ;;  %s1457_s13 = smov %s1459_s15 }
 0x3b9   :  { %12 = sbr.rel (!%p10_p5) target bundleno = 2 (0x2), region = 76 }

// kernel: whisper_forward.37
= control target key start
LH: loop header
LB: loop body
LE: loop exit
PB: predicated region body
PF: predicated region fallthrough
CT: control target
= control target key end

     0   :  { %v306_v6 = vmov 0.0   ;;  %vm307_vm0 = vmmov 0   ;;  %s377_s0 = inlined_call_operand.vmem [shape: bf16[16,128], index: 0, kind: input, shape index: {}]   ;;  %s378_s1 = inlined_call_operand.vmem [shape: bf16[128,128], index: 1, kind: input, shape index: {}]   ;;  %s379_s2 = inlined_call_operand.vmem [shape: f32[1,128], index: 2, kind: input, shape index: {}]   ;;  %s380_s3 = inlined_call_operand.vmem [shape: f32[1,128], index: 3, kind: input, shape index: {}]   ;;  %s381_s4 = inlined_call_operand.vmem [shape: f32[1,128], index: 4, kind: input, shape index: {}]   ;;  %s382_s5 = inlined_call_operand.vmem [shape: bf16[16,128], index: 5, kind: output, shape index: {}]  }
   0x1   :  { %v251_v0 = vld [vmem:[%s377_s0] sm:$0xff]   ;;  %268 = vmatprep.subr.bf16.mxu0 %v306_v6  ;;  %v291_v7 = vld [vmem:[%s378_s1 + $0x8] sm:$0xff]   ;;  %v292_v8 = vld [vmem:[%s378_s1 + $0x10] sm:$0xff]   ;;  %284 = vmatprep.mubr.msk.bf16.mxu0 %vm307_vm0, %v306_v6 }
   0x2   :  { %v252_v1 = vunpack.c.l.bf16 %v251_v0  ;;  %v253_v2 = vunpack.c.h.bf16 %v251_v0  ;;  %v290_v5 = vld [vmem:[%s378_s1] sm:$0xff]   ;;  %v293_v9 = vld [vmem:[%s378_s1 + $0x18] sm:$0xff]   ;;  %v295_v11 = vld [vmem:[%s378_s1 + $0x28] sm:$0xff]  }
   0x3   :  { %269 = vmatpush3.bf16.msra.mxu0 %v290_v5  ;;  %v294_v10 = vld [vmem:[%s378_s1 + $0x20] sm:$0xff]   ;;  %v296_v12 = vld [vmem:[%s378_s1 + $0x30] sm:$0xff]   ;;  %v297_v13 = vld [vmem:[%s378_s1 + $0x38] sm:$0xff]  }
   0x4   :  { %31 = vadd.xlane.f32.xlu0 %v252_v1  ;;  %v37_v3 = vmul.f32 %v252_v1, %v252_v1  ;;  %v38_v4 = vmul.f32 %v253_v2, %v253_v2  ;;  %270 = vmatprep.subr.bf16.mxu0 %v306_v6  ;;  %v235_v33 = vld [vmem:[%s379_s2] ss:$0 sm:$0xff] }
   0x5   :  { %v236_v38 = vld [vmem:[%s380_s3] ss:$0 sm:$0xff] }
   0x6   :  { %39 = vadd.xlane.f32.xlu1 %v37_v3  ;;  %v245_v43 = vld [vmem:[%s381_s4] ss:$0 sm:$0xff] }
   0x7   :  { %271 = vmatpush3.bf16.msra.mxu0 %v291_v7 }
   0x8   :  { %33 = vadd.xlane.f32.xlu0 %v253_v2  ;;  %272 = vmatprep.subr.bf16.mxu0 %v306_v6 }
   0xa   :  { %41 = vadd.xlane.f32.xlu1 %v38_v4 }
   0xb   :  { %273 = vmatpush3.bf16.msra.mxu0 %v292_v8 }
   0xc   :  { %274 = vmatprep.subr.bf16.mxu0 %v306_v6 }
   0xf   :  { %275 = vmatpush3.bf16.msra.mxu0 %v293_v9 }
  0x10   :  { %276 = vmatprep.subr.bf16.mxu0 %v306_v6 }
  0x13   :  { %277 = vmatpush3.bf16.msra.mxu0 %v294_v10 }
  0x14   :  { %278 = vmatprep.subr.bf16.mxu0 %v306_v6 }
  0x17   :  { %279 = vmatpush3.bf16.msra.mxu0 %v295_v11 }
  0x18   :  { %280 = vmatprep.subr.bf16.mxu0 %v306_v6 }
  0x1b   :  { %281 = vmatpush3.bf16.msra.mxu0 %v296_v12 }
  0x1c   :  { %282 = vmatprep.subr.bf16.mxu0 %v306_v6 }
  0x1f   :  { %283 = vmatpush3.bf16.msra.mxu0 %v297_v13 }
  0x91   :  { %v32_v14 = vpop.xlane.xlu0 %31 }
  0x92   :  { %v35_v15 = vmul.f32 0.03125, %v32_v14 }
  0x93   :  { %v40_v16 = vpop.xlane.xlu1 %39 }
  0x94   :  { %v45_v17 = vmul.f32 %v35_v15, %v35_v15  ;;  %v43_v18 = vmul.f32 0.03125, %v40_v16  ;;  %v51_v30 = vsub.f32 %v252_v1, %v35_v15 }
  0x95   :  { %v34_v19 = vpop.xlane.xlu0 %33 }
  0x96   :  { %v47_v20 = vsub.f32 %v43_v18, %v45_v17  ;;  %v36_v21 = vmul.f32 0.03125, %v34_v19 }
  0x97   :  { %v42_v22 = vpop.xlane.xlu1 %41 }
  0x98   :  { %v49_v23 = vmax.f32 %v47_v20, 0.0  ;;  %v46_v24 = vmul.f32 %v36_v21, %v36_v21  ;;  %v44_v25 = vmul.f32 0.03125, %v42_v22  ;;  %v52_v34 = vsub.f32 %v253_v2, %v36_v21 }
  0x9a   :  { %v53_v26 = vadd.f32 1e-05, %v49_v23  ;;  %v48_v27 = vsub.f32 %v44_v25, %v46_v24 }
  0x9c   :  { %298 = vrsqrt.f32 %v53_v26  ;;  %v50_v28 = vmax.f32 %v48_v27, 0.0 }
  0x9e   :  { %v54_v29 = vadd.f32 1e-05, %v50_v28 }
  0xa0   :  { %300 = vrsqrt.f32 %v54_v29 }
  0xa6   :  { %v299_v31 = vpop.eup %298 }
  0xa7   :  { %v57_v32 = vmul.f32 %v299_v31, %v51_v30 }
  0xa9   :  { %v66_v37 = vmul.f32 %v235_v33, %v57_v32 }
  0xaa   :  { %v301_v35 = vpop.eup %300 }
  0xab   :  { %v58_v36 = vmul.f32 %v301_v35, %v52_v34  ;;  %v75_v40 = vadd.f32 %v236_v38, %v66_v37 }
  0xad   :  { %v67_v39 = vmul.f32 %v235_v33, %v58_v36 }
  0xaf   :  { %v76_v41 = vadd.f32 %v236_v38, %v67_v39 }
  0xb1   :  { %v77_v42 = vpack.c.bf16 %v76_v41, %v75_v40 }
  0xb3   :  { %285 = vmatmul.mubr.bf16.vlgmr.msra.gmra.mrb[0].mxu0 %v77_v42 }
 0x186   :  { %v178_v44 = vpop.f32.mrb[0].mxu0 }
 0x187   :  { %v201_v45 = vadd.f32 %v245_v43, %v178_v44  ;;  %v286_v46 = vpop.f32.mrb[1].mxu0 }
 0x188   :  { %v181_v47 = vpop.f32.mrb[2].mxu0 }
 0x189   :  { %v203_v48 = vmul.f32 %v201_v45, %v201_v45  ;;  %v202_v49 = vadd.f32 %v245_v43, %v181_v47  ;;  %v287_v50 = vpop.f32.mrb[3].mxu0 }
 0x18b   :  { %v205_v51 = vmul.f32 %v203_v48, %v201_v45  ;;  %v204_v52 = vmul.f32 %v202_v49, %v202_v49 }
 0x18d   :  { %v207_v53 = vmul.f32 0.044715, %v205_v51  ;;  %v206_v54 = vmul.f32 %v204_v52, %v202_v49 }
 0x18f   :  { %v209_v55 = vadd.f32 %v207_v53, %v201_v45  ;;  %v208_v56 = vmul.f32 0.044715, %v206_v54 }
 0x191   :  { %v211_v57 = vmul.f32 0.7978846, %v209_v55  ;;  %v210_v58 = vadd.f32 %v208_v56, %v202_v49 }
 0x193   :  { %302 = vtanh.f32 %v211_v57  ;;  %v212_v59 = vmul.f32 0.7978846, %v210_v58 }
 0x195   :  { %304 = vtanh.f32 %v212_v59 }
 0x19d   :  { %v303_v60 = vpop.eup %302 }
 0x19e   :  { %v215_v61 = vadd.f32 1.0, %v303_v60 }
 0x19f   :  { %v305_v62 = vpop.eup %304 }
 0x1a0   :  { %v217_v63 = vmul.f32 0.5, %v215_v61  ;;  %v216_v0 = vadd.f32 1.0, %v305_v62 }
 0x1a2   :  { %v218_v1 = vmul.f32 0.5, %v216_v0  ;;  %v219_v2 = vmul.f32 %v217_v63, %v201_v45 }
 0x1a4   :  { %v220_v3 = vmul.f32 %v218_v1, %v202_v49 }
 0x1a6   :  { %v257_v4 = vpack.c.bf16 %v220_v3, %v219_v2 }
 0x1a8   :  { %258 = vst [vmem:[%s382_s5] sm:$0xff] %v257_v4  }

// kernel: whisper_forward.44
= control target key start
LH: loop header
LB: loop body
LE: loop exit
PB: predicated region body
PF: predicated region fallthrough
CT: control target
= control target key end

     0   :  { %vm18_vm0 = vcmask 261120   ;;  %vm72_vm1 = vcmask 257024   ;;  %s132_s0 = inlined_call_operand.vmem [shape: bf16[16,32], index: 0, kind: input, shape index: {}]   ;;  %s133_s1 = inlined_call_operand.vmem [shape: f32[1,32], index: 1, kind: input, shape index: {}]   ;;  %s134_s2 = inlined_call_operand.vmem [shape: f32[1,32], index: 2, kind: input, shape index: {}]   ;;  %s135_s3 = inlined_call_operand.vmem [shape: bf16[16,32], index: 3, kind: output, shape index: {}]  }
   0x1   :  { %v86_v0 = vld [vmem:[%s132_s0] sm:$0xff]  }
   0x2   :  { %v87_v1 = vunpack.c.l.bf16 %v86_v0  ;;  %v88_v2 = vunpack.c.h.bf16 %v86_v0  ;;  %v79_v22 = vld [vmem:[%s133_s1] ss:$0 sm:$0xff] }
   0x3   :  { %v80_v24 = vld [vmem:[%s134_s2] ss:$0 sm:$0xff] }
   0x4   :  { %v19_v3 = vsel %vm18_vm0, %v87_v1, 0.0  ;;  %v22_v4 = vsel %vm18_vm0, %v88_v2, 0.0 }
   0x5   :  { %20 = vadd.xlane.f32.xlu0 %v19_v3 }
   0x9   :  { %23 = vadd.xlane.f32.xlu0 %v22_v4 }
  0x92   :  { %v21_v5 = vpop.xlane.xlu0 %20 }
  0x93   :  { %v26_v6 = vmul.f32 0.03125, %v21_v5 }
  0x95   :  { %v28_v7 = vsub.f32 %v87_v1, %v26_v6 }
  0x96   :  { %v24_v8 = vpop.xlane.xlu0 %23 }
  0x97   :  { %v27_v9 = vmul.f32 0.03125, %v24_v8  ;;  %v30_v10 = vmul.f32 %v28_v7, %v28_v7 }
  0x99   :  { %v29_v11 = vsub.f32 %v88_v2, %v27_v9  ;;  %v32_v12 = vsel %vm18_vm0, %v30_v10, 0.0 }
  0x9a   :  { %33 = vadd.xlane.f32.xlu1 %v32_v12 }
  0x9b   :  { %v31_v13 = vmul.f32 %v29_v11, %v29_v11 }
  0x9d   :  { %v35_v14 = vsel %vm18_vm0, %v31_v13, 0.0 }
  0x9e   :  { %36 = vadd.xlane.f32.xlu1 %v35_v14 }
 0x127   :  { %v34_v15 = vpop.xlane.xlu1 %33 }
 0x128   :  { %v38_v16 = vmul.f32 0.03125, %v34_v15 }
 0x12a   :  { %v40_v17 = vadd.f32 1e-05, %v38_v16 }
 0x12b   :  { %v37_v18 = vpop.xlane.xlu1 %36 }
 0x12c   :  { %89 = vrsqrt.f32 %v40_v17  ;;  %v39_v19 = vmul.f32 0.03125, %v37_v18 }
 0x12e   :  { %v41_v20 = vadd.f32 1e-05, %v39_v19 }
 0x130   :  { %91 = vrsqrt.f32 %v41_v20 }
 0x136   :  { %v90_v21 = vpop.eup %89 }
 0x137   :  { %v44_v23 = vmul.f32 %v90_v21, %v28_v7 }
 0x139   :  { %v53_v25 = vmul.f32 %v79_v22, %v44_v23 }
 0x13a   :  { %v92_v26 = vpop.eup %91 }
 0x13b   :  { %v62_v27 = vadd.f32 %v80_v24, %v53_v25  ;;  %v45_v28 = vmul.f32 %v92_v26, %v29_v11 }
 0x13d   :  { %v83_v29 = vpack.c.bf16 %v62_v27, %v62_v27  ;;  %v54_v30 = vmul.f32 %v79_v22, %v45_v28 }
 0x13f   :  { %73 = vst.msk [vmem:[%s135_s3] sm:$0xf] %vm72_vm1, %v83_v29  ;;  %v63_v31 = vadd.f32 %v80_v24, %v54_v30 }
 0x141   :  { %v84_v32 = vpack.c.bf16 %v63_v31, %v63_v31 }
 0x143   :  { %74 = vst.msk [vmem:[%s135_s3 + $0x4] sm:$0xf] %vm72_vm1, %v84_v32 }

// kernel: whisper_forward.49
= control target key start
LH: loop header
LB: loop body
LE: loop exit
PB: predicated region body
PF: predicated region fallthrough
CT: control target
= control target key end

     0   :  { %v227_v0 = vmov 0.0   ;;  %vm228_vm0 = vmmov 0   ;;  %s282_s1 = inlined_call_operand.vmem [shape: bf16[128,128], index: 1, kind: input, shape index: {}]   ;;  %s283_s0 = inlined_call_operand.vmem [shape: bf16[16,128], index: 0, kind: input, shape index: {}]   ;;  %s284_s2 = inlined_call_operand.vmem [shape: f32[1,128], index: 2, kind: input, shape index: {}]   ;;  %s285_s3 = inlined_call_operand.vmem [shape: bf16[16,128], index: 3, kind: output, shape index: {}]  }
   0x1   :  { %196 = vmatprep.subr.bf16.mxu0 %v227_v0  ;;  %v218_v1 = vld [vmem:[%s282_s1] sm:$0xff]   ;;  %212 = vmatprep.mubr.msk.bf16.mxu0 %vm228_vm0, %v227_v0  ;;  %v219_v2 = vld [vmem:[%s282_s1 + $0x8] sm:$0xff]   ;;  %v220_v3 = vld [vmem:[%s282_s1 + $0x10] sm:$0xff]  }
   0x2   :  { %197 = vmatpush3.bf16.msra.mxu0 %v218_v1  ;;  %v221_v4 = vld [vmem:[%s282_s1 + $0x18] sm:$0xff]   ;;  %v222_v5 = vld [vmem:[%s282_s1 + $0x20] sm:$0xff]   ;;  %v223_v6 = vld [vmem:[%s282_s1 + $0x28] sm:$0xff]  }
   0x3   :  { %198 = vmatprep.subr.bf16.mxu0 %v227_v0  ;;  %v224_v7 = vld [vmem:[%s282_s1 + $0x30] sm:$0xff]   ;;  %v225_v8 = vld [vmem:[%s282_s1 + $0x38] sm:$0xff]   ;;  %v226_v9 = vld [vmem:[%s283_s0] sm:$0xff]  }
   0x4   :  { %v177_v11 = vld [vmem:[%s284_s2] ss:$0 sm:$0xff] }
   0x6   :  { %199 = vmatpush3.bf16.msra.mxu0 %v219_v2 }
   0x7   :  { %200 = vmatprep.subr.bf16.mxu0 %v227_v0 }
   0xa   :  { %201 = vmatpush3.bf16.msra.mxu0 %v220_v3 }
   0xb   :  { %202 = vmatprep.subr.bf16.mxu0 %v227_v0 }
   0xe   :  { %203 = vmatpush3.bf16.msra.mxu0 %v221_v4 }
   0xf   :  { %204 = vmatprep.subr.bf16.mxu0 %v227_v0 }
  0x12   :  { %205 = vmatpush3.bf16.msra.mxu0 %v222_v5 }
  0x13   :  { %206 = vmatprep.subr.bf16.mxu0 %v227_v0 }
  0x16   :  { %207 = vmatpush3.bf16.msra.mxu0 %v223_v6 }
  0x17   :  { %208 = vmatprep.subr.bf16.mxu0 %v227_v0 }
  0x1a   :  { %209 = vmatpush3.bf16.msra.mxu0 %v224_v7 }
  0x1b   :  { %210 = vmatprep.subr.bf16.mxu0 %v227_v0 }
  0x1e   :  { %211 = vmatpush3.bf16.msra.mxu0 %v225_v8 }
  0x21   :  { %213 = vmatmul.mubr.bf16.vlgmr.msra.gmra.mrb[0].mxu0 %v226_v9 }
  0xf4   :  { %v129_v10 = vpop.f32.mrb[0].mxu0 }
  0xf5   :  { %v214_v12 = vpop.f32.mrb[1].mxu0  ;;  %v152_v14 = vadd.f32 %v177_v11, %v129_v10 }
  0xf6   :  { %v132_v13 = vpop.f32.mrb[2].mxu0 }
  0xf7   :  { %v153_v15 = vadd.f32 %v177_v11, %v132_v13  ;;  %v215_v16 = vpop.f32.mrb[3].mxu0 }
  0xf9   :  { %v185_v17 = vpack.c.bf16 %v153_v15, %v152_v14 }
  0xfb   :  { %186 = vst [vmem:[%s285_s3] sm:$0xff] %v185_v17  }

// kernel: whisper_forward.46
= control target key start
LH: loop header
LB: loop body
LE: loop exit
PB: predicated region body
PF: predicated region fallthrough
CT: control target
= control target key end

     0   :  { %s1299_s12 = smov 0   ;;  %s1301_s13 = smov 0   ;;  %s1483_s0 = inlined_call_operand.vmem [shape: bf16[2,4,8,8], index: 0, kind: input, shape index: {}]   ;;  %s1484_s1 = inlined_call_operand.vmem [shape: bf16[2,4,8,8], index: 1, kind: input, shape index: {}]   ;;  %s1485_s2 = inlined_call_operand.vmem [shape: bf16[2,4,8,8], index: 2, kind: input, shape index: {}]   ;;  %s1486_s3 = inlined_call_operand.vmem [shape: bf16[2,8,32], index: 3, kind: output, shape index: {}]  }
   0x1   :  { %s1303_s14 = smov 0  }
   0x2 LB: > { %s39_s15 = sadd.s32 1, %s1266_s13  ;;  %p1100_p0 = scmp.ge.s32.totalorder %s1270_s14, 1  ;;  %s1270_s14 = sphi %s1303_s14, %s13_s14   ;;  %s1266_s13 = sphi %s1301_s13, %s1490_s13   ;;  %s1262_s12 = sphi %s1299_s12, %s1489_s12  }
   0x3   : > { %p41_p1 = scmp.ge.s32.totalorder %s39_s15, 2  ;;  %p223_p2 = scmp.lt.s32.totalorder %s1270_s14, 3 }
   0x5   : > { %s1492_s15 = smov (%p41_p1, %s39_s15), 0  ;;  %p224_p3 = pnand %p1100_p0, %p223_p2 }
   0x6   : > { %p284_p4 = scmp.lt.s32.totalorder (!%p224_p3), %s1262_s12, 1  ;;  %vm346_vm0 = vcmask (!%p224_p3), 64512   ;;  %v1272_v0 = vmov (!%p224_p3), 0.0   ;;  %vm1273_vm1 = vmmov (!%p224_p3), 0   ;;  %vm337_vm2 = vcmask (!%p224_p3), 7168   ;;  %s1276_s26 = smov (!%p224_p3), 8  }
   0x7   : > { %227 = sbr.rel (%p224_p3) target bundleno = 951 (0x3b7), region = 32  ;;  %1143 = vmatprep.subr.bf16.mxu0 (!%p224_p3), %v1272_v0  ;;  %347 = vst.msk [vmem:[#allocation4] sm:$0xff] (!%p224_p3), %vm346_vm0, %v1272_v0  ;;  %348 = vst.msk [vmem:[#allocation4 + $0x8] sm:$0xff] (!%p224_p3), %vm346_vm0, %v1272_v0  ;;  %1149 = vmatprep.subr.bf16.mxu1 (!%p224_p3), %v1272_v0  ;;  %v1274_v13 = vmov (!%p224_p3), -1e+30   ;;  %v549_v14 = vlaneseq (!%p224_p3)  ;;  %v1275_v42 = vmov (!%p224_p3), 0  }
   0x8   : > { %349 = vst.msk [vmem:[#allocation4 + $0x10] sm:$0xff] (!%p224_p3), %vm346_vm0, %v1272_v0  ;;  %350 = vst.msk [vmem:[#allocation4 + $0x18] sm:$0xff] (!%p224_p3), %vm346_vm0, %v1272_v0  ;;  %1145 = vmatprep.mubr.msk.bf16.mxu0 (!%p224_p3), %vm1273_vm1, %v1272_v0  ;;  %1151 = vmatprep.mubr.msk.bf16.mxu1 (!%p224_p3), %vm1273_vm1, %v1272_v0  ;;  %vm695_vm6 = vcmask (!%p224_p3), 1043456   ;;  %s1277_s27 = smov (!%p224_p3), 16   ;;  %s1278_s28 = smov (!%p224_p3), 24   ;;  %vm929_vm7 = vcmask (!%p224_p3), 60416  }
   0x9   : > { %338 = vst.msk [vmem:[#allocation2] sm:$0xff] (!%p224_p3), %vm337_vm2, %v1274_v13  ;;  %339 = vst.msk [vmem:[#allocation2 + $0x8] sm:$0xff] (!%p224_p3), %vm337_vm2, %v1274_v13  ;;  %v550_v15 = vand.u32 (!%p224_p3), 127, %v549_v14  ;;  %v556_v16 = vshrl.u32 (!%p224_p3), %v549_v14, 7  ;;  %1222 = vset.pattern.permute.xlu0 (!%p224_p3), %v1275_v42  ;;  %1223 = vset.pattern.permute.xlu1 (!%p224_p3), %v1275_v42  ;;  %vm938_vm8 = vcmask (!%p224_p3), 126016   ;;  %vm947_vm9 = vcmask (!%p224_p3), 191616  }
   0xa   : > { %340 = vst.msk [vmem:[#allocation2 + $0x10] sm:$0xff] (!%p224_p3), %vm337_vm2, %v1274_v13  ;;  %341 = vst.msk [vmem:[#allocation2 + $0x18] sm:$0xff] (!%p224_p3), %vm337_vm2, %v1274_v13  ;;  %vm956_vm10 = vcmask (!%p224_p3), 257216  }
   0xb   : > { %342 = vst.msk [vmem:[#allocation3] sm:$0xff] (!%p224_p3), %vm337_vm2, %v1272_v0  ;;  %343 = vst.msk [vmem:[#allocation3 + $0x8] sm:$0xff] (!%p224_p3), %vm337_vm2, %v1272_v0  ;;  %vm553_vm3 = vcmp.lt.s32.totalorder (!%p224_p3), %v550_v15, 8  ;;  %vm559_vm4 = vcmp.le.s32.totalorder (!%p224_p3), %v550_v15, %v556_v16 }
   0xc   : > { %344 = vst.msk [vmem:[#allocation3 + $0x10] sm:$0xff] (!%p224_p3), %vm337_vm2, %v1272_v0  ;;  %345 = vst.msk [vmem:[#allocation3 + $0x18] sm:$0xff] (!%p224_p3), %vm337_vm2, %v1272_v0 }
   0xd   : > { %vm1376_vm5 = vmand (!%p224_p3), %vm553_vm3, %vm559_vm4 }
   0xe   : > { %s1494_s12 = smov (!%p284_p4, %s1262_s12), 1 }
   0xf   : > { %s1334_s16 = sshll.u32 %s1494_s12, 4  ;;  %s1107_s29 = sshll.u32 %s1494_s12, 2 }
  0x10   : > { %s307_s19 = scalar_lea.vmem %s1484_s1, %s1334_s16  ;;  %s294_s22 = scalar_lea.vmem %s1483_s0, %s1334_s16  ;;  %v1404_v43 = vld [vmem:[#allocation2] sm:$0xff]  ;;  %v1409_v46 = vld [vmem:[#allocation2 + $0x8] sm:$0xff] }
  0x11   : > { %v355_v1 = vld [vmem:[%s307_s19] sm:$0xf]  ;;  %v356_v2 = vld [vmem:[%s307_s19 + $0x4] sm:$0xf]  ;;  %v357_v5 = vld [vmem:[%s307_s19 + $0x8] sm:$0xf]  ;;  %s320_s25 = scalar_lea.vmem %s1485_s2, %s1334_s16  ;;  %s331_s5 = scalar_lea.vmem %s1486_s3, %s1107_s29 }
  0x12   : > { %v368_v3 = vsel %vm346_vm0, %v355_v1, 0  ;;  %v414_v4 = vsel %vm346_vm0, %v356_v2, 0  ;;  %v358_v6 = vld [vmem:[%s307_s19 + $0xc] sm:$0xf]  ;;  %v351_v7 = vld [vmem:[%s294_s22] sm:$0xf] }
  0x13   : > { %1144 = vmatpush3.bf16.xpose.msra.mxu0 %v368_v3  ;;  %1150 = vmatpush3.bf16.xpose.msra.mxu1 %v414_v4  ;;  %v352_v8 = vld [vmem:[%s294_s22 + $0x4] sm:$0xf]  ;;  %v460_v9 = vsel %vm346_vm0, %v357_v5, 0  ;;  %v506_v10 = vsel %vm346_vm0, %v358_v6, 0  ;;  %v353_v11 = vld [vmem:[%s294_s22 + $0x8] sm:$0xf] }
  0x14   : > { %1155 = vmatprep.subr.bf16.mxu0 %v1272_v0  ;;  %1161 = vmatprep.subr.bf16.mxu1 %v1272_v0  ;;  %v354_v12 = vld [vmem:[%s294_s22 + $0xc] sm:$0xf]  ;;  %v1419_v50 = vld [vmem:[#allocation2 + $0x10] sm:$0xff]  ;;  %v1427_v54 = vld [vmem:[#allocation2 + $0x18] sm:$0xff] }
  0x15   : > { %v359_v59 = vld [vmem:[%s320_s25] sm:$0xf]  ;;  %v360_v61 = vld [vmem:[%s320_s25 + $0x4] sm:$0xf]  ;;  %v361_v63 = vld [vmem:[%s320_s25 + $0x8] sm:$0xf] }
  0x16   : > { %v697_v60 = vsel %vm695_vm6, %v359_v59, 0  ;;  %v743_v62 = vsel %vm695_vm6, %v360_v61, 0  ;;  %v789_v1 = vsel %vm695_vm6, %v361_v63, 0  ;;  %v362_v2 = vld [vmem:[%s320_s25 + $0xc] sm:$0xf] }
  0x17   : > { %v835_v3 = vsel %vm695_vm6, %v362_v2, 0  ;;  %v661_v59 = vld [vmem:[#allocation4 + $0x8] sm:$0xff] }
  0x1a   : > { %1146 = vmatmul.mubr.msk.bf16.vlgmr.msra.gmra.mrb[0].mxu0 %vm346_vm0, %v351_v7  ;;  %1152 = vmatmul.mubr.msk.bf16.vlgmr.msra.gmra.mrb[0].mxu1 %vm346_vm0, %v352_v8 }
  0x1b   : > { %1156 = vmatpush3.bf16.xpose.msra.mxu0 %v460_v9  ;;  %1162 = vmatpush3.bf16.xpose.msra.mxu1 %v506_v10 }
  0x1c   : > { %1157 = vmatprep.mubr.msk.bf16.mxu0 %vm1273_vm1, %v1272_v0  ;;  %1163 = vmatprep.mubr.msk.bf16.mxu1 %vm1273_vm1, %v1272_v0 }
  0x1d   : > { %1167 = vmatprep.subr.bf16.mxu0 %v1272_v0  ;;  %1173 = vmatprep.subr.bf16.mxu1 %v1272_v0 }
  0x22   : > { %1158 = vmatmul.mubr.msk.bf16.vlgmr.msra.gmra.mrb[4].mxu0 %vm346_vm0, %v353_v11  ;;  %1164 = vmatmul.mubr.msk.bf16.vlgmr.msra.gmra.mrb[4].mxu1 %vm346_vm0, %v354_v12 }
  0x23   : > { %1169 = vmatprep.mubr.msk.bf16.mxu0 %vm1273_vm1, %v1272_v0  ;;  %1175 = vmatprep.mubr.msk.bf16.mxu1 %vm1273_vm1, %v1272_v0 }
  0x24   : > { %1168 = vmatpush3.bf16.msra.mxu0 %v697_v60  ;;  %1174 = vmatpush3.bf16.msra.mxu1 %v743_v62 }
  0x25   : > { %1179 = vmatprep.subr.bf16.mxu0 %v1272_v0  ;;  %1185 = vmatprep.subr.bf16.mxu1 %v1272_v0 }
  0xed   : > { %v404_v18 = vpop.f32.mrb[0].mxu0  ;;  %v450_v19 = vpop.f32.mrb[0].mxu1 }
  0xee   : > { %v1382_v20 = vsel %vm1376_vm5, %v404_v18, -1e+30  ;;  %v1147_v21 = vpop.f32.mrb[1].mxu0  ;;  %v1386_v22 = vsel %vm1376_vm5, %v450_v19, -1e+30  ;;  %v1153_v23 = vpop.f32.mrb[1].mxu1 }
  0xef   : > { %v407_v24 = vpop.f32.mrb[2].mxu0  ;;  %v571_v25 = vsel %vm346_vm0, %v1382_v20, -inf  ;;  %v453_v26 = vpop.f32.mrb[2].mxu1  ;;  %v574_v29 = vsel %vm346_vm0, %v1386_v22, -inf }
  0xf0   : > { %572 = vmax.xlane.f32.xlu0 %v571_v25  ;;  %v1148_v27 = vpop.f32.mrb[3].mxu0  ;;  %v1154_v28 = vpop.f32.mrb[3].mxu1 }
  0xf4   : > { %575 = vmax.xlane.f32.xlu0 %v574_v29 }
  0xf5   : > { %v496_v30 = vpop.f32.mrb[4].mxu0  ;;  %v542_v31 = vpop.f32.mrb[4].mxu1 }
  0xf6   : > { %v1394_v32 = vsel %vm1376_vm5, %v496_v30, -1e+30  ;;  %v1159_v33 = vpop.f32.mrb[5].mxu0  ;;  %v1398_v34 = vsel %vm1376_vm5, %v542_v31, -1e+30  ;;  %v1165_v35 = vpop.f32.mrb[5].mxu1 }
  0xf7   : > { %v499_v36 = vpop.f32.mrb[6].mxu0  ;;  %v577_v37 = vsel %vm346_vm0, %v1394_v32, -inf  ;;  %v545_v38 = vpop.f32.mrb[6].mxu1  ;;  %v580_v41 = vsel %vm346_vm0, %v1398_v34, -inf }
  0xf8   : > { %578 = vmax.xlane.f32.xlu1 %v577_v37  ;;  %v1160_v39 = vpop.f32.mrb[7].mxu0  ;;  %v1166_v40 = vpop.f32.mrb[7].mxu1  ;;  %v633_v37 = vld [vmem:[#allocation3 + $0x10] sm:$0xff] }
  0xfc   : > { %581 = vmax.xlane.f32.xlu1 %v580_v41  ;;  %v634_v41 = vld [vmem:[#allocation3 + $0x18] sm:$0xff] }
 0x17d   : > { %v573_v44 = vpop.xlane.xlu0 %572 }
 0x17e   : > { %v1407_v45 = vmax.f32 %v1404_v43, %v573_v44 }
 0x180   : > { %v587_v47 = vsub.f32 %v1404_v43, %v1407_v45  ;;  %885 = vst.msk [vmem:[#allocation2] sm:$0xff] %vm337_vm2, %v1407_v45  ;;  %601 = vperm.xlu0 %1222, %v1407_v45  }
 0x181   : > { %v576_v48 = vpop.xlane.xlu0 %575 }
 0x182   : > { %v1417_v49 = vmax.f32 %v1409_v46, %v576_v48  ;;  %v591_v33 = vmul.f32 1.442695, %v587_v47 }
 0x184   : > { %v588_v51 = vsub.f32 %v1409_v46, %v1417_v49  ;;  %886 = vst.msk [vmem:[#allocation2 + $0x8] sm:$0xff] %vm337_vm2, %v1417_v49  ;;  %606 = vperm.xlu1 %1223, %v1417_v49   ;;  %v631_v49 = vld [vmem:[#allocation3] sm:$0xff] }
 0x185   : > { %v579_v52 = vpop.xlane.xlu1 %578 }
 0x186   : > { %v585_v53 = vmax.f32 %v1419_v50, %v579_v52 }
 0x188   : > { %v589_v55 = vsub.f32 %v1419_v50, %v585_v53  ;;  %887 = vst.msk [vmem:[#allocation2 + $0x10] sm:$0xff] %vm337_vm2, %v585_v53  ;;  %611 = vperm.xlu1 %1223, %v585_v53  }
 0x189   : > { %v582_v56 = vpop.xlane.xlu1 %581 }
 0x18a   : > { %v586_v57 = vmax.f32 %v1427_v54, %v582_v56  ;;  %v595_v27 = vmul.f32 1.442695, %v589_v55 }
 0x18c   : > { %v590_v58 = vsub.f32 %v1427_v54, %v586_v57  ;;  %888 = vst.msk [vmem:[#allocation2 + $0x18] sm:$0xff] %vm337_vm2, %v586_v57  ;;  %616 = vperm.xlu1 %1223, %v586_v57  }
 0x18e   : > { %v597_v29 = vmul.f32 1.442695, %v590_v58 }
 0x1ff   : > { %v602_v4 = vpop.permute.xlu0 %601 }
 0x200   : > { %v619_v5 = vsub.f32 %v1382_v20, %v602_v4 }
 0x202   : > { %v623_v6 = vmul.f32 1.442695, %v619_v5 }
 0x203   : > { %v607_v7 = vpop.permute.xlu1 %606 }
 0x204   : > { %1224 = vpow2.f32 %v623_v6  ;;  %v620_v8 = vsub.f32 %v1386_v22, %v607_v7 }
 0x206   : > { %v625_v9 = vmul.f32 1.442695, %v620_v8 }
 0x207   : > { %v612_v10 = vpop.permute.xlu1 %611 }
 0x208   : > { %1226 = vpow2.f32 %v625_v9  ;;  %v621_v11 = vsub.f32 %v1394_v32, %v612_v10 }
 0x20a   : > { %v627_v12 = vmul.f32 1.442695, %v621_v11  ;;  %v663_v11 = vld [vmem:[#allocation4 + $0x18] sm:$0xff] }
 0x20b   : > { %v617_v13 = vpop.permute.xlu1 %616 }
 0x20c   : > { %1228 = vpow2.f32 %v627_v12  ;;  %v622_v14 = vsub.f32 %v1398_v34, %v617_v13  ;;  %v632_v34 = vld [vmem:[#allocation3 + $0x8] sm:$0xff] }
 0x20e   : > { %v1225_v15 = vpop.eup %1224  ;;  %v629_v16 = vmul.f32 1.442695, %v622_v14 }
 0x20f   : > { %v688_v17 = vpack.c.bf16 %v1225_v15, %v1225_v15  ;;  %v639_v28 = vsel %vm346_vm0, %v1225_v15, 0.0 }
 0x210   : > { %1230 = vpow2.f32 %v629_v16 }
 0x211   : > { %1170 = vmatmul.mubr.msk.bf16.vlgmr.msra.gmra.mrb[8].mxu0 %vm346_vm0, %v688_v17  ;;  %1232 = vpow2.f32 %v595_v27 }
 0x212   : > { %v1227_v18 = vpop.eup %1226  ;;  %1180 = vmatpush3.bf16.msra.mxu0 %v789_v1  ;;  %1181 = vmatprep.mubr.msk.bf16.mxu0 %vm1273_vm1, %v1272_v0 }
 0x213   : > { %v642_v19 = vsel %vm346_vm0, %v1227_v18, 0.0  ;;  %v689_v20 = vpack.c.bf16 %v1227_v18, %v1227_v18 }
 0x214   : > { %643 = vadd.xlane.f32.xlu1 %v642_v19 }
 0x215   : > { %1176 = vmatmul.mubr.msk.bf16.vlgmr.msra.gmra.mrb[8].mxu1 %vm346_vm0, %v689_v20 }
 0x216   : > { %v1229_v21 = vpop.eup %1228  ;;  %1186 = vmatpush3.bf16.msra.mxu1 %v835_v3  ;;  %1187 = vmatprep.mubr.msk.bf16.mxu1 %vm1273_vm1, %v1272_v0  ;;  %v593_v0 = vmul.f32 1.442695, %v588_v51  ;;  %v662_v3 = vld [vmem:[#allocation4 + $0x10] sm:$0xff] }
 0x217   : > { %v645_v22 = vsel %vm346_vm0, %v1229_v21, 0.0  ;;  %v690_v23 = vpack.c.bf16 %v1229_v21, %v1229_v21 }
 0x218   : > { %646 = vadd.xlane.f32.xlu0 %v645_v22  ;;  %1234 = vpow2.f32 %v593_v0 }
 0x219   : > { %1182 = vmatmul.mubr.msk.bf16.vlgmr.msra.gmra.mrb[12].mxu0 %vm346_vm0, %v690_v23  ;;  %1236 = vpow2.f32 %v597_v29 }
 0x21a   : > { %v1231_v24 = vpop.eup %1230  ;;  %1238 = vpow2.f32 %v591_v33 }
 0x21b   : > { %v648_v25 = vsel %vm346_vm0, %v1231_v24, 0.0  ;;  %v691_v26 = vpack.c.bf16 %v1231_v24, %v1231_v24  ;;  %v1233_v30 = vpop.eup %1232 }
 0x21c   : > { %649 = vadd.xlane.f32.xlu1 %v648_v25  ;;  %v637_v39 = vmul.f32 %v1233_v30, %v633_v37 }
 0x21d   : > { %1188 = vmatmul.mubr.msk.bf16.vlgmr.msra.gmra.mrb[12].mxu1 %vm346_vm0, %v691_v26 }
 0x220   : > { %640 = vadd.xlane.f32.xlu1 %v639_v28 }
 0x222   : > { %v1235_v31 = vpop.eup %1234 }
 0x223   : > { %v1237_v32 = vpop.eup %1236  ;;  %v636_v35 = vmul.f32 %v1235_v31, %v632_v34 }
 0x224   : > { %v638_v44 = vmul.f32 %v1237_v32, %v634_v41  ;;  %v1239_v46 = vpop.eup %1238 }
 0x225   : > { %v635_v47 = vmul.f32 %v1239_v46, %v631_v49 }
 0x22e   : > { %676 = vperm.xlu0 %1222, %v1233_v30   ;;  %v660_v30 = vld [vmem:[#allocation4] sm:$0xff] }
 0x231   : > { %671 = vperm.xlu1 %1223, %v1235_v31  }
 0x235   : > { %681 = vperm.xlu1 %1223, %v1237_v32  }
 0x2a1   : > { %v644_v36 = vpop.xlane.xlu1 %643 }
 0x2a2   : > { %v652_v38 = vadd.f32 %v644_v36, %v636_v35 }
 0x2a4   : > { %657 = vst.msk [vmem:[#allocation3 + $0x8] sm:$0xff] %vm337_vm2, %v652_v38 }
 0x2a5   : > { %v647_v40 = vpop.xlane.xlu0 %646 }
 0x2a6   : > { %v653_v42 = vadd.f32 %v647_v40, %v637_v39 }
 0x2a8   : > { %658 = vst.msk [vmem:[#allocation3 + $0x10] sm:$0xff] %vm337_vm2, %v653_v42 }
 0x2a9   : > { %v650_v48 = vpop.xlane.xlu1 %649 }
 0x2aa   : > { %v654_v43 = vadd.f32 %v650_v48, %v638_v44 }
 0x2ab   : > { %v897_v45 = vld [vmem:[#allocation3 + $0x8] sm:$0xff] }
 0x2ac   : > { %659 = vst.msk [vmem:[#allocation3 + $0x18] sm:$0xff] %vm337_vm2, %v654_v43  ;;  %1240 = vrcp.f32 %v897_v45 }
 0x2ad   : > { %v641_v50 = vpop.xlane.xlu1 %640  ;;  %v677_v4 = vpop.permute.xlu0 %676 }
 0x2ae   : > { %v651_v51 = vadd.f32 %v641_v50, %v635_v47  ;;  %v686_v9 = vmul.f32 %v677_v4, %v662_v3 }
 0x2af   : > { %v898_v52 = vld [vmem:[#allocation3 + $0x10] sm:$0xff] }
 0x2b0   : > { %656 = vst.msk [vmem:[#allocation3] sm:$0xff] %vm337_vm2, %v651_v51  ;;  %1242 = vrcp.f32 %v898_v52 }
 0x2b1   : > { %v672_v60 = vpop.permute.xlu1 %671 }
 0x2b2   : > { %v685_v1 = vmul.f32 %v672_v60, %v661_v59 }
 0x2b3   : > { %v899_v53 = vld [vmem:[#allocation3 + $0x18] sm:$0xff] }
 0x2b4   : > { %1244 = vrcp.f32 %v899_v53 }
 0x2b5   : > { %v682_v12 = vpop.permute.xlu1 %681 }
 0x2b6   : > { %v1241_v54 = vpop.eup %1240  ;;  %v687_v17 = vmul.f32 %v682_v12, %v663_v11 }
 0x2b7   : > { %911 = vperm.xlu1 %1223, %v1241_v54   ;;  %v896_v55 = vld [vmem:[#allocation3] sm:$0xff] }
 0x2b8   : > { %1246 = vrcp.f32 %v896_v55 }
 0x2ba   : > { %v1243_v56 = vpop.eup %1242 }
 0x2bb   : > { %916 = vperm.xlu1 %1223, %v1243_v56  }
 0x2be   : > { %v1245_v57 = vpop.eup %1244 }
 0x2bf   : > { %666 = vperm.xlu1 %1223, %v1239_v46   ;;  %921 = vperm.xlu0 %1222, %v1245_v57  }
 0x2c2   : > { %v1247_v58 = vpop.eup %1246 }
 0x2c3   : > { %906 = vperm.xlu0 %1222, %v1247_v58  }
 0x2e4   : > { %v733_v61 = vpop.f32.mrb[8].mxu0 }
 0x2e5   : > { %v1171_v62 = vpop.f32.mrb[9].mxu0 }
 0x2e6   : > { %v736_v63 = vpop.f32.mrb[10].mxu0 }
 0x2e7   : > { %v1172_v2 = vpop.f32.mrb[11].mxu0 }
 0x2e8   : > { %v779_v5 = vpop.f32.mrb[8].mxu1 }
 0x2e9   : > { %v878_v6 = vadd.f32 %v779_v5, %v685_v1  ;;  %v1177_v7 = vpop.f32.mrb[9].mxu1 }
 0x2ea   : > { %v782_v8 = vpop.f32.mrb[10].mxu1 }
 0x2eb   : > { %882 = vst.msk [vmem:[#allocation4 + $0x8] sm:$0xff] %vm346_vm0, %v878_v6  ;;  %v1178_v10 = vpop.f32.mrb[11].mxu1 }
 0x2ec   : > { %v825_v13 = vpop.f32.mrb[12].mxu0 }
 0x2ed   : > { %v879_v14 = vadd.f32 %v825_v13, %v686_v9  ;;  %v1183_v15 = vpop.f32.mrb[13].mxu0 }
 0x2ee   : > { %v828_v16 = vpop.f32.mrb[14].mxu0 }
 0x2ef   : > { %883 = vst.msk [vmem:[#allocation4 + $0x10] sm:$0xff] %vm346_vm0, %v879_v14  ;;  %v1184_v18 = vpop.f32.mrb[15].mxu0 }
 0x2f0   : > { %v871_v19 = vpop.f32.mrb[12].mxu1 }
 0x2f1   : > { %v880_v20 = vadd.f32 %v871_v19, %v687_v17  ;;  %v1189_v21 = vpop.f32.mrb[13].mxu1 }
 0x2f2   : > { %v874_v22 = vpop.f32.mrb[14].mxu1  ;;  %v893_v24 = vld [vmem:[#allocation4 + $0x8] sm:$0xff] }
 0x2f3   : > { %884 = vst.msk [vmem:[#allocation4 + $0x18] sm:$0xff] %vm346_vm0, %v880_v20  ;;  %v1190_v23 = vpop.f32.mrb[15].mxu1 }
 0x2f6   : > { %v894_v0 = vld [vmem:[#allocation4 + $0x10] sm:$0xff] }
 0x2fa   : > { %v895_v33 = vld [vmem:[#allocation4 + $0x18] sm:$0xff] }
 0x336   : > { %v912_v25 = vpop.permute.xlu1 %911 }
 0x337   : > { %v925_v26 = vmul.f32 %v912_v25, %v893_v24 }
 0x339   : > { %v1124_v27 = vpack.c.bf16 %v925_v26, %v925_v26 }
 0x33a   : > { %v917_v28 = vpop.permute.xlu1 %916 }
 0x33b   : > { %v926_v29 = vmul.f32 %v917_v28, %v894_v0  ;;  %935 = vrot.lane.b32.xlu1 %v1124_v27, %s1276_s26 }
 0x33d   : > { %v1125_v31 = vpack.c.bf16 %v926_v29, %v926_v29 }
 0x33e   : > { %v922_v32 = vpop.permute.xlu0 %921  ;;  %v667_v34 = vpop.permute.xlu1 %666 }
 0x33f   : > { %v927_v35 = vmul.f32 %v922_v32, %v895_v33  ;;  %v684_v36 = vmul.f32 %v667_v34, %v660_v30  ;;  %944 = vrot.lane.b32.xlu0 %v1125_v31, %s1277_s27 }
 0x341   : > { %v1126_v37 = vpack.c.bf16 %v927_v35, %v927_v35  ;;  %v877_v38 = vadd.f32 %v733_v61, %v684_v36 }
 0x342   : > { %v907_v39 = vpop.permute.xlu0 %906 }
 0x343   : > { %881 = vst.msk [vmem:[#allocation4] sm:$0xff] %vm346_vm0, %v877_v38  ;;  %953 = vrot.lane.b32.xlu1 %v1126_v37, %s1278_s28 }
 0x34a   : > { %v892_v40 = vld [vmem:[#allocation4] sm:$0xff] }
 0x34b   : > { %v924_v41 = vmul.f32 %v907_v39, %v892_v40 }
 0x34d   : > { %v928_v42 = vpack.c.bf16 %v924_v41, %v924_v41 }
 0x34f   : > { %930 = vst.msk [vmem:[%s331_s5] sm:$0xf] %vm929_vm7, %v928_v42 }
 0x3ad   : > { %v936_v44 = vpop.permute.xlu1 %935 }
 0x3ae   : > { %939 = vst.msk [vmem:[%s331_s5] sm:$0xf] %vm938_vm8, %v936_v44 }
 0x3b1   : > { %v945_v46 = vpop.permute.xlu0 %944 }
 0x3b2   : > { %948 = vst.msk [vmem:[%s331_s5] sm:$0xf] %vm947_vm9, %v945_v46 }
 0x3b5   : > { %v954_v48 = vpop.permute.xlu1 %953 }
 0x3b6   : > { %957 = vst.msk [vmem:[%s331_s5] sm:$0xf] %vm956_vm10, %v954_v48 }
 0x3b7 PF: > { %s13_s14 = sadd.s32 1, %s1270_s14   ;;  %s1489_s12 = smov %s1266_s13 }
 0x3b8   : > { %p10_p5 = scmp.ge.s32.totalorder %s13_s14, 4   ;;  %s1490_s13 = smov %s1492_s15 }
 0x3ba   :  { %12 = sbr.rel (!%p10_p5) target bundleno = 2 (0x2), region = 76 }

// kernel: whisper_forward.63
= control target key start
LH: loop header
LB: loop body
LE: loop exit
PB: predicated region body
PF: predicated region fallthrough
CT: control target
= control target key end

     0   :  { %v254_v6 = vmov 0.0   ;;  %vm255_vm0 = vmmov 0   ;;  %s320_s0 = inlined_call_operand.vmem [shape: bf16[16,128], index: 0, kind: input, shape index: {}]   ;;  %s321_s1 = inlined_call_operand.vmem [shape: bf16[128,128], index: 1, kind: input, shape index: {}]   ;;  %s322_s2 = inlined_call_operand.vmem [shape: f32[1,128], index: 2, kind: input, shape index: {}]   ;;  %s323_s3 = inlined_call_operand.vmem [shape: f32[1,128], index: 3, kind: input, shape index: {}]   ;;  %s324_s4 = inlined_call_operand.vmem [shape: f32[16,128], index: 4, kind: output, shape index: {}]  }
   0x1   :  { %v208_v0 = vld [vmem:[%s320_s0] sm:$0xff]   ;;  %220 = vmatprep.subr.bf16.mxu0 %v254_v6  ;;  %v243_v7 = vld [vmem:[%s321_s1 + $0x8] sm:$0xff]   ;;  %v244_v8 = vld [vmem:[%s321_s1 + $0x10] sm:$0xff]   ;;  %236 = vmatprep.mubr.msk.bf16.mxu0 %vm255_vm0, %v254_v6 }
   0x2   :  { %v209_v1 = vunpack.c.l.bf16 %v208_v0  ;;  %v210_v2 = vunpack.c.h.bf16 %v208_v0  ;;  %v242_v5 = vld [vmem:[%s321_s1] sm:$0xff]   ;;  %v245_v9 = vld [vmem:[%s321_s1 + $0x18] sm:$0xff]   ;;  %v247_v11 = vld [vmem:[%s321_s1 + $0x28] sm:$0xff]  }
   0x3   :  { %221 = vmatpush3.bf16.msra.mxu0 %v242_v5  ;;  %v246_v10 = vld [vmem:[%s321_s1 + $0x20] sm:$0xff]   ;;  %v248_v12 = vld [vmem:[%s321_s1 + $0x30] sm:$0xff]   ;;  %v249_v13 = vld [vmem:[%s321_s1 + $0x38] sm:$0xff]  }
   0x4   :  { %28 = vadd.xlane.f32.xlu0 %v209_v1  ;;  %v34_v3 = vmul.f32 %v209_v1, %v209_v1  ;;  %v35_v4 = vmul.f32 %v210_v2, %v210_v2  ;;  %222 = vmatprep.subr.bf16.mxu0 %v254_v6  ;;  %v197_v33 = vld [vmem:[%s322_s2] ss:$0 sm:$0xff] }
   0x5   :  { %v198_v38 = vld [vmem:[%s323_s3] ss:$0 sm:$0xff] }
   0x6   :  { %36 = vadd.xlane.f32.xlu1 %v34_v3 }
   0x7   :  { %223 = vmatpush3.bf16.msra.mxu0 %v243_v7 }
   0x8   :  { %30 = vadd.xlane.f32.xlu0 %v210_v2  ;;  %224 = vmatprep.subr.bf16.mxu0 %v254_v6 }
   0xa   :  { %38 = vadd.xlane.f32.xlu1 %v35_v4 }
   0xb   :  { %225 = vmatpush3.bf16.msra.mxu0 %v244_v8 }
   0xc   :  { %226 = vmatprep.subr.bf16.mxu0 %v254_v6 }
   0xf   :  { %227 = vmatpush3.bf16.msra.mxu0 %v245_v9 }
  0x10   :  { %228 = vmatprep.subr.bf16.mxu0 %v254_v6 }
  0x13   :  { %229 = vmatpush3.bf16.msra.mxu0 %v246_v10 }
  0x14   :  { %230 = vmatprep.subr.bf16.mxu0 %v254_v6 }
  0x17   :  { %231 = vmatpush3.bf16.msra.mxu0 %v247_v11 }
  0x18   :  { %232 = vmatprep.subr.bf16.mxu0 %v254_v6 }
  0x1b   :  { %233 = vmatpush3.bf16.msra.mxu0 %v248_v12 }
  0x1c   :  { %234 = vmatprep.subr.bf16.mxu0 %v254_v6 }
  0x1f   :  { %235 = vmatpush3.bf16.msra.mxu0 %v249_v13 }
  0x91   :  { %v29_v14 = vpop.xlane.xlu0 %28 }
  0x92   :  { %v32_v15 = vmul.f32 0.03125, %v29_v14 }
  0x93   :  { %v37_v16 = vpop.xlane.xlu1 %36 }
  0x94   :  { %v42_v17 = vmul.f32 %v32_v15, %v32_v15  ;;  %v40_v18 = vmul.f32 0.03125, %v37_v16  ;;  %v48_v30 = vsub.f32 %v209_v1, %v32_v15 }
  0x95   :  { %v31_v19 = vpop.xlane.xlu0 %30 }
  0x96   :  { %v44_v20 = vsub.f32 %v40_v18, %v42_v17  ;;  %v33_v21 = vmul.f32 0.03125, %v31_v19 }
  0x97   :  { %v39_v22 = vpop.xlane.xlu1 %38 }
  0x98   :  { %v46_v23 = vmax.f32 %v44_v20, 0.0  ;;  %v43_v24 = vmul.f32 %v33_v21, %v33_v21  ;;  %v41_v25 = vmul.f32 0.03125, %v39_v22  ;;  %v49_v34 = vsub.f32 %v210_v2, %v33_v21 }
  0x9a   :  { %v50_v26 = vadd.f32 1e-05, %v46_v23  ;;  %v45_v27 = vsub.f32 %v41_v25, %v43_v24 }
  0x9c   :  { %250 = vrsqrt.f32 %v50_v26  ;;  %v47_v28 = vmax.f32 %v45_v27, 0.0 }
  0x9e   :  { %v51_v29 = vadd.f32 1e-05, %v47_v28 }
  0xa0   :  { %252 = vrsqrt.f32 %v51_v29 }
  0xa6   :  { %v251_v31 = vpop.eup %250 }
  0xa7   :  { %v54_v32 = vmul.f32 %v251_v31, %v48_v30 }
  0xa9   :  { %v63_v37 = vmul.f32 %v197_v33, %v54_v32 }
  0xaa   :  { %v253_v35 = vpop.eup %252 }
  0xab   :  { %v55_v36 = vmul.f32 %v253_v35, %v49_v34  ;;  %v72_v40 = vadd.f32 %v198_v38, %v63_v37 }
  0xad   :  { %v64_v39 = vmul.f32 %v197_v33, %v55_v36 }
  0xaf   :  { %v73_v41 = vadd.f32 %v198_v38, %v64_v39 }
  0xb1   :  { %v74_v42 = vpack.c.bf16 %v73_v41, %v72_v40 }
  0xb3   :  { %237 = vmatmul.mubr.bf16.vlgmr.msra.gmra.mrb[0].mxu0 %v74_v42 }
 0x186   :  { %v175_v43 = vpop.f32.mrb[0].mxu0 }
 0x187   :  { %191 = vst [vmem:[%s324_s4] sm:$0xff] %v175_v43  ;;  %v238_v44 = vpop.f32.mrb[1].mxu0 }
 0x188   :  { %v178_v45 = vpop.f32.mrb[2].mxu0 }
 0x189   :  { %192 = vst [vmem:[%s324_s4 + $0x8] sm:$0xff] %v178_v45  ;;  %v239_v46 = vpop.f32.mrb[3].mxu0 }

</bundles_post_ra>
